<compile_context>
chip_gen: v7x
topology: tpu7x:2x2x1
jax: 0.10.0
libtpu: 0.0.40
codegen_flags: <defaults>
</compile_context>

<pallas_src>
import math
import functools

import jax
import jax.numpy as jnp
from jax.experimental import pallas as pl
from jax.experimental.pallas import tpu as pltpu


# Attention-block indices into the packed weight stacks.
_ENC_SELF, _ENC_SPD, _DEC_SELF, _DEC_MEM, _DEC_EGO, _DEC_PED = range(6)
# LayerNorm indices: encoder ln1..ln3 -> 0..2, decoder ln1..ln5 -> 3..7.


# ----------------------------- Fused Pallas kernel -----------------------------

def _fused_kernel(x_ref, spd_ref, t_ref, ego_ref, ped_ref,
                  srcm_ref, obdm_ref, spdm_ref, pedm_ref,
                  attn_w_ref, attn_b_ref,
                  ffn_w1_ref, ffn_b1_ref, ffn_w2_ref, ffn_b2_ref,
                  ln_ref, out_ref, *, num_heads, eps):
    D = x_ref.shape[-1]
    H = num_heads
    dk = D // H
    scale = 1.0 / math.sqrt(dk)

    def mha(q_in, kv_in, mask_bool, idx):
        # Packed weights: w = [Wq | Wk | Wv | Wo]  -> (D, 4D), b -> (1, 4D).
        w = attn_w_ref[idx]                    # (D, 4D) static index, no runtime cost
        b = attn_b_ref[idx]                    # (1, 4D)
        q = jnp.dot(q_in, w[:, :D], preferred_element_type=jnp.float32) + b[:, :D]
        kv = jnp.dot(kv_in, w[:, D:3 * D], preferred_element_type=jnp.float32) + b[:, D:3 * D]
        k, v = kv[:, :D], kv[:, D:]
        heads = []
        for h in range(H):                     # static unroll over heads (values stay in vregs)
            sl = slice(h * dk, (h + 1) * dk)
            qh, kh, vh = q[:, sl], k[:, sl], v[:, sl]
            # scores = qh @ kh.T without an explicit transpose
            s = jax.lax.dot_general(qh, kh, (((1,), (1,)), ((), ())),
                                    preferred_element_type=jnp.float32) * scale
            s = jnp.where(mask_bool, s, -1e9)
            m = jnp.max(s, axis=-1, keepdims=True)
            p = jnp.exp(s - m)
            p = p * pl.reciprocal(jnp.sum(p, axis=-1, keepdims=True), approx=True)
            heads.append(jnp.dot(p, vh, preferred_element_type=jnp.float32))
        o = jnp.concatenate(heads, axis=-1)    # (T, D) lane-dense
        return jnp.dot(o, w[:, 3 * D:], preferred_element_type=jnp.float32) + b[:, 3 * D:]

    def add_ln(x, y, idx):
        # LayerNorm(x + y); eps=1e-6 (Annotated-Transformer custom LayerNorm, as used by PIE).
        z = x + y
        mean = jnp.mean(z, axis=-1, keepdims=True)
        var = jnp.mean((z - mean) ** 2, axis=-1, keepdims=True)
        zn = (z - mean) * jax.lax.rsqrt(var + eps)
        gb = ln_ref[idx]                       # (2, D)
        return zn * gb[0:1] + gb[1:2]

    def ffn(x, idx):
        h = jnp.dot(x, ffn_w1_ref[idx], preferred_element_type=jnp.float32) + ffn_b1_ref[idx]
        h = jnp.maximum(h, 0.0)                # h kept in f32 through the second matmul
        return jnp.dot(h, ffn_w2_ref[idx], preferred_element_type=jnp.float32) + ffn_b2_ref[idx]

    # Per-batch activations; everything below lives in VMEM/vregs.
    x = x_ref[0].astype(jnp.float32)
    spd = spd_ref[0].astype(jnp.float32)
    t = t_ref[0].astype(jnp.float32)
    ego = ego_ref[0].astype(jnp.float32)
    ped = ped_ref[0].astype(jnp.float32)
    src_m = srcm_ref[0, 0] > 0
    obd_m = obdm_ref[0, 0] > 0
    spd_m = spdm_ref[0, 0] > 0
    ped_m = pedm_ref[0, 0] > 0

    # ----- encoder layer -----
    h = add_ln(x, mha(x, x, src_m, _ENC_SELF), 0)
    encode = add_ln(h, ffn(h, 0), 1)
    mix = add_ln(encode, mha(encode, spd, obd_m, _ENC_SPD), 2)
    memory = mix + encode                      # decode(): memory = embed + memory

    # ----- decoder layer -----
    Tq = t.shape[0]
    row = jax.lax.broadcasted_iota(jnp.int32, (Tq, Tq), 0)
    col = jax.lax.broadcasted_iota(jnp.int32, (Tq, Tq), 1)
    causal = row >= col                        # causal mask built in-kernel (no HBM mask DMA)

    d = add_ln(t, mha(t, t, causal, _DEC_SELF), 3)
    d = add_ln(d, mha(d, memory, src_m, _DEC_MEM), 4)
    d = add_ln(d, mha(d, ego, spd_m, _DEC_EGO), 5)
    d = add_ln(d, mha(d, ped, ped_m, _DEC_PED), 6)
    d = add_ln(d, ffn(d, 1), 7)

    out_ref[0] = d.astype(out_ref.dtype)


# ----------------------------- Pallas wrapper -----------------------------

def fused_encoder_decoder(x_src, embed_spd, t_tgt, embed_ego, embed_ped,
                          src_mask, obd_mask, spd_mask, ped_mask,
                          packed, *, num_heads, eps=1e-6):
    B, T, D = x_src.shape
    attn_w, attn_b, ffn_w1, ffn_b1, ffn_w2, ffn_b2, ln = packed
    Dff = ffn_w1.shape[-1]

    act_spec = pl.BlockSpec((1, T, D), lambda b: (b, 0, 0))
    mask_spec = pl.BlockSpec((1, 1, T, T), lambda b: (b, 0, 0, 0))

    def rep_spec(a):  # full-array block, replicated across the batch grid
        nd = a.ndim
        return pl.BlockSpec(a.shape, lambda b, _nd=nd: (0,) * _nd)

    acts = (x_src, embed_spd, t_tgt, embed_ego, embed_ped)
    masks = (src_mask, obd_mask, spd_mask, ped_mask)
    weights = (attn_w, attn_b, ffn_w1, ffn_b1, ffn_w2, ffn_b2, ln)

    flops = B * (6 * (8 * T * D * D + 4 * T * T * D) + 8 * T * D * Dff)
    bytes_accessed = sum(int(a.size) * a.dtype.itemsize for a in acts + masks + weights)
    bytes_accessed += B * T * D * x_src.dtype.itemsize
    cost = pl.CostEstimate(flops=int(flops),
                           transcendentals=int(B * 6 * num_heads * T * T),
                           bytes_accessed=int(bytes_accessed))

    return pl.pallas_call(
        functools.partial(_fused_kernel, num_heads=num_heads, eps=eps),
        out_shape=jax.ShapeDtypeStruct((B, T, D), x_src.dtype),
        grid=(B,),
        in_specs=[act_spec] * 5 + [mask_spec] * 4 + [rep_spec(w) for w in weights],
        out_specs=act_spec,
        compiler_params=pltpu.CompilerParams(dimension_semantics=("parallel",)),
        cost_estimate=cost,
    )(*acts, *masks, *weights)


# ----------------------------- JAX glue (embeddings, param packing) -----------------------------

def positional_encoding(T, D):
    pos = jnp.arange(T, dtype=jnp.float32)[:, None]
    div = jnp.exp(jnp.arange(0, D, 2, dtype=jnp.float32) * (-math.log(10000.0) / D))
    pe = jnp.zeros((T, D), jnp.float32)
    pe = pe.at[:, 0::2].set(jnp.sin(pos * div))
    pe = pe.at[:, 1::2].set(jnp.cos(pos * div))
    return pe


def pack_params(params):
    """Pack per-module weights into a handful of stacked arrays for the fused kernel."""
    def pack_attn(p):
        w = jnp.concatenate([p["wq"], p["wk"], p["wv"], p["wo"]], axis=1)    # (D, 4D)
        b = jnp.concatenate([p["bq"], p["bk"], p["bv"], p["bo"]])[None, :]   # (1, 4D)
        return w, b

    enc, dec = params["encoder"], params["decoder"]
    attn_ps = [enc["self_attn"], enc["spd_attn"],
               dec["self_attn"], dec["mem_attn"], dec["ego_attn"], dec["ped_attn"]]
    ws, bs = zip(*(pack_attn(p) for p in attn_ps))
    attn_w = jnp.stack(ws)                                                   # (6, D, 4D)
    attn_b = jnp.stack(bs)                                                   # (6, 1, 4D)

    ffn_w1 = jnp.stack([enc["ffn"]["w1"], dec["ffn"]["w1"]])                 # (2, D, Dff)
    ffn_b1 = jnp.stack([enc["ffn"]["b1"][None, :], dec["ffn"]["b1"][None, :]])   # (2, 1, Dff)
    ffn_w2 = jnp.stack([enc["ffn"]["w2"], dec["ffn"]["w2"]])                 # (2, Dff, D)
    ffn_b2 = jnp.stack([enc["ffn"]["b2"][None, :], dec["ffn"]["b2"][None, :]])   # (2, 1, D)

    lns = [enc["ln1"], enc["ln2"], enc["ln3"],
           dec["ln1"], dec["ln2"], dec["ln3"], dec["ln4"], dec["ln5"]]
    ln = jnp.stack([jnp.stack([p["g"], p["b"]]) for p in lns])               # (8, 2, D)
    return attn_w, attn_b, ffn_w1, ffn_b1, ffn_w2, ffn_b2, ln


def encoder_decoder_forward(params, src, obd_spd, ego_op_flow, ped_op_flow, tgt,
                            src_mask, obd_enc_mask, spd_mask, ped_mask, *, num_heads):
    """Mirrors EncoderDecoder.forward()."""
    D = params["src_embed"]["w"].shape[1]
    B, T, _ = src.shape
    pe = positional_encoding(T, D)

    def embed(x, p):  # tiny K=2..4 linears: leave to XLA (fused into one HLO fusion)
        return jnp.dot(x, p["w"]) + p["b"]

    # embed_spd = enc_extra_embed_I(obd_spd.permute(0, 2, 1)), etc.
    embed_spd = embed(jnp.transpose(obd_spd, (0, 2, 1)), params["enc_extra_embed_I"])
    embed_ego = embed(jnp.transpose(ego_op_flow, (0, 2, 1)), params["enc_extra_embed_II"])
    embed_ped = embed(jnp.transpose(ped_op_flow, (0, 2, 1)), params["enc_extra_embed_III"])
    x_src = embed(src, params["src_embed"]) + pe[None]
    t_tgt = embed(tgt, params["tgt_embed"]) + pe[None]

    packed = pack_params(params)
    out = fused_encoder_decoder(x_src, embed_spd, t_tgt, embed_ego, embed_ped,
                                src_mask, obd_enc_mask, spd_mask, ped_mask,
                                packed, num_heads=num_heads)
    # TODO(synk): self.generator is never invoked inside forward() in the reference module,
    #             so it is intentionally not applied here.
    return out


# ----------------------------- Deterministic parameter init -----------------------------

def _lin_init(key, din, dout, scale=0.05):
    return {"w": scale * jax.random.normal(key, (din, dout), jnp.float32),
            "b": jnp.zeros((dout,), jnp.float32)}


def _mha_init(key, D):
    ks = jax.random.split(key, 4)
    p = {}
    for name, k in zip(("q", "k", "v", "o"), ks):
        lin = _lin_init(k, D, D)
        p["w" + name], p["b" + name] = lin["w"], lin["b"]
    return p


def _ln_init(D):
    return {"g": jnp.ones((D,), jnp.float32), "b": jnp.zeros((D,), jnp.float32)}


def _ffn_init(key, D, Dff):
    k1, k2 = jax.random.split(key)
    l1, l2 = _lin_init(k1, D, Dff), _lin_init(k2, Dff, D)
    return {"w1": l1["w"], "b1": l1["b"], "w2": l2["w"], "b2": l2["b"]}


def init_params(key, *, d_src, d_tgt, d_spd, d_ego, d_ped, D, Dff):
    ks = jax.random.split(key, 16)
    return {
        "src_embed": _lin_init(ks[0], d_src, D),
        "tgt_embed": _lin_init(ks[1], d_tgt, D),
        "enc_extra_embed_I": _lin_init(ks[2], d_spd, D),
        "enc_extra_embed_II": _lin_init(ks[3], d_ego, D),
        "enc_extra_embed_III": _lin_init(ks[4], d_ped, D),
        "encoder": {
            "self_attn": _mha_init(ks[5], D),
            "spd_attn": _mha_init(ks[6], D),
            "ffn": _ffn_init(ks[7], D, Dff),
            "ln1": _ln_init(D), "ln2": _ln_init(D), "ln3": _ln_init(D),
        },
        "decoder": {
            "self_attn": _mha_init(ks[8], D),
            "mem_attn": _mha_init(ks[9], D),
            "ego_attn": _mha_init(ks[10], D),
            "ped_attn": _mha_init(ks[11], D),
            "ffn": _ffn_init(ks[12], D, Dff),
            "ln1": _ln_init(D), "ln2": _ln_init(D), "ln3": _ln_init(D),
            "ln4": _ln_init(D), "ln5": _ln_init(D),
        },
    }


# ----------------------------- Demo -----------------------------

if __name__ == "__main__":
    B, T, D, H, Dff = 2, 8, 32, 4, 64
    d_src, d_tgt, d_spd, d_ego, d_ped = 4, 4, 2, 4, 4

    key = jax.random.PRNGKey(0)
    kp, k1, k2, k3, k4, k5 = jax.random.split(key, 6)

    params = init_params(kp, d_src=d_src, d_tgt=d_tgt, d_spd=d_spd,
                         d_ego=d_ego, d_ped=d_ped, D=D, Dff=Dff)

    # Inputs (PyTorch layout: sequences (B, T, F); extra features channel-first (B, C, T))
    src = jax.random.normal(k1, (B, T, d_src), jnp.float32)
    tgt = jax.random.normal(k2, (B, T, d_tgt), jnp.float32)
    obd_spd = jax.random.normal(k3, (B, d_spd, T), jnp.float32)
    ego_op_flow = jax.random.normal(k4, (B, d_ego, T), jnp.float32)
    ped_op_flow = jax.random.normal(k5, (B, d_ped, T), jnp.float32)

    # attention masks: (B, 1, Tq, Tk), all ones (no padding in this demo)
    src_mask = jnp.ones((B, 1, T, T), jnp.float32)
    obd_enc_mask = jnp.ones((B, 1, T, T), jnp.float32)
    spd_mask = jnp.ones((B, 1, T, T), jnp.float32)
    ped_mask = jnp.ones((B, 1, T, T), jnp.float32)

    fwd = jax.jit(functools.partial(encoder_decoder_forward, num_heads=H))
    out = fwd(params, src, obd_spd, ego_op_flow, ped_op_flow, tgt,
              src_mask, obd_enc_mask, spd_mask, ped_mask)
    out = jax.block_until_ready(out)
    assert out.shape == (B, T, D), out.shape
    assert bool(jnp.all(jnp.isfinite(out)))
    print("KERNEL_OK")
</pallas_src>

<mosaic_0001>
module attributes {stable_mosaic.version = 11 : i64} {
  func.func @_fused_kernel(%arg0: i32, %arg1: memref<1x8x32xf32, #tpu.memory_space<vmem>>, %arg2: memref<1x8x32xf32, #tpu.memory_space<vmem>>, %arg3: memref<1x8x32xf32, #tpu.memory_space<vmem>>, %arg4: memref<1x8x32xf32, #tpu.memory_space<vmem>>, %arg5: memref<1x8x32xf32, #tpu.memory_space<vmem>>, %arg6: memref<1x1x8x8xf32, #tpu.memory_space<vmem>>, %arg7: memref<1x1x8x8xf32, #tpu.memory_space<vmem>>, %arg8: memref<1x1x8x8xf32, #tpu.memory_space<vmem>>, %arg9: memref<1x1x8x8xf32, #tpu.memory_space<vmem>>, %arg10: memref<6x32x128xf32, #tpu.memory_space<vmem>>, %arg11: memref<6x1x128xf32, #tpu.memory_space<vmem>>, %arg12: memref<2x32x64xf32, #tpu.memory_space<vmem>>, %arg13: memref<2x1x64xf32, #tpu.memory_space<vmem>>, %arg14: memref<2x64x32xf32, #tpu.memory_space<vmem>>, %arg15: memref<2x1x32xf32, #tpu.memory_space<vmem>>, %arg16: memref<8x2x32xf32, #tpu.memory_space<vmem>>, %arg17: memref<1x8x32xf32, #tpu.memory_space<vmem>>) attributes {dimension_semantics = [#tpu.dimension_semantics<parallel>], iteration_bounds = array<i64: 2>, scalar_prefetch = 0 : i64, scratch_operands = 0 : i64, tpu.core_type = #tpu.core_type<tc>, window_params = [{transform_indices = @transform_0, window_bounds = array<i64: 1, 8, 32>}, {transform_indices = @transform_1, window_bounds = array<i64: 1, 8, 32>}, {transform_indices = @transform_2, window_bounds = array<i64: 1, 8, 32>}, {transform_indices = @transform_3, window_bounds = array<i64: 1, 8, 32>}, {transform_indices = @transform_4, window_bounds = array<i64: 1, 8, 32>}, {transform_indices = @transform_5, window_bounds = array<i64: 1, 1, 8, 8>}, {transform_indices = @transform_6, window_bounds = array<i64: 1, 1, 8, 8>}, {transform_indices = @transform_7, window_bounds = array<i64: 1, 1, 8, 8>}, {transform_indices = @transform_8, window_bounds = array<i64: 1, 1, 8, 8>}, {pipeline_mode = #tpu.pipeline_mode<synchronous>, transform_indices = @transform_9, window_bounds = array<i64: 6, 32, 128>}, {pipeline_mode = #tpu.pipeline_mode<synchronous>, transform_indices = @transform_10, window_bounds = array<i64: 6, 1, 128>}, {pipeline_mode = #tpu.pipeline_mode<synchronous>, transform_indices = @transform_11, window_bounds = array<i64: 2, 32, 64>}, {pipeline_mode = #tpu.pipeline_mode<synchronous>, transform_indices = @transform_12, window_bounds = array<i64: 2, 1, 64>}, {pipeline_mode = #tpu.pipeline_mode<synchronous>, transform_indices = @transform_13, window_bounds = array<i64: 2, 64, 32>}, {pipeline_mode = #tpu.pipeline_mode<synchronous>, transform_indices = @transform_14, window_bounds = array<i64: 2, 1, 32>}, {pipeline_mode = #tpu.pipeline_mode<synchronous>, transform_indices = @transform_15, window_bounds = array<i64: 8, 2, 32>}, {transform_indices = @transform_16, window_bounds = array<i64: 1, 8, 32>}]} {
    %c0 = arith.constant 0 : index
    %c0_0 = arith.constant 0 : index
    %c0_1 = arith.constant 0 : index
    %0 = vector.load %arg1[%c0, %c0_0, %c0_1] : memref<1x8x32xf32, #tpu.memory_space<vmem>>, vector<1x8x32xf32>
    %1 = vector.shape_cast %0 : vector<1x8x32xf32> to vector<8x32xf32>
    %c0_2 = arith.constant 0 : index
    %c0_3 = arith.constant 0 : index
    %c0_4 = arith.constant 0 : index
    %2 = vector.load %arg2[%c0_2, %c0_3, %c0_4] : memref<1x8x32xf32, #tpu.memory_space<vmem>>, vector<1x8x32xf32>
    %3 = vector.shape_cast %2 : vector<1x8x32xf32> to vector<8x32xf32>
    %c0_5 = arith.constant 0 : index
    %c0_6 = arith.constant 0 : index
    %c0_7 = arith.constant 0 : index
    %4 = vector.load %arg3[%c0_5, %c0_6, %c0_7] : memref<1x8x32xf32, #tpu.memory_space<vmem>>, vector<1x8x32xf32>
    %5 = vector.shape_cast %4 : vector<1x8x32xf32> to vector<8x32xf32>
    %c0_8 = arith.constant 0 : index
    %c0_9 = arith.constant 0 : index
    %c0_10 = arith.constant 0 : index
    %6 = vector.load %arg4[%c0_8, %c0_9, %c0_10] : memref<1x8x32xf32, #tpu.memory_space<vmem>>, vector<1x8x32xf32>
    %7 = vector.shape_cast %6 : vector<1x8x32xf32> to vector<8x32xf32>
    %c0_11 = arith.constant 0 : index
    %c0_12 = arith.constant 0 : index
    %c0_13 = arith.constant 0 : index
    %8 = vector.load %arg5[%c0_11, %c0_12, %c0_13] : memref<1x8x32xf32, #tpu.memory_space<vmem>>, vector<1x8x32xf32>
    %9 = vector.shape_cast %8 : vector<1x8x32xf32> to vector<8x32xf32>
    %c0_14 = arith.constant 0 : index
    %c0_15 = arith.constant 0 : index
    %c0_16 = arith.constant 0 : index
    %c0_17 = arith.constant 0 : index
    %10 = vector.load %arg6[%c0_14, %c0_15, %c0_16, %c0_17] : memref<1x1x8x8xf32, #tpu.memory_space<vmem>>, vector<1x1x8x8xf32>
    %11 = vector.shape_cast %10 : vector<1x1x8x8xf32> to vector<8x8xf32>
    %cst = arith.constant 0.000000e+00 : f32
    %12 = vector.broadcast %cst : f32 to vector<8x8xf32>
    %13 = arith.cmpf ogt, %11, %12 : vector<8x8xf32>
    %c0_18 = arith.constant 0 : index
    %c0_19 = arith.constant 0 : index
    %c0_20 = arith.constant 0 : index
    %c0_21 = arith.constant 0 : index
    %14 = vector.load %arg7[%c0_18, %c0_19, %c0_20, %c0_21] : memref<1x1x8x8xf32, #tpu.memory_space<vmem>>, vector<1x1x8x8xf32>
    %15 = vector.shape_cast %14 : vector<1x1x8x8xf32> to vector<8x8xf32>
    %cst_22 = arith.constant 0.000000e+00 : f32
    %16 = vector.broadcast %cst_22 : f32 to vector<8x8xf32>
    %17 = arith.cmpf ogt, %15, %16 : vector<8x8xf32>
    %c0_23 = arith.constant 0 : index
    %c0_24 = arith.constant 0 : index
    %c0_25 = arith.constant 0 : index
    %c0_26 = arith.constant 0 : index
    %18 = vector.load %arg8[%c0_23, %c0_24, %c0_25, %c0_26] : memref<1x1x8x8xf32, #tpu.memory_space<vmem>>, vector<1x1x8x8xf32>
    %19 = vector.shape_cast %18 : vector<1x1x8x8xf32> to vector<8x8xf32>
    %cst_27 = arith.constant 0.000000e+00 : f32
    %20 = vector.broadcast %cst_27 : f32 to vector<8x8xf32>
    %21 = arith.cmpf ogt, %19, %20 : vector<8x8xf32>
    %c0_28 = arith.constant 0 : index
    %c0_29 = arith.constant 0 : index
    %c0_30 = arith.constant 0 : index
    %c0_31 = arith.constant 0 : index
    %22 = vector.load %arg9[%c0_28, %c0_29, %c0_30, %c0_31] : memref<1x1x8x8xf32, #tpu.memory_space<vmem>>, vector<1x1x8x8xf32>
    %23 = vector.shape_cast %22 : vector<1x1x8x8xf32> to vector<8x8xf32>
    %cst_32 = arith.constant 0.000000e+00 : f32
    %24 = vector.broadcast %cst_32 : f32 to vector<8x8xf32>
    %25 = arith.cmpf ogt, %23, %24 : vector<8x8xf32>
    %c0_33 = arith.constant 0 : index
    %c0_34 = arith.constant 0 : index
    %c0_35 = arith.constant 0 : index
    %26 = vector.load %arg10[%c0_33, %c0_34, %c0_35] : memref<6x32x128xf32, #tpu.memory_space<vmem>>, vector<1x32x128xf32>
    %27 = vector.shape_cast %26 : vector<1x32x128xf32> to vector<32x128xf32>
    %c0_36 = arith.constant 0 : index
    %c0_37 = arith.constant 0 : index
    %c0_38 = arith.constant 0 : index
    %28 = vector.load %arg11[%c0_36, %c0_37, %c0_38] : memref<6x1x128xf32, #tpu.memory_space<vmem>>, vector<1x1x128xf32>
    %29 = vector.shape_cast %28 : vector<1x1x128xf32> to vector<1x128xf32>
    %30 = vector.extract_strided_slice %27 {offsets = [0, 0], sizes = [32, 32], strides = [1, 1]} : vector<32x128xf32> to vector<32x32xf32>
    %cst_39 = arith.constant dense<0.000000e+00> : vector<8x32xf32>
    %31 = tpu.matmul %1, %30, %cst_39 {dimension_numbers = #tpu.dot_dimension_numbers<[1], [0], [0], [1], [0, 0, 1, 1], [], []>} : vector<8x32xf32>, vector<32x32xf32>, vector<8x32xf32> -> vector<8x32xf32>
    %32 = vector.extract_strided_slice %29 {offsets = [0, 0], sizes = [1, 32], strides = [1, 1]} : vector<1x128xf32> to vector<1x32xf32>
    %33 = vector.broadcast %32 : vector<1x32xf32> to vector<8x32xf32>
    %34 = arith.addf %31, %33 : vector<8x32xf32>
    %35 = vector.extract_strided_slice %27 {offsets = [0, 32], sizes = [32, 64], strides = [1, 1]} : vector<32x128xf32> to vector<32x64xf32>
    %cst_40 = arith.constant dense<0.000000e+00> : vector<8x64xf32>
    %36 = tpu.matmul %1, %35, %cst_40 {dimension_numbers = #tpu.dot_dimension_numbers<[1], [0], [0], [1], [0, 0, 1, 1], [], []>} : vector<8x32xf32>, vector<32x64xf32>, vector<8x64xf32> -> vector<8x64xf32>
    %37 = vector.extract_strided_slice %29 {offsets = [0, 32], sizes = [1, 64], strides = [1, 1]} : vector<1x128xf32> to vector<1x64xf32>
    %38 = vector.broadcast %37 : vector<1x64xf32> to vector<8x64xf32>
    %39 = arith.addf %36, %38 : vector<8x64xf32>
    %40 = vector.extract_strided_slice %39 {offsets = [0, 0], sizes = [8, 32], strides = [1, 1]} : vector<8x64xf32> to vector<8x32xf32>
    %41 = vector.extract_strided_slice %39 {offsets = [0, 32], sizes = [8, 32], strides = [1, 1]} : vector<8x64xf32> to vector<8x32xf32>
    %42 = vector.extract_strided_slice %34 {offsets = [0, 0], sizes = [8, 8], strides = [1, 1]} : vector<8x32xf32> to vector<8x8xf32>
    %43 = vector.extract_strided_slice %40 {offsets = [0, 0], sizes = [8, 8], strides = [1, 1]} : vector<8x32xf32> to vector<8x8xf32>
    %44 = vector.extract_strided_slice %41 {offsets = [0, 0], sizes = [8, 8], strides = [1, 1]} : vector<8x32xf32> to vector<8x8xf32>
    %cst_41 = arith.constant dense<0.000000e+00> : vector<8x8xf32>
    %45 = tpu.matmul %42, %43, %cst_41 {dimension_numbers = #tpu.dot_dimension_numbers<[1], [1], [0], [0], [0, 0, 1, 0], [], []>} : vector<8x8xf32>, vector<8x8xf32>, vector<8x8xf32> -> vector<8x8xf32>
    %cst_42 = arith.constant 0.353553385 : f32
    %46 = vector.broadcast %cst_42 : f32 to vector<8x8xf32>
    %47 = arith.mulf %45, %46 : vector<8x8xf32>
    %cst_43 = arith.constant -1.000000e+09 : f32
    %48 = vector.broadcast %cst_43 : f32 to vector<8x8xf32>
    %49 = arith.select %13, %47, %48 : vector<8x8xi1>, vector<8x8xf32>
    %cst_44 = arith.constant dense<0xFF800000> : vector<8xf32>
    %50 = vector.multi_reduction <maximumf>, %49, %cst_44 [1] : vector<8x8xf32> to vector<8xf32>
    %51 = vector.shape_cast %50 : vector<8xf32> to vector<8x1xf32>
    %52 = vector.broadcast %51 : vector<8x1xf32> to vector<8x8xf32>
    %53 = arith.subf %49, %52 : vector<8x8xf32>
    %54 = math.exp %53 : vector<8x8xf32>
    %cst_45 = arith.constant dense<0.000000e+00> : vector<8xf32>
    %55 = vector.multi_reduction <add>, %54, %cst_45 [1] : vector<8x8xf32> to vector<8xf32>
    %56 = vector.shape_cast %55 : vector<8xf32> to vector<8x1xf32>
    %57 = tpu.reciprocal %56 {approx = true} : vector<8x1xf32> -> vector<8x1xf32>
    %58 = vector.broadcast %57 : vector<8x1xf32> to vector<8x8xf32>
    %59 = arith.mulf %54, %58 : vector<8x8xf32>
    %cst_46 = arith.constant dense<0.000000e+00> : vector<8x8xf32>
    %60 = tpu.matmul %59, %44, %cst_46 {dimension_numbers = #tpu.dot_dimension_numbers<[1], [0], [0], [1], [0, 0, 1, 1], [], []>} : vector<8x8xf32>, vector<8x8xf32>, vector<8x8xf32> -> vector<8x8xf32>
    %61 = vector.extract_strided_slice %34 {offsets = [0, 8], sizes = [8, 8], strides = [1, 1]} : vector<8x32xf32> to vector<8x8xf32>
    %62 = vector.extract_strided_slice %40 {offsets = [0, 8], sizes = [8, 8], strides = [1, 1]} : vector<8x32xf32> to vector<8x8xf32>
    %63 = vector.extract_strided_slice %41 {offsets = [0, 8], sizes = [8, 8], strides = [1, 1]} : vector<8x32xf32> to vector<8x8xf32>
    %cst_47 = arith.constant dense<0.000000e+00> : vector<8x8xf32>
    %64 = tpu.matmul %61, %62, %cst_47 {dimension_numbers = #tpu.dot_dimension_numbers<[1], [1], [0], [0], [0, 0, 1, 0], [], []>} : vector<8x8xf32>, vector<8x8xf32>, vector<8x8xf32> -> vector<8x8xf32>
    %cst_48 = arith.constant 0.353553385 : f32
    %65 = vector.broadcast %cst_48 : f32 to vector<8x8xf32>
    %66 = arith.mulf %64, %65 : vector<8x8xf32>
    %cst_49 = arith.constant -1.000000e+09 : f32
    %67 = vector.broadcast %cst_49 : f32 to vector<8x8xf32>
    %68 = arith.select %13, %66, %67 : vector<8x8xi1>, vector<8x8xf32>
    %cst_50 = arith.constant dense<0xFF800000> : vector<8xf32>
    %69 = vector.multi_reduction <maximumf>, %68, %cst_50 [1] : vector<8x8xf32> to vector<8xf32>
    %70 = vector.shape_cast %69 : vector<8xf32> to vector<8x1xf32>
    %71 = vector.broadcast %70 : vector<8x1xf32> to vector<8x8xf32>
    %72 = arith.subf %68, %71 : vector<8x8xf32>
    %73 = math.exp %72 : vector<8x8xf32>
    %cst_51 = arith.constant dense<0.000000e+00> : vector<8xf32>
    %74 = vector.multi_reduction <add>, %73, %cst_51 [1] : vector<8x8xf32> to vector<8xf32>
    %75 = vector.shape_cast %74 : vector<8xf32> to vector<8x1xf32>
    %76 = tpu.reciprocal %75 {approx = true} : vector<8x1xf32> -> vector<8x1xf32>
    %77 = vector.broadcast %76 : vector<8x1xf32> to vector<8x8xf32>
    %78 = arith.mulf %73, %77 : vector<8x8xf32>
    %cst_52 = arith.constant dense<0.000000e+00> : vector<8x8xf32>
    %79 = tpu.matmul %78, %63, %cst_52 {dimension_numbers = #tpu.dot_dimension_numbers<[1], [0], [0], [1], [0, 0, 1, 1], [], []>} : vector<8x8xf32>, vector<8x8xf32>, vector<8x8xf32> -> vector<8x8xf32>
    %80 = vector.extract_strided_slice %34 {offsets = [0, 16], sizes = [8, 8], strides = [1, 1]} : vector<8x32xf32> to vector<8x8xf32>
    %81 = vector.extract_strided_slice %40 {offsets = [0, 16], sizes = [8, 8], strides = [1, 1]} : vector<8x32xf32> to vector<8x8xf32>
    %82 = vector.extract_strided_slice %41 {offsets = [0, 16], sizes = [8, 8], strides = [1, 1]} : vector<8x32xf32> to vector<8x8xf32>
    %cst_53 = arith.constant dense<0.000000e+00> : vector<8x8xf32>
    %83 = tpu.matmul %80, %81, %cst_53 {dimension_numbers = #tpu.dot_dimension_numbers<[1], [1], [0], [0], [0, 0, 1, 0], [], []>} : vector<8x8xf32>, vector<8x8xf32>, vector<8x8xf32> -> vector<8x8xf32>
    %cst_54 = arith.constant 0.353553385 : f32
    %84 = vector.broadcast %cst_54 : f32 to vector<8x8xf32>
    %85 = arith.mulf %83, %84 : vector<8x8xf32>
    %cst_55 = arith.constant -1.000000e+09 : f32
    %86 = vector.broadcast %cst_55 : f32 to vector<8x8xf32>
    %87 = arith.select %13, %85, %86 : vector<8x8xi1>, vector<8x8xf32>
    %cst_56 = arith.constant dense<0xFF800000> : vector<8xf32>
    %88 = vector.multi_reduction <maximumf>, %87, %cst_56 [1] : vector<8x8xf32> to vector<8xf32>
    %89 = vector.shape_cast %88 : vector<8xf32> to vector<8x1xf32>
    %90 = vector.broadcast %89 : vector<8x1xf32> to vector<8x8xf32>
    %91 = arith.subf %87, %90 : vector<8x8xf32>
    %92 = math.exp %91 : vector<8x8xf32>
    %cst_57 = arith.constant dense<0.000000e+00> : vector<8xf32>
    %93 = vector.multi_reduction <add>, %92, %cst_57 [1] : vector<8x8xf32> to vector<8xf32>
    %94 = vector.shape_cast %93 : vector<8xf32> to vector<8x1xf32>
    %95 = tpu.reciprocal %94 {approx = true} : vector<8x1xf32> -> vector<8x1xf32>
    %96 = vector.broadcast %95 : vector<8x1xf32> to vector<8x8xf32>
    %97 = arith.mulf %92, %96 : vector<8x8xf32>
    %cst_58 = arith.constant dense<0.000000e+00> : vector<8x8xf32>
    %98 = tpu.matmul %97, %82, %cst_58 {dimension_numbers = #tpu.dot_dimension_numbers<[1], [0], [0], [1], [0, 0, 1, 1], [], []>} : vector<8x8xf32>, vector<8x8xf32>, vector<8x8xf32> -> vector<8x8xf32>
    %99 = vector.extract_strided_slice %34 {offsets = [0, 24], sizes = [8, 8], strides = [1, 1]} : vector<8x32xf32> to vector<8x8xf32>
    %100 = vector.extract_strided_slice %40 {offsets = [0, 24], sizes = [8, 8], strides = [1, 1]} : vector<8x32xf32> to vector<8x8xf32>
    %101 = vector.extract_strided_slice %41 {offsets = [0, 24], sizes = [8, 8], strides = [1, 1]} : vector<8x32xf32> to vector<8x8xf32>
    %cst_59 = arith.constant dense<0.000000e+00> : vector<8x8xf32>
    %102 = tpu.matmul %99, %100, %cst_59 {dimension_numbers = #tpu.dot_dimension_numbers<[1], [1], [0], [0], [0, 0, 1, 0], [], []>} : vector<8x8xf32>, vector<8x8xf32>, vector<8x8xf32> -> vector<8x8xf32>
    %cst_60 = arith.constant 0.353553385 : f32
    %103 = vector.broadcast %cst_60 : f32 to vector<8x8xf32>
    %104 = arith.mulf %102, %103 : vector<8x8xf32>
    %cst_61 = arith.constant -1.000000e+09 : f32
    %105 = vector.broadcast %cst_61 : f32 to vector<8x8xf32>
    %106 = arith.select %13, %104, %105 : vector<8x8xi1>, vector<8x8xf32>
    %cst_62 = arith.constant dense<0xFF800000> : vector<8xf32>
    %107 = vector.multi_reduction <maximumf>, %106, %cst_62 [1] : vector<8x8xf32> to vector<8xf32>
    %108 = vector.shape_cast %107 : vector<8xf32> to vector<8x1xf32>
    %109 = vector.broadcast %108 : vector<8x1xf32> to vector<8x8xf32>
    %110 = arith.subf %106, %109 : vector<8x8xf32>
    %111 = math.exp %110 : vector<8x8xf32>
    %cst_63 = arith.constant dense<0.000000e+00> : vector<8xf32>
    %112 = vector.multi_reduction <add>, %111, %cst_63 [1] : vector<8x8xf32> to vector<8xf32>
    %113 = vector.shape_cast %112 : vector<8xf32> to vector<8x1xf32>
    %114 = tpu.reciprocal %113 {approx = true} : vector<8x1xf32> -> vector<8x1xf32>
    %115 = vector.broadcast %114 : vector<8x1xf32> to vector<8x8xf32>
    %116 = arith.mulf %111, %115 : vector<8x8xf32>
    %cst_64 = arith.constant dense<0.000000e+00> : vector<8x8xf32>
    %117 = tpu.matmul %116, %101, %cst_64 {dimension_numbers = #tpu.dot_dimension_numbers<[1], [0], [0], [1], [0, 0, 1, 1], [], []>} : vector<8x8xf32>, vector<8x8xf32>, vector<8x8xf32> -> vector<8x8xf32>
    %118 = tpu.concatenate %60, %79, %98, %117 in 1 : vector<8x8xf32>, vector<8x8xf32>, vector<8x8xf32>, vector<8x8xf32> -> vector<8x32xf32>
    %119 = vector.extract_strided_slice %27 {offsets = [0, 96], sizes = [32, 32], strides = [1, 1]} : vector<32x128xf32> to vector<32x32xf32>
    %cst_65 = arith.constant dense<0.000000e+00> : vector<8x32xf32>
    %120 = tpu.matmul %118, %119, %cst_65 {dimension_numbers = #tpu.dot_dimension_numbers<[1], [0], [0], [1], [0, 0, 1, 1], [], []>} : vector<8x32xf32>, vector<32x32xf32>, vector<8x32xf32> -> vector<8x32xf32>
    %121 = vector.extract_strided_slice %29 {offsets = [0, 96], sizes = [1, 32], strides = [1, 1]} : vector<1x128xf32> to vector<1x32xf32>
    %122 = vector.broadcast %121 : vector<1x32xf32> to vector<8x32xf32>
    %123 = arith.addf %120, %122 : vector<8x32xf32>
    %124 = arith.addf %1, %123 : vector<8x32xf32>
    %cst_66 = arith.constant dense<0.000000e+00> : vector<8xf32>
    %125 = vector.multi_reduction <add>, %124, %cst_66 [1] : vector<8x32xf32> to vector<8xf32>
    %126 = vector.shape_cast %125 : vector<8xf32> to vector<8x1xf32>
    %cst_67 = arith.constant 3.200000e+01 : f32
    %127 = vector.broadcast %cst_67 : f32 to vector<8x1xf32>
    %128 = arith.divf %126, %127 : vector<8x1xf32>
    %129 = vector.broadcast %128 : vector<8x1xf32> to vector<8x32xf32>
    %130 = arith.subf %124, %129 : vector<8x32xf32>
    %131 = arith.mulf %130, %130 : vector<8x32xf32>
    %cst_68 = arith.constant dense<0.000000e+00> : vector<8xf32>
    %132 = vector.multi_reduction <add>, %131, %cst_68 [1] : vector<8x32xf32> to vector<8xf32>
    %133 = vector.shape_cast %132 : vector<8xf32> to vector<8x1xf32>
    %cst_69 = arith.constant 3.200000e+01 : f32
    %134 = vector.broadcast %cst_69 : f32 to vector<8x1xf32>
    %135 = arith.divf %133, %134 : vector<8x1xf32>
    %136 = vector.broadcast %128 : vector<8x1xf32> to vector<8x32xf32>
    %137 = arith.subf %124, %136 : vector<8x32xf32>
    %cst_70 = arith.constant 9.99999997E-7 : f32
    %138 = vector.broadcast %cst_70 : f32 to vector<8x1xf32>
    %139 = arith.addf %135, %138 : vector<8x1xf32>
    %140 = math.rsqrt %139 : vector<8x1xf32>
    %141 = vector.broadcast %140 : vector<8x1xf32> to vector<8x32xf32>
    %142 = arith.mulf %137, %141 : vector<8x32xf32>
    %c0_71 = arith.constant 0 : index
    %c0_72 = arith.constant 0 : index
    %c0_73 = arith.constant 0 : index
    %143 = vector.load %arg16[%c0_71, %c0_72, %c0_73] : memref<8x2x32xf32, #tpu.memory_space<vmem>>, vector<1x2x32xf32>
    %144 = vector.shape_cast %143 : vector<1x2x32xf32> to vector<2x32xf32>
    %145 = vector.extract_strided_slice %144 {offsets = [0, 0], sizes = [1, 32], strides = [1, 1]} : vector<2x32xf32> to vector<1x32xf32>
    %146 = vector.broadcast %145 : vector<1x32xf32> to vector<8x32xf32>
    %147 = arith.mulf %142, %146 : vector<8x32xf32>
    %148 = vector.extract_strided_slice %144 {offsets = [1, 0], sizes = [1, 32], strides = [1, 1]} : vector<2x32xf32> to vector<1x32xf32>
    %149 = vector.broadcast %148 : vector<1x32xf32> to vector<8x32xf32>
    %150 = arith.addf %147, %149 : vector<8x32xf32>
    %c0_74 = arith.constant 0 : index
    %c0_75 = arith.constant 0 : index
    %c0_76 = arith.constant 0 : index
    %151 = vector.load %arg12[%c0_74, %c0_75, %c0_76] : memref<2x32x64xf32, #tpu.memory_space<vmem>>, vector<1x32x64xf32>
    %152 = vector.shape_cast %151 : vector<1x32x64xf32> to vector<32x64xf32>
    %cst_77 = arith.constant dense<0.000000e+00> : vector<8x64xf32>
    %153 = tpu.matmul %150, %152, %cst_77 {dimension_numbers = #tpu.dot_dimension_numbers<[1], [0], [0], [1], [0, 0, 1, 1], [], []>} : vector<8x32xf32>, vector<32x64xf32>, vector<8x64xf32> -> vector<8x64xf32>
    %c0_78 = arith.constant 0 : index
    %c0_79 = arith.constant 0 : index
    %c0_80 = arith.constant 0 : index
    %154 = vector.load %arg13[%c0_78, %c0_79, %c0_80] : memref<2x1x64xf32, #tpu.memory_space<vmem>>, vector<1x1x64xf32>
    %155 = vector.shape_cast %154 : vector<1x1x64xf32> to vector<1x64xf32>
    %156 = vector.broadcast %155 : vector<1x64xf32> to vector<8x64xf32>
    %157 = arith.addf %153, %156 : vector<8x64xf32>
    %cst_81 = arith.constant 0.000000e+00 : f32
    %158 = vector.broadcast %cst_81 : f32 to vector<8x64xf32>
    %159 = arith.maximumf %157, %158 : vector<8x64xf32>
    %c0_82 = arith.constant 0 : index
    %c0_83 = arith.constant 0 : index
    %c0_84 = arith.constant 0 : index
    %160 = vector.load %arg14[%c0_82, %c0_83, %c0_84] : memref<2x64x32xf32, #tpu.memory_space<vmem>>, vector<1x64x32xf32>
    %161 = vector.shape_cast %160 : vector<1x64x32xf32> to vector<64x32xf32>
    %cst_85 = arith.constant dense<0.000000e+00> : vector<8x32xf32>
    %162 = tpu.matmul %159, %161, %cst_85 {dimension_numbers = #tpu.dot_dimension_numbers<[1], [0], [0], [1], [0, 0, 1, 1], [], []>} : vector<8x64xf32>, vector<64x32xf32>, vector<8x32xf32> -> vector<8x32xf32>
    %c0_86 = arith.constant 0 : index
    %c0_87 = arith.constant 0 : index
    %c0_88 = arith.constant 0 : index
    %163 = vector.load %arg15[%c0_86, %c0_87, %c0_88] : memref<2x1x32xf32, #tpu.memory_space<vmem>>, vector<1x1x32xf32>
    %164 = vector.shape_cast %163 : vector<1x1x32xf32> to vector<1x32xf32>
    %165 = vector.broadcast %164 : vector<1x32xf32> to vector<8x32xf32>
    %166 = arith.addf %162, %165 : vector<8x32xf32>
    %167 = arith.addf %150, %166 : vector<8x32xf32>
    %cst_89 = arith.constant dense<0.000000e+00> : vector<8xf32>
    %168 = vector.multi_reduction <add>, %167, %cst_89 [1] : vector<8x32xf32> to vector<8xf32>
    %169 = vector.shape_cast %168 : vector<8xf32> to vector<8x1xf32>
    %cst_90 = arith.constant 3.200000e+01 : f32
    %170 = vector.broadcast %cst_90 : f32 to vector<8x1xf32>
    %171 = arith.divf %169, %170 : vector<8x1xf32>
    %172 = vector.broadcast %171 : vector<8x1xf32> to vector<8x32xf32>
    %173 = arith.subf %167, %172 : vector<8x32xf32>
    %174 = arith.mulf %173, %173 : vector<8x32xf32>
    %cst_91 = arith.constant dense<0.000000e+00> : vector<8xf32>
    %175 = vector.multi_reduction <add>, %174, %cst_91 [1] : vector<8x32xf32> to vector<8xf32>
    %176 = vector.shape_cast %175 : vector<8xf32> to vector<8x1xf32>
    %cst_92 = arith.constant 3.200000e+01 : f32
    %177 = vector.broadcast %cst_92 : f32 to vector<8x1xf32>
    %178 = arith.divf %176, %177 : vector<8x1xf32>
    %179 = vector.broadcast %171 : vector<8x1xf32> to vector<8x32xf32>
    %180 = arith.subf %167, %179 : vector<8x32xf32>
    %cst_93 = arith.constant 9.99999997E-7 : f32
    %181 = vector.broadcast %cst_93 : f32 to vector<8x1xf32>
    %182 = arith.addf %178, %181 : vector<8x1xf32>
    %183 = math.rsqrt %182 : vector<8x1xf32>
    %184 = vector.broadcast %183 : vector<8x1xf32> to vector<8x32xf32>
    %185 = arith.mulf %180, %184 : vector<8x32xf32>
    %c1 = arith.constant 1 : index
    %c0_94 = arith.constant 0 : index
    %c0_95 = arith.constant 0 : index
    %186 = vector.load %arg16[%c1, %c0_94, %c0_95] : memref<8x2x32xf32, #tpu.memory_space<vmem>>, vector<1x2x32xf32>
    %187 = vector.shape_cast %186 : vector<1x2x32xf32> to vector<2x32xf32>
    %188 = vector.extract_strided_slice %187 {offsets = [0, 0], sizes = [1, 32], strides = [1, 1]} : vector<2x32xf32> to vector<1x32xf32>
    %189 = vector.broadcast %188 : vector<1x32xf32> to vector<8x32xf32>
    %190 = arith.mulf %185, %189 : vector<8x32xf32>
    %191 = vector.extract_strided_slice %187 {offsets = [1, 0], sizes = [1, 32], strides = [1, 1]} : vector<2x32xf32> to vector<1x32xf32>
    %192 = vector.broadcast %191 : vector<1x32xf32> to vector<8x32xf32>
    %193 = arith.addf %190, %192 : vector<8x32xf32>
    %c1_96 = arith.constant 1 : index
    %c0_97 = arith.constant 0 : index
    %c0_98 = arith.constant 0 : index
    %194 = vector.load %arg10[%c1_96, %c0_97, %c0_98] : memref<6x32x128xf32, #tpu.memory_space<vmem>>, vector<1x32x128xf32>
    %195 = vector.shape_cast %194 : vector<1x32x128xf32> to vector<32x128xf32>
    %c1_99 = arith.constant 1 : index
    %c0_100 = arith.constant 0 : index
    %c0_101 = arith.constant 0 : index
    %196 = vector.load %arg11[%c1_99, %c0_100, %c0_101] : memref<6x1x128xf32, #tpu.memory_space<vmem>>, vector<1x1x128xf32>
    %197 = vector.shape_cast %196 : vector<1x1x128xf32> to vector<1x128xf32>
    %198 = vector.extract_strided_slice %195 {offsets = [0, 0], sizes = [32, 32], strides = [1, 1]} : vector<32x128xf32> to vector<32x32xf32>
    %cst_102 = arith.constant dense<0.000000e+00> : vector<8x32xf32>
    %199 = tpu.matmul %193, %198, %cst_102 {dimension_numbers = #tpu.dot_dimension_numbers<[1], [0], [0], [1], [0, 0, 1, 1], [], []>} : vector<8x32xf32>, vector<32x32xf32>, vector<8x32xf32> -> vector<8x32xf32>
    %200 = vector.extract_strided_slice %197 {offsets = [0, 0], sizes = [1, 32], strides = [1, 1]} : vector<1x128xf32> to vector<1x32xf32>
    %201 = vector.broadcast %200 : vector<1x32xf32> to vector<8x32xf32>
    %202 = arith.addf %199, %201 : vector<8x32xf32>
    %203 = vector.extract_strided_slice %195 {offsets = [0, 32], sizes = [32, 64], strides = [1, 1]} : vector<32x128xf32> to vector<32x64xf32>
    %cst_103 = arith.constant dense<0.000000e+00> : vector<8x64xf32>
    %204 = tpu.matmul %3, %203, %cst_103 {dimension_numbers = #tpu.dot_dimension_numbers<[1], [0], [0], [1], [0, 0, 1, 1], [], []>} : vector<8x32xf32>, vector<32x64xf32>, vector<8x64xf32> -> vector<8x64xf32>
    %205 = vector.extract_strided_slice %197 {offsets = [0, 32], sizes = [1, 64], strides = [1, 1]} : vector<1x128xf32> to vector<1x64xf32>
    %206 = vector.broadcast %205 : vector<1x64xf32> to vector<8x64xf32>
    %207 = arith.addf %204, %206 : vector<8x64xf32>
    %208 = vector.extract_strided_slice %207 {offsets = [0, 0], sizes = [8, 32], strides = [1, 1]} : vector<8x64xf32> to vector<8x32xf32>
    %209 = vector.extract_strided_slice %207 {offsets = [0, 32], sizes = [8, 32], strides = [1, 1]} : vector<8x64xf32> to vector<8x32xf32>
    %210 = vector.extract_strided_slice %202 {offsets = [0, 0], sizes = [8, 8], strides = [1, 1]} : vector<8x32xf32> to vector<8x8xf32>
    %211 = vector.extract_strided_slice %208 {offsets = [0, 0], sizes = [8, 8], strides = [1, 1]} : vector<8x32xf32> to vector<8x8xf32>
    %212 = vector.extract_strided_slice %209 {offsets = [0, 0], sizes = [8, 8], strides = [1, 1]} : vector<8x32xf32> to vector<8x8xf32>
    %cst_104 = arith.constant dense<0.000000e+00> : vector<8x8xf32>
    %213 = tpu.matmul %210, %211, %cst_104 {dimension_numbers = #tpu.dot_dimension_numbers<[1], [1], [0], [0], [0, 0, 1, 0], [], []>} : vector<8x8xf32>, vector<8x8xf32>, vector<8x8xf32> -> vector<8x8xf32>
    %cst_105 = arith.constant 0.353553385 : f32
    %214 = vector.broadcast %cst_105 : f32 to vector<8x8xf32>
    %215 = arith.mulf %213, %214 : vector<8x8xf32>
    %cst_106 = arith.constant -1.000000e+09 : f32
    %216 = vector.broadcast %cst_106 : f32 to vector<8x8xf32>
    %217 = arith.select %17, %215, %216 : vector<8x8xi1>, vector<8x8xf32>
    %cst_107 = arith.constant dense<0xFF800000> : vector<8xf32>
    %218 = vector.multi_reduction <maximumf>, %217, %cst_107 [1] : vector<8x8xf32> to vector<8xf32>
    %219 = vector.shape_cast %218 : vector<8xf32> to vector<8x1xf32>
    %220 = vector.broadcast %219 : vector<8x1xf32> to vector<8x8xf32>
    %221 = arith.subf %217, %220 : vector<8x8xf32>
    %222 = math.exp %221 : vector<8x8xf32>
    %cst_108 = arith.constant dense<0.000000e+00> : vector<8xf32>
    %223 = vector.multi_reduction <add>, %222, %cst_108 [1] : vector<8x8xf32> to vector<8xf32>
    %224 = vector.shape_cast %223 : vector<8xf32> to vector<8x1xf32>
    %225 = tpu.reciprocal %224 {approx = true} : vector<8x1xf32> -> vector<8x1xf32>
    %226 = vector.broadcast %225 : vector<8x1xf32> to vector<8x8xf32>
    %227 = arith.mulf %222, %226 : vector<8x8xf32>
    %cst_109 = arith.constant dense<0.000000e+00> : vector<8x8xf32>
    %228 = tpu.matmul %227, %212, %cst_109 {dimension_numbers = #tpu.dot_dimension_numbers<[1], [0], [0], [1], [0, 0, 1, 1], [], []>} : vector<8x8xf32>, vector<8x8xf32>, vector<8x8xf32> -> vector<8x8xf32>
    %229 = vector.extract_strided_slice %202 {offsets = [0, 8], sizes = [8, 8], strides = [1, 1]} : vector<8x32xf32> to vector<8x8xf32>
    %230 = vector.extract_strided_slice %208 {offsets = [0, 8], sizes = [8, 8], strides = [1, 1]} : vector<8x32xf32> to vector<8x8xf32>
    %231 = vector.extract_strided_slice %209 {offsets = [0, 8], sizes = [8, 8], strides = [1, 1]} : vector<8x32xf32> to vector<8x8xf32>
    %cst_110 = arith.constant dense<0.000000e+00> : vector<8x8xf32>
    %232 = tpu.matmul %229, %230, %cst_110 {dimension_numbers = #tpu.dot_dimension_numbers<[1], [1], [0], [0], [0, 0, 1, 0], [], []>} : vector<8x8xf32>, vector<8x8xf32>, vector<8x8xf32> -> vector<8x8xf32>
    %cst_111 = arith.constant 0.353553385 : f32
    %233 = vector.broadcast %cst_111 : f32 to vector<8x8xf32>
    %234 = arith.mulf %232, %233 : vector<8x8xf32>
    %cst_112 = arith.constant -1.000000e+09 : f32
    %235 = vector.broadcast %cst_112 : f32 to vector<8x8xf32>
    %236 = arith.select %17, %234, %235 : vector<8x8xi1>, vector<8x8xf32>
    %cst_113 = arith.constant dense<0xFF800000> : vector<8xf32>
    %237 = vector.multi_reduction <maximumf>, %236, %cst_113 [1] : vector<8x8xf32> to vector<8xf32>
    %238 = vector.shape_cast %237 : vector<8xf32> to vector<8x1xf32>
    %239 = vector.broadcast %238 : vector<8x1xf32> to vector<8x8xf32>
    %240 = arith.subf %236, %239 : vector<8x8xf32>
    %241 = math.exp %240 : vector<8x8xf32>
    %cst_114 = arith.constant dense<0.000000e+00> : vector<8xf32>
    %242 = vector.multi_reduction <add>, %241, %cst_114 [1] : vector<8x8xf32> to vector<8xf32>
    %243 = vector.shape_cast %242 : vector<8xf32> to vector<8x1xf32>
    %244 = tpu.reciprocal %243 {approx = true} : vector<8x1xf32> -> vector<8x1xf32>
    %245 = vector.broadcast %244 : vector<8x1xf32> to vector<8x8xf32>
    %246 = arith.mulf %241, %245 : vector<8x8xf32>
    %cst_115 = arith.constant dense<0.000000e+00> : vector<8x8xf32>
    %247 = tpu.matmul %246, %231, %cst_115 {dimension_numbers = #tpu.dot_dimension_numbers<[1], [0], [0], [1], [0, 0, 1, 1], [], []>} : vector<8x8xf32>, vector<8x8xf32>, vector<8x8xf32> -> vector<8x8xf32>
    %248 = vector.extract_strided_slice %202 {offsets = [0, 16], sizes = [8, 8], strides = [1, 1]} : vector<8x32xf32> to vector<8x8xf32>
    %249 = vector.extract_strided_slice %208 {offsets = [0, 16], sizes = [8, 8], strides = [1, 1]} : vector<8x32xf32> to vector<8x8xf32>
    %250 = vector.extract_strided_slice %209 {offsets = [0, 16], sizes = [8, 8], strides = [1, 1]} : vector<8x32xf32> to vector<8x8xf32>
    %cst_116 = arith.constant dense<0.000000e+00> : vector<8x8xf32>
    %251 = tpu.matmul %248, %249, %cst_116 {dimension_numbers = #tpu.dot_dimension_numbers<[1], [1], [0], [0], [0, 0, 1, 0], [], []>} : vector<8x8xf32>, vector<8x8xf32>, vector<8x8xf32> -> vector<8x8xf32>
    %cst_117 = arith.constant 0.353553385 : f32
    %252 = vector.broadcast %cst_117 : f32 to vector<8x8xf32>
    %253 = arith.mulf %251, %252 : vector<8x8xf32>
    %cst_118 = arith.constant -1.000000e+09 : f32
    %254 = vector.broadcast %cst_118 : f32 to vector<8x8xf32>
    %255 = arith.select %17, %253, %254 : vector<8x8xi1>, vector<8x8xf32>
    %cst_119 = arith.constant dense<0xFF800000> : vector<8xf32>
    %256 = vector.multi_reduction <maximumf>, %255, %cst_119 [1] : vector<8x8xf32> to vector<8xf32>
    %257 = vector.shape_cast %256 : vector<8xf32> to vector<8x1xf32>
    %258 = vector.broadcast %257 : vector<8x1xf32> to vector<8x8xf32>
    %259 = arith.subf %255, %258 : vector<8x8xf32>
    %260 = math.exp %259 : vector<8x8xf32>
    %cst_120 = arith.constant dense<0.000000e+00> : vector<8xf32>
    %261 = vector.multi_reduction <add>, %260, %cst_120 [1] : vector<8x8xf32> to vector<8xf32>
    %262 = vector.shape_cast %261 : vector<8xf32> to vector<8x1xf32>
    %263 = tpu.reciprocal %262 {approx = true} : vector<8x1xf32> -> vector<8x1xf32>
    %264 = vector.broadcast %263 : vector<8x1xf32> to vector<8x8xf32>
    %265 = arith.mulf %260, %264 : vector<8x8xf32>
    %cst_121 = arith.constant dense<0.000000e+00> : vector<8x8xf32>
    %266 = tpu.matmul %265, %250, %cst_121 {dimension_numbers = #tpu.dot_dimension_numbers<[1], [0], [0], [1], [0, 0, 1, 1], [], []>} : vector<8x8xf32>, vector<8x8xf32>, vector<8x8xf32> -> vector<8x8xf32>
    %267 = vector.extract_strided_slice %202 {offsets = [0, 24], sizes = [8, 8], strides = [1, 1]} : vector<8x32xf32> to vector<8x8xf32>
    %268 = vector.extract_strided_slice %208 {offsets = [0, 24], sizes = [8, 8], strides = [1, 1]} : vector<8x32xf32> to vector<8x8xf32>
    %269 = vector.extract_strided_slice %209 {offsets = [0, 24], sizes = [8, 8], strides = [1, 1]} : vector<8x32xf32> to vector<8x8xf32>
    %cst_122 = arith.constant dense<0.000000e+00> : vector<8x8xf32>
    %270 = tpu.matmul %267, %268, %cst_122 {dimension_numbers = #tpu.dot_dimension_numbers<[1], [1], [0], [0], [0, 0, 1, 0], [], []>} : vector<8x8xf32>, vector<8x8xf32>, vector<8x8xf32> -> vector<8x8xf32>
    %cst_123 = arith.constant 0.353553385 : f32
    %271 = vector.broadcast %cst_123 : f32 to vector<8x8xf32>
    %272 = arith.mulf %270, %271 : vector<8x8xf32>
    %cst_124 = arith.constant -1.000000e+09 : f32
    %273 = vector.broadcast %cst_124 : f32 to vector<8x8xf32>
    %274 = arith.select %17, %272, %273 : vector<8x8xi1>, vector<8x8xf32>
    %cst_125 = arith.constant dense<0xFF800000> : vector<8xf32>
    %275 = vector.multi_reduction <maximumf>, %274, %cst_125 [1] : vector<8x8xf32> to vector<8xf32>
    %276 = vector.shape_cast %275 : vector<8xf32> to vector<8x1xf32>
    %277 = vector.broadcast %276 : vector<8x1xf32> to vector<8x8xf32>
    %278 = arith.subf %274, %277 : vector<8x8xf32>
    %279 = math.exp %278 : vector<8x8xf32>
    %cst_126 = arith.constant dense<0.000000e+00> : vector<8xf32>
    %280 = vector.multi_reduction <add>, %279, %cst_126 [1] : vector<8x8xf32> to vector<8xf32>
    %281 = vector.shape_cast %280 : vector<8xf32> to vector<8x1xf32>
    %282 = tpu.reciprocal %281 {approx = true} : vector<8x1xf32> -> vector<8x1xf32>
    %283 = vector.broadcast %282 : vector<8x1xf32> to vector<8x8xf32>
    %284 = arith.mulf %279, %283 : vector<8x8xf32>
    %cst_127 = arith.constant dense<0.000000e+00> : vector<8x8xf32>
    %285 = tpu.matmul %284, %269, %cst_127 {dimension_numbers = #tpu.dot_dimension_numbers<[1], [0], [0], [1], [0, 0, 1, 1], [], []>} : vector<8x8xf32>, vector<8x8xf32>, vector<8x8xf32> -> vector<8x8xf32>
    %286 = tpu.concatenate %228, %247, %266, %285 in 1 : vector<8x8xf32>, vector<8x8xf32>, vector<8x8xf32>, vector<8x8xf32> -> vector<8x32xf32>
    %287 = vector.extract_strided_slice %195 {offsets = [0, 96], sizes = [32, 32], strides = [1, 1]} : vector<32x128xf32> to vector<32x32xf32>
    %cst_128 = arith.constant dense<0.000000e+00> : vector<8x32xf32>
    %288 = tpu.matmul %286, %287, %cst_128 {dimension_numbers = #tpu.dot_dimension_numbers<[1], [0], [0], [1], [0, 0, 1, 1], [], []>} : vector<8x32xf32>, vector<32x32xf32>, vector<8x32xf32> -> vector<8x32xf32>
    %289 = vector.extract_strided_slice %197 {offsets = [0, 96], sizes = [1, 32], strides = [1, 1]} : vector<1x128xf32> to vector<1x32xf32>
    %290 = vector.broadcast %289 : vector<1x32xf32> to vector<8x32xf32>
    %291 = arith.addf %288, %290 : vector<8x32xf32>
    %292 = arith.addf %193, %291 : vector<8x32xf32>
    %cst_129 = arith.constant dense<0.000000e+00> : vector<8xf32>
    %293 = vector.multi_reduction <add>, %292, %cst_129 [1] : vector<8x32xf32> to vector<8xf32>
    %294 = vector.shape_cast %293 : vector<8xf32> to vector<8x1xf32>
    %cst_130 = arith.constant 3.200000e+01 : f32
    %295 = vector.broadcast %cst_130 : f32 to vector<8x1xf32>
    %296 = arith.divf %294, %295 : vector<8x1xf32>
    %297 = vector.broadcast %296 : vector<8x1xf32> to vector<8x32xf32>
    %298 = arith.subf %292, %297 : vector<8x32xf32>
    %299 = arith.mulf %298, %298 : vector<8x32xf32>
    %cst_131 = arith.constant dense<0.000000e+00> : vector<8xf32>
    %300 = vector.multi_reduction <add>, %299, %cst_131 [1] : vector<8x32xf32> to vector<8xf32>
    %301 = vector.shape_cast %300 : vector<8xf32> to vector<8x1xf32>
    %cst_132 = arith.constant 3.200000e+01 : f32
    %302 = vector.broadcast %cst_132 : f32 to vector<8x1xf32>
    %303 = arith.divf %301, %302 : vector<8x1xf32>
    %304 = vector.broadcast %296 : vector<8x1xf32> to vector<8x32xf32>
    %305 = arith.subf %292, %304 : vector<8x32xf32>
    %cst_133 = arith.constant 9.99999997E-7 : f32
    %306 = vector.broadcast %cst_133 : f32 to vector<8x1xf32>
    %307 = arith.addf %303, %306 : vector<8x1xf32>
    %308 = math.rsqrt %307 : vector<8x1xf32>
    %309 = vector.broadcast %308 : vector<8x1xf32> to vector<8x32xf32>
    %310 = arith.mulf %305, %309 : vector<8x32xf32>
    %c2 = arith.constant 2 : index
    %c0_134 = arith.constant 0 : index
    %c0_135 = arith.constant 0 : index
    %311 = vector.load %arg16[%c2, %c0_134, %c0_135] : memref<8x2x32xf32, #tpu.memory_space<vmem>>, vector<1x2x32xf32>
    %312 = vector.shape_cast %311 : vector<1x2x32xf32> to vector<2x32xf32>
    %313 = vector.extract_strided_slice %312 {offsets = [0, 0], sizes = [1, 32], strides = [1, 1]} : vector<2x32xf32> to vector<1x32xf32>
    %314 = vector.broadcast %313 : vector<1x32xf32> to vector<8x32xf32>
    %315 = arith.mulf %310, %314 : vector<8x32xf32>
    %316 = vector.extract_strided_slice %312 {offsets = [1, 0], sizes = [1, 32], strides = [1, 1]} : vector<2x32xf32> to vector<1x32xf32>
    %317 = vector.broadcast %316 : vector<1x32xf32> to vector<8x32xf32>
    %318 = arith.addf %315, %317 : vector<8x32xf32>
    %319 = arith.addf %318, %193 : vector<8x32xf32>
    %320 = tpu.iota {dimensions = array<i32: 0>} : vector<8x8xi32>
    %321 = tpu.iota {dimensions = array<i32: 1>} : vector<8x8xi32>
    %322 = arith.cmpi sge, %320, %321 : vector<8x8xi32>
    %c2_136 = arith.constant 2 : index
    %c0_137 = arith.constant 0 : index
    %c0_138 = arith.constant 0 : index
    %323 = vector.load %arg10[%c2_136, %c0_137, %c0_138] : memref<6x32x128xf32, #tpu.memory_space<vmem>>, vector<1x32x128xf32>
    %324 = vector.shape_cast %323 : vector<1x32x128xf32> to vector<32x128xf32>
    %c2_139 = arith.constant 2 : index
    %c0_140 = arith.constant 0 : index
    %c0_141 = arith.constant 0 : index
    %325 = vector.load %arg11[%c2_139, %c0_140, %c0_141] : memref<6x1x128xf32, #tpu.memory_space<vmem>>, vector<1x1x128xf32>
    %326 = vector.shape_cast %325 : vector<1x1x128xf32> to vector<1x128xf32>
    %327 = vector.extract_strided_slice %324 {offsets = [0, 0], sizes = [32, 32], strides = [1, 1]} : vector<32x128xf32> to vector<32x32xf32>
    %cst_142 = arith.constant dense<0.000000e+00> : vector<8x32xf32>
    %328 = tpu.matmul %5, %327, %cst_142 {dimension_numbers = #tpu.dot_dimension_numbers<[1], [0], [0], [1], [0, 0, 1, 1], [], []>} : vector<8x32xf32>, vector<32x32xf32>, vector<8x32xf32> -> vector<8x32xf32>
    %329 = vector.extract_strided_slice %326 {offsets = [0, 0], sizes = [1, 32], strides = [1, 1]} : vector<1x128xf32> to vector<1x32xf32>
    %330 = vector.broadcast %329 : vector<1x32xf32> to vector<8x32xf32>
    %331 = arith.addf %328, %330 : vector<8x32xf32>
    %332 = vector.extract_strided_slice %324 {offsets = [0, 32], sizes = [32, 64], strides = [1, 1]} : vector<32x128xf32> to vector<32x64xf32>
    %cst_143 = arith.constant dense<0.000000e+00> : vector<8x64xf32>
    %333 = tpu.matmul %5, %332, %cst_143 {dimension_numbers = #tpu.dot_dimension_numbers<[1], [0], [0], [1], [0, 0, 1, 1], [], []>} : vector<8x32xf32>, vector<32x64xf32>, vector<8x64xf32> -> vector<8x64xf32>
    %334 = vector.extract_strided_slice %326 {offsets = [0, 32], sizes = [1, 64], strides = [1, 1]} : vector<1x128xf32> to vector<1x64xf32>
    %335 = vector.broadcast %334 : vector<1x64xf32> to vector<8x64xf32>
    %336 = arith.addf %333, %335 : vector<8x64xf32>
    %337 = vector.extract_strided_slice %336 {offsets = [0, 0], sizes = [8, 32], strides = [1, 1]} : vector<8x64xf32> to vector<8x32xf32>
    %338 = vector.extract_strided_slice %336 {offsets = [0, 32], sizes = [8, 32], strides = [1, 1]} : vector<8x64xf32> to vector<8x32xf32>
    %339 = vector.extract_strided_slice %331 {offsets = [0, 0], sizes = [8, 8], strides = [1, 1]} : vector<8x32xf32> to vector<8x8xf32>
    %340 = vector.extract_strided_slice %337 {offsets = [0, 0], sizes = [8, 8], strides = [1, 1]} : vector<8x32xf32> to vector<8x8xf32>
    %341 = vector.extract_strided_slice %338 {offsets = [0, 0], sizes = [8, 8], strides = [1, 1]} : vector<8x32xf32> to vector<8x8xf32>
    %cst_144 = arith.constant dense<0.000000e+00> : vector<8x8xf32>
    %342 = tpu.matmul %339, %340, %cst_144 {dimension_numbers = #tpu.dot_dimension_numbers<[1], [1], [0], [0], [0, 0, 1, 0], [], []>} : vector<8x8xf32>, vector<8x8xf32>, vector<8x8xf32> -> vector<8x8xf32>
    %cst_145 = arith.constant 0.353553385 : f32
    %343 = vector.broadcast %cst_145 : f32 to vector<8x8xf32>
    %344 = arith.mulf %342, %343 : vector<8x8xf32>
    %cst_146 = arith.constant -1.000000e+09 : f32
    %345 = vector.broadcast %cst_146 : f32 to vector<8x8xf32>
    %346 = arith.select %322, %344, %345 : vector<8x8xi1>, vector<8x8xf32>
    %cst_147 = arith.constant dense<0xFF800000> : vector<8xf32>
    %347 = vector.multi_reduction <maximumf>, %346, %cst_147 [1] : vector<8x8xf32> to vector<8xf32>
    %348 = vector.shape_cast %347 : vector<8xf32> to vector<8x1xf32>
    %349 = vector.broadcast %348 : vector<8x1xf32> to vector<8x8xf32>
    %350 = arith.subf %346, %349 : vector<8x8xf32>
    %351 = math.exp %350 : vector<8x8xf32>
    %cst_148 = arith.constant dense<0.000000e+00> : vector<8xf32>
    %352 = vector.multi_reduction <add>, %351, %cst_148 [1] : vector<8x8xf32> to vector<8xf32>
    %353 = vector.shape_cast %352 : vector<8xf32> to vector<8x1xf32>
    %354 = tpu.reciprocal %353 {approx = true} : vector<8x1xf32> -> vector<8x1xf32>
    %355 = vector.broadcast %354 : vector<8x1xf32> to vector<8x8xf32>
    %356 = arith.mulf %351, %355 : vector<8x8xf32>
    %cst_149 = arith.constant dense<0.000000e+00> : vector<8x8xf32>
    %357 = tpu.matmul %356, %341, %cst_149 {dimension_numbers = #tpu.dot_dimension_numbers<[1], [0], [0], [1], [0, 0, 1, 1], [], []>} : vector<8x8xf32>, vector<8x8xf32>, vector<8x8xf32> -> vector<8x8xf32>
    %358 = vector.extract_strided_slice %331 {offsets = [0, 8], sizes = [8, 8], strides = [1, 1]} : vector<8x32xf32> to vector<8x8xf32>
    %359 = vector.extract_strided_slice %337 {offsets = [0, 8], sizes = [8, 8], strides = [1, 1]} : vector<8x32xf32> to vector<8x8xf32>
    %360 = vector.extract_strided_slice %338 {offsets = [0, 8], sizes = [8, 8], strides = [1, 1]} : vector<8x32xf32> to vector<8x8xf32>
    %cst_150 = arith.constant dense<0.000000e+00> : vector<8x8xf32>
    %361 = tpu.matmul %358, %359, %cst_150 {dimension_numbers = #tpu.dot_dimension_numbers<[1], [1], [0], [0], [0, 0, 1, 0], [], []>} : vector<8x8xf32>, vector<8x8xf32>, vector<8x8xf32> -> vector<8x8xf32>
    %cst_151 = arith.constant 0.353553385 : f32
    %362 = vector.broadcast %cst_151 : f32 to vector<8x8xf32>
    %363 = arith.mulf %361, %362 : vector<8x8xf32>
    %cst_152 = arith.constant -1.000000e+09 : f32
    %364 = vector.broadcast %cst_152 : f32 to vector<8x8xf32>
    %365 = arith.select %322, %363, %364 : vector<8x8xi1>, vector<8x8xf32>
    %cst_153 = arith.constant dense<0xFF800000> : vector<8xf32>
    %366 = vector.multi_reduction <maximumf>, %365, %cst_153 [1] : vector<8x8xf32> to vector<8xf32>
    %367 = vector.shape_cast %366 : vector<8xf32> to vector<8x1xf32>
    %368 = vector.broadcast %367 : vector<8x1xf32> to vector<8x8xf32>
    %369 = arith.subf %365, %368 : vector<8x8xf32>
    %370 = math.exp %369 : vector<8x8xf32>
    %cst_154 = arith.constant dense<0.000000e+00> : vector<8xf32>
    %371 = vector.multi_reduction <add>, %370, %cst_154 [1] : vector<8x8xf32> to vector<8xf32>
    %372 = vector.shape_cast %371 : vector<8xf32> to vector<8x1xf32>
    %373 = tpu.reciprocal %372 {approx = true} : vector<8x1xf32> -> vector<8x1xf32>
    %374 = vector.broadcast %373 : vector<8x1xf32> to vector<8x8xf32>
    %375 = arith.mulf %370, %374 : vector<8x8xf32>
    %cst_155 = arith.constant dense<0.000000e+00> : vector<8x8xf32>
    %376 = tpu.matmul %375, %360, %cst_155 {dimension_numbers = #tpu.dot_dimension_numbers<[1], [0], [0], [1], [0, 0, 1, 1], [], []>} : vector<8x8xf32>, vector<8x8xf32>, vector<8x8xf32> -> vector<8x8xf32>
    %377 = vector.extract_strided_slice %331 {offsets = [0, 16], sizes = [8, 8], strides = [1, 1]} : vector<8x32xf32> to vector<8x8xf32>
    %378 = vector.extract_strided_slice %337 {offsets = [0, 16], sizes = [8, 8], strides = [1, 1]} : vector<8x32xf32> to vector<8x8xf32>
    %379 = vector.extract_strided_slice %338 {offsets = [0, 16], sizes = [8, 8], strides = [1, 1]} : vector<8x32xf32> to vector<8x8xf32>
    %cst_156 = arith.constant dense<0.000000e+00> : vector<8x8xf32>
    %380 = tpu.matmul %377, %378, %cst_156 {dimension_numbers = #tpu.dot_dimension_numbers<[1], [1], [0], [0], [0, 0, 1, 0], [], []>} : vector<8x8xf32>, vector<8x8xf32>, vector<8x8xf32> -> vector<8x8xf32>
    %cst_157 = arith.constant 0.353553385 : f32
    %381 = vector.broadcast %cst_157 : f32 to vector<8x8xf32>
    %382 = arith.mulf %380, %381 : vector<8x8xf32>
    %cst_158 = arith.constant -1.000000e+09 : f32
    %383 = vector.broadcast %cst_158 : f32 to vector<8x8xf32>
    %384 = arith.select %322, %382, %383 : vector<8x8xi1>, vector<8x8xf32>
    %cst_159 = arith.constant dense<0xFF800000> : vector<8xf32>
    %385 = vector.multi_reduction <maximumf>, %384, %cst_159 [1] : vector<8x8xf32> to vector<8xf32>
    %386 = vector.shape_cast %385 : vector<8xf32> to vector<8x1xf32>
    %387 = vector.broadcast %386 : vector<8x1xf32> to vector<8x8xf32>
    %388 = arith.subf %384, %387 : vector<8x8xf32>
    %389 = math.exp %388 : vector<8x8xf32>
    %cst_160 = arith.constant dense<0.000000e+00> : vector<8xf32>
    %390 = vector.multi_reduction <add>, %389, %cst_160 [1] : vector<8x8xf32> to vector<8xf32>
    %391 = vector.shape_cast %390 : vector<8xf32> to vector<8x1xf32>
    %392 = tpu.reciprocal %391 {approx = true} : vector<8x1xf32> -> vector<8x1xf32>
    %393 = vector.broadcast %392 : vector<8x1xf32> to vector<8x8xf32>
    %394 = arith.mulf %389, %393 : vector<8x8xf32>
    %cst_161 = arith.constant dense<0.000000e+00> : vector<8x8xf32>
    %395 = tpu.matmul %394, %379, %cst_161 {dimension_numbers = #tpu.dot_dimension_numbers<[1], [0], [0], [1], [0, 0, 1, 1], [], []>} : vector<8x8xf32>, vector<8x8xf32>, vector<8x8xf32> -> vector<8x8xf32>
    %396 = vector.extract_strided_slice %331 {offsets = [0, 24], sizes = [8, 8], strides = [1, 1]} : vector<8x32xf32> to vector<8x8xf32>
    %397 = vector.extract_strided_slice %337 {offsets = [0, 24], sizes = [8, 8], strides = [1, 1]} : vector<8x32xf32> to vector<8x8xf32>
    %398 = vector.extract_strided_slice %338 {offsets = [0, 24], sizes = [8, 8], strides = [1, 1]} : vector<8x32xf32> to vector<8x8xf32>
    %cst_162 = arith.constant dense<0.000000e+00> : vector<8x8xf32>
    %399 = tpu.matmul %396, %397, %cst_162 {dimension_numbers = #tpu.dot_dimension_numbers<[1], [1], [0], [0], [0, 0, 1, 0], [], []>} : vector<8x8xf32>, vector<8x8xf32>, vector<8x8xf32> -> vector<8x8xf32>
    %cst_163 = arith.constant 0.353553385 : f32
    %400 = vector.broadcast %cst_163 : f32 to vector<8x8xf32>
    %401 = arith.mulf %399, %400 : vector<8x8xf32>
    %cst_164 = arith.constant -1.000000e+09 : f32
    %402 = vector.broadcast %cst_164 : f32 to vector<8x8xf32>
    %403 = arith.select %322, %401, %402 : vector<8x8xi1>, vector<8x8xf32>
    %cst_165 = arith.constant dense<0xFF800000> : vector<8xf32>
    %404 = vector.multi_reduction <maximumf>, %403, %cst_165 [1] : vector<8x8xf32> to vector<8xf32>
    %405 = vector.shape_cast %404 : vector<8xf32> to vector<8x1xf32>
    %406 = vector.broadcast %405 : vector<8x1xf32> to vector<8x8xf32>
    %407 = arith.subf %403, %406 : vector<8x8xf32>
    %408 = math.exp %407 : vector<8x8xf32>
    %cst_166 = arith.constant dense<0.000000e+00> : vector<8xf32>
    %409 = vector.multi_reduction <add>, %408, %cst_166 [1] : vector<8x8xf32> to vector<8xf32>
    %410 = vector.shape_cast %409 : vector<8xf32> to vector<8x1xf32>
    %411 = tpu.reciprocal %410 {approx = true} : vector<8x1xf32> -> vector<8x1xf32>
    %412 = vector.broadcast %411 : vector<8x1xf32> to vector<8x8xf32>
    %413 = arith.mulf %408, %412 : vector<8x8xf32>
    %cst_167 = arith.constant dense<0.000000e+00> : vector<8x8xf32>
    %414 = tpu.matmul %413, %398, %cst_167 {dimension_numbers = #tpu.dot_dimension_numbers<[1], [0], [0], [1], [0, 0, 1, 1], [], []>} : vector<8x8xf32>, vector<8x8xf32>, vector<8x8xf32> -> vector<8x8xf32>
    %415 = tpu.concatenate %357, %376, %395, %414 in 1 : vector<8x8xf32>, vector<8x8xf32>, vector<8x8xf32>, vector<8x8xf32> -> vector<8x32xf32>
    %416 = vector.extract_strided_slice %324 {offsets = [0, 96], sizes = [32, 32], strides = [1, 1]} : vector<32x128xf32> to vector<32x32xf32>
    %cst_168 = arith.constant dense<0.000000e+00> : vector<8x32xf32>
    %417 = tpu.matmul %415, %416, %cst_168 {dimension_numbers = #tpu.dot_dimension_numbers<[1], [0], [0], [1], [0, 0, 1, 1], [], []>} : vector<8x32xf32>, vector<32x32xf32>, vector<8x32xf32> -> vector<8x32xf32>
    %418 = vector.extract_strided_slice %326 {offsets = [0, 96], sizes = [1, 32], strides = [1, 1]} : vector<1x128xf32> to vector<1x32xf32>
    %419 = vector.broadcast %418 : vector<1x32xf32> to vector<8x32xf32>
    %420 = arith.addf %417, %419 : vector<8x32xf32>
    %421 = arith.addf %5, %420 : vector<8x32xf32>
    %cst_169 = arith.constant dense<0.000000e+00> : vector<8xf32>
    %422 = vector.multi_reduction <add>, %421, %cst_169 [1] : vector<8x32xf32> to vector<8xf32>
    %423 = vector.shape_cast %422 : vector<8xf32> to vector<8x1xf32>
    %cst_170 = arith.constant 3.200000e+01 : f32
    %424 = vector.broadcast %cst_170 : f32 to vector<8x1xf32>
    %425 = arith.divf %423, %424 : vector<8x1xf32>
    %426 = vector.broadcast %425 : vector<8x1xf32> to vector<8x32xf32>
    %427 = arith.subf %421, %426 : vector<8x32xf32>
    %428 = arith.mulf %427, %427 : vector<8x32xf32>
    %cst_171 = arith.constant dense<0.000000e+00> : vector<8xf32>
    %429 = vector.multi_reduction <add>, %428, %cst_171 [1] : vector<8x32xf32> to vector<8xf32>
    %430 = vector.shape_cast %429 : vector<8xf32> to vector<8x1xf32>
    %cst_172 = arith.constant 3.200000e+01 : f32
    %431 = vector.broadcast %cst_172 : f32 to vector<8x1xf32>
    %432 = arith.divf %430, %431 : vector<8x1xf32>
    %433 = vector.broadcast %425 : vector<8x1xf32> to vector<8x32xf32>
    %434 = arith.subf %421, %433 : vector<8x32xf32>
    %cst_173 = arith.constant 9.99999997E-7 : f32
    %435 = vector.broadcast %cst_173 : f32 to vector<8x1xf32>
    %436 = arith.addf %432, %435 : vector<8x1xf32>
    %437 = math.rsqrt %436 : vector<8x1xf32>
    %438 = vector.broadcast %437 : vector<8x1xf32> to vector<8x32xf32>
    %439 = arith.mulf %434, %438 : vector<8x32xf32>
    %c3 = arith.constant 3 : index
    %c0_174 = arith.constant 0 : index
    %c0_175 = arith.constant 0 : index
    %440 = vector.load %arg16[%c3, %c0_174, %c0_175] : memref<8x2x32xf32, #tpu.memory_space<vmem>>, vector<1x2x32xf32>
    %441 = vector.shape_cast %440 : vector<1x2x32xf32> to vector<2x32xf32>
    %442 = vector.extract_strided_slice %441 {offsets = [0, 0], sizes = [1, 32], strides = [1, 1]} : vector<2x32xf32> to vector<1x32xf32>
    %443 = vector.broadcast %442 : vector<1x32xf32> to vector<8x32xf32>
    %444 = arith.mulf %439, %443 : vector<8x32xf32>
    %445 = vector.extract_strided_slice %441 {offsets = [1, 0], sizes = [1, 32], strides = [1, 1]} : vector<2x32xf32> to vector<1x32xf32>
    %446 = vector.broadcast %445 : vector<1x32xf32> to vector<8x32xf32>
    %447 = arith.addf %444, %446 : vector<8x32xf32>
    %c3_176 = arith.constant 3 : index
    %c0_177 = arith.constant 0 : index
    %c0_178 = arith.constant 0 : index
    %448 = vector.load %arg10[%c3_176, %c0_177, %c0_178] : memref<6x32x128xf32, #tpu.memory_space<vmem>>, vector<1x32x128xf32>
    %449 = vector.shape_cast %448 : vector<1x32x128xf32> to vector<32x128xf32>
    %c3_179 = arith.constant 3 : index
    %c0_180 = arith.constant 0 : index
    %c0_181 = arith.constant 0 : index
    %450 = vector.load %arg11[%c3_179, %c0_180, %c0_181] : memref<6x1x128xf32, #tpu.memory_space<vmem>>, vector<1x1x128xf32>
    %451 = vector.shape_cast %450 : vector<1x1x128xf32> to vector<1x128xf32>
    %452 = vector.extract_strided_slice %449 {offsets = [0, 0], sizes = [32, 32], strides = [1, 1]} : vector<32x128xf32> to vector<32x32xf32>
    %cst_182 = arith.constant dense<0.000000e+00> : vector<8x32xf32>
    %453 = tpu.matmul %447, %452, %cst_182 {dimension_numbers = #tpu.dot_dimension_numbers<[1], [0], [0], [1], [0, 0, 1, 1], [], []>} : vector<8x32xf32>, vector<32x32xf32>, vector<8x32xf32> -> vector<8x32xf32>
    %454 = vector.extract_strided_slice %451 {offsets = [0, 0], sizes = [1, 32], strides = [1, 1]} : vector<1x128xf32> to vector<1x32xf32>
    %455 = vector.broadcast %454 : vector<1x32xf32> to vector<8x32xf32>
    %456 = arith.addf %453, %455 : vector<8x32xf32>
    %457 = vector.extract_strided_slice %449 {offsets = [0, 32], sizes = [32, 64], strides = [1, 1]} : vector<32x128xf32> to vector<32x64xf32>
    %cst_183 = arith.constant dense<0.000000e+00> : vector<8x64xf32>
    %458 = tpu.matmul %319, %457, %cst_183 {dimension_numbers = #tpu.dot_dimension_numbers<[1], [0], [0], [1], [0, 0, 1, 1], [], []>} : vector<8x32xf32>, vector<32x64xf32>, vector<8x64xf32> -> vector<8x64xf32>
    %459 = vector.extract_strided_slice %451 {offsets = [0, 32], sizes = [1, 64], strides = [1, 1]} : vector<1x128xf32> to vector<1x64xf32>
    %460 = vector.broadcast %459 : vector<1x64xf32> to vector<8x64xf32>
    %461 = arith.addf %458, %460 : vector<8x64xf32>
    %462 = vector.extract_strided_slice %461 {offsets = [0, 0], sizes = [8, 32], strides = [1, 1]} : vector<8x64xf32> to vector<8x32xf32>
    %463 = vector.extract_strided_slice %461 {offsets = [0, 32], sizes = [8, 32], strides = [1, 1]} : vector<8x64xf32> to vector<8x32xf32>
    %464 = vector.extract_strided_slice %456 {offsets = [0, 0], sizes = [8, 8], strides = [1, 1]} : vector<8x32xf32> to vector<8x8xf32>
    %465 = vector.extract_strided_slice %462 {offsets = [0, 0], sizes = [8, 8], strides = [1, 1]} : vector<8x32xf32> to vector<8x8xf32>
    %466 = vector.extract_strided_slice %463 {offsets = [0, 0], sizes = [8, 8], strides = [1, 1]} : vector<8x32xf32> to vector<8x8xf32>
    %cst_184 = arith.constant dense<0.000000e+00> : vector<8x8xf32>
    %467 = tpu.matmul %464, %465, %cst_184 {dimension_numbers = #tpu.dot_dimension_numbers<[1], [1], [0], [0], [0, 0, 1, 0], [], []>} : vector<8x8xf32>, vector<8x8xf32>, vector<8x8xf32> -> vector<8x8xf32>
    %cst_185 = arith.constant 0.353553385 : f32
    %468 = vector.broadcast %cst_185 : f32 to vector<8x8xf32>
    %469 = arith.mulf %467, %468 : vector<8x8xf32>
    %cst_186 = arith.constant -1.000000e+09 : f32
    %470 = vector.broadcast %cst_186 : f32 to vector<8x8xf32>
    %471 = arith.select %13, %469, %470 : vector<8x8xi1>, vector<8x8xf32>
    %cst_187 = arith.constant dense<0xFF800000> : vector<8xf32>
    %472 = vector.multi_reduction <maximumf>, %471, %cst_187 [1] : vector<8x8xf32> to vector<8xf32>
    %473 = vector.shape_cast %472 : vector<8xf32> to vector<8x1xf32>
    %474 = vector.broadcast %473 : vector<8x1xf32> to vector<8x8xf32>
    %475 = arith.subf %471, %474 : vector<8x8xf32>
    %476 = math.exp %475 : vector<8x8xf32>
    %cst_188 = arith.constant dense<0.000000e+00> : vector<8xf32>
    %477 = vector.multi_reduction <add>, %476, %cst_188 [1] : vector<8x8xf32> to vector<8xf32>
    %478 = vector.shape_cast %477 : vector<8xf32> to vector<8x1xf32>
    %479 = tpu.reciprocal %478 {approx = true} : vector<8x1xf32> -> vector<8x1xf32>
    %480 = vector.broadcast %479 : vector<8x1xf32> to vector<8x8xf32>
    %481 = arith.mulf %476, %480 : vector<8x8xf32>
    %cst_189 = arith.constant dense<0.000000e+00> : vector<8x8xf32>
    %482 = tpu.matmul %481, %466, %cst_189 {dimension_numbers = #tpu.dot_dimension_numbers<[1], [0], [0], [1], [0, 0, 1, 1], [], []>} : vector<8x8xf32>, vector<8x8xf32>, vector<8x8xf32> -> vector<8x8xf32>
    %483 = vector.extract_strided_slice %456 {offsets = [0, 8], sizes = [8, 8], strides = [1, 1]} : vector<8x32xf32> to vector<8x8xf32>
    %484 = vector.extract_strided_slice %462 {offsets = [0, 8], sizes = [8, 8], strides = [1, 1]} : vector<8x32xf32> to vector<8x8xf32>
    %485 = vector.extract_strided_slice %463 {offsets = [0, 8], sizes = [8, 8], strides = [1, 1]} : vector<8x32xf32> to vector<8x8xf32>
    %cst_190 = arith.constant dense<0.000000e+00> : vector<8x8xf32>
    %486 = tpu.matmul %483, %484, %cst_190 {dimension_numbers = #tpu.dot_dimension_numbers<[1], [1], [0], [0], [0, 0, 1, 0], [], []>} : vector<8x8xf32>, vector<8x8xf32>, vector<8x8xf32> -> vector<8x8xf32>
    %cst_191 = arith.constant 0.353553385 : f32
    %487 = vector.broadcast %cst_191 : f32 to vector<8x8xf32>
    %488 = arith.mulf %486, %487 : vector<8x8xf32>
    %cst_192 = arith.constant -1.000000e+09 : f32
    %489 = vector.broadcast %cst_192 : f32 to vector<8x8xf32>
    %490 = arith.select %13, %488, %489 : vector<8x8xi1>, vector<8x8xf32>
    %cst_193 = arith.constant dense<0xFF800000> : vector<8xf32>
    %491 = vector.multi_reduction <maximumf>, %490, %cst_193 [1] : vector<8x8xf32> to vector<8xf32>
    %492 = vector.shape_cast %491 : vector<8xf32> to vector<8x1xf32>
    %493 = vector.broadcast %492 : vector<8x1xf32> to vector<8x8xf32>
    %494 = arith.subf %490, %493 : vector<8x8xf32>
    %495 = math.exp %494 : vector<8x8xf32>
    %cst_194 = arith.constant dense<0.000000e+00> : vector<8xf32>
    %496 = vector.multi_reduction <add>, %495, %cst_194 [1] : vector<8x8xf32> to vector<8xf32>
    %497 = vector.shape_cast %496 : vector<8xf32> to vector<8x1xf32>
    %498 = tpu.reciprocal %497 {approx = true} : vector<8x1xf32> -> vector<8x1xf32>
    %499 = vector.broadcast %498 : vector<8x1xf32> to vector<8x8xf32>
    %500 = arith.mulf %495, %499 : vector<8x8xf32>
    %cst_195 = arith.constant dense<0.000000e+00> : vector<8x8xf32>
    %501 = tpu.matmul %500, %485, %cst_195 {dimension_numbers = #tpu.dot_dimension_numbers<[1], [0], [0], [1], [0, 0, 1, 1], [], []>} : vector<8x8xf32>, vector<8x8xf32>, vector<8x8xf32> -> vector<8x8xf32>
    %502 = vector.extract_strided_slice %456 {offsets = [0, 16], sizes = [8, 8], strides = [1, 1]} : vector<8x32xf32> to vector<8x8xf32>
    %503 = vector.extract_strided_slice %462 {offsets = [0, 16], sizes = [8, 8], strides = [1, 1]} : vector<8x32xf32> to vector<8x8xf32>
    %504 = vector.extract_strided_slice %463 {offsets = [0, 16], sizes = [8, 8], strides = [1, 1]} : vector<8x32xf32> to vector<8x8xf32>
    %cst_196 = arith.constant dense<0.000000e+00> : vector<8x8xf32>
    %505 = tpu.matmul %502, %503, %cst_196 {dimension_numbers = #tpu.dot_dimension_numbers<[1], [1], [0], [0], [0, 0, 1, 0], [], []>} : vector<8x8xf32>, vector<8x8xf32>, vector<8x8xf32> -> vector<8x8xf32>
    %cst_197 = arith.constant 0.353553385 : f32
    %506 = vector.broadcast %cst_197 : f32 to vector<8x8xf32>
    %507 = arith.mulf %505, %506 : vector<8x8xf32>
    %cst_198 = arith.constant -1.000000e+09 : f32
    %508 = vector.broadcast %cst_198 : f32 to vector<8x8xf32>
    %509 = arith.select %13, %507, %508 : vector<8x8xi1>, vector<8x8xf32>
    %cst_199 = arith.constant dense<0xFF800000> : vector<8xf32>
    %510 = vector.multi_reduction <maximumf>, %509, %cst_199 [1] : vector<8x8xf32> to vector<8xf32>
    %511 = vector.shape_cast %510 : vector<8xf32> to vector<8x1xf32>
    %512 = vector.broadcast %511 : vector<8x1xf32> to vector<8x8xf32>
    %513 = arith.subf %509, %512 : vector<8x8xf32>
    %514 = math.exp %513 : vector<8x8xf32>
    %cst_200 = arith.constant dense<0.000000e+00> : vector<8xf32>
    %515 = vector.multi_reduction <add>, %514, %cst_200 [1] : vector<8x8xf32> to vector<8xf32>
    %516 = vector.shape_cast %515 : vector<8xf32> to vector<8x1xf32>
    %517 = tpu.reciprocal %516 {approx = true} : vector<8x1xf32> -> vector<8x1xf32>
    %518 = vector.broadcast %517 : vector<8x1xf32> to vector<8x8xf32>
    %519 = arith.mulf %514, %518 : vector<8x8xf32>
    %cst_201 = arith.constant dense<0.000000e+00> : vector<8x8xf32>
    %520 = tpu.matmul %519, %504, %cst_201 {dimension_numbers = #tpu.dot_dimension_numbers<[1], [0], [0], [1], [0, 0, 1, 1], [], []>} : vector<8x8xf32>, vector<8x8xf32>, vector<8x8xf32> -> vector<8x8xf32>
    %521 = vector.extract_strided_slice %456 {offsets = [0, 24], sizes = [8, 8], strides = [1, 1]} : vector<8x32xf32> to vector<8x8xf32>
    %522 = vector.extract_strided_slice %462 {offsets = [0, 24], sizes = [8, 8], strides = [1, 1]} : vector<8x32xf32> to vector<8x8xf32>
    %523 = vector.extract_strided_slice %463 {offsets = [0, 24], sizes = [8, 8], strides = [1, 1]} : vector<8x32xf32> to vector<8x8xf32>
    %cst_202 = arith.constant dense<0.000000e+00> : vector<8x8xf32>
    %524 = tpu.matmul %521, %522, %cst_202 {dimension_numbers = #tpu.dot_dimension_numbers<[1], [1], [0], [0], [0, 0, 1, 0], [], []>} : vector<8x8xf32>, vector<8x8xf32>, vector<8x8xf32> -> vector<8x8xf32>
    %cst_203 = arith.constant 0.353553385 : f32
    %525 = vector.broadcast %cst_203 : f32 to vector<8x8xf32>
    %526 = arith.mulf %524, %525 : vector<8x8xf32>
    %cst_204 = arith.constant -1.000000e+09 : f32
    %527 = vector.broadcast %cst_204 : f32 to vector<8x8xf32>
    %528 = arith.select %13, %526, %527 : vector<8x8xi1>, vector<8x8xf32>
    %cst_205 = arith.constant dense<0xFF800000> : vector<8xf32>
    %529 = vector.multi_reduction <maximumf>, %528, %cst_205 [1] : vector<8x8xf32> to vector<8xf32>
    %530 = vector.shape_cast %529 : vector<8xf32> to vector<8x1xf32>
    %531 = vector.broadcast %530 : vector<8x1xf32> to vector<8x8xf32>
    %532 = arith.subf %528, %531 : vector<8x8xf32>
    %533 = math.exp %532 : vector<8x8xf32>
    %cst_206 = arith.constant dense<0.000000e+00> : vector<8xf32>
    %534 = vector.multi_reduction <add>, %533, %cst_206 [1] : vector<8x8xf32> to vector<8xf32>
    %535 = vector.shape_cast %534 : vector<8xf32> to vector<8x1xf32>
    %536 = tpu.reciprocal %535 {approx = true} : vector<8x1xf32> -> vector<8x1xf32>
    %537 = vector.broadcast %536 : vector<8x1xf32> to vector<8x8xf32>
    %538 = arith.mulf %533, %537 : vector<8x8xf32>
    %cst_207 = arith.constant dense<0.000000e+00> : vector<8x8xf32>
    %539 = tpu.matmul %538, %523, %cst_207 {dimension_numbers = #tpu.dot_dimension_numbers<[1], [0], [0], [1], [0, 0, 1, 1], [], []>} : vector<8x8xf32>, vector<8x8xf32>, vector<8x8xf32> -> vector<8x8xf32>
    %540 = tpu.concatenate %482, %501, %520, %539 in 1 : vector<8x8xf32>, vector<8x8xf32>, vector<8x8xf32>, vector<8x8xf32> -> vector<8x32xf32>
    %541 = vector.extract_strided_slice %449 {offsets = [0, 96], sizes = [32, 32], strides = [1, 1]} : vector<32x128xf32> to vector<32x32xf32>
    %cst_208 = arith.constant dense<0.000000e+00> : vector<8x32xf32>
    %542 = tpu.matmul %540, %541, %cst_208 {dimension_numbers = #tpu.dot_dimension_numbers<[1], [0], [0], [1], [0, 0, 1, 1], [], []>} : vector<8x32xf32>, vector<32x32xf32>, vector<8x32xf32> -> vector<8x32xf32>
    %543 = vector.extract_strided_slice %451 {offsets = [0, 96], sizes = [1, 32], strides = [1, 1]} : vector<1x128xf32> to vector<1x32xf32>
    %544 = vector.broadcast %543 : vector<1x32xf32> to vector<8x32xf32>
    %545 = arith.addf %542, %544 : vector<8x32xf32>
    %546 = arith.addf %447, %545 : vector<8x32xf32>
    %cst_209 = arith.constant dense<0.000000e+00> : vector<8xf32>
    %547 = vector.multi_reduction <add>, %546, %cst_209 [1] : vector<8x32xf32> to vector<8xf32>
    %548 = vector.shape_cast %547 : vector<8xf32> to vector<8x1xf32>
    %cst_210 = arith.constant 3.200000e+01 : f32
    %549 = vector.broadcast %cst_210 : f32 to vector<8x1xf32>
    %550 = arith.divf %548, %549 : vector<8x1xf32>
    %551 = vector.broadcast %550 : vector<8x1xf32> to vector<8x32xf32>
    %552 = arith.subf %546, %551 : vector<8x32xf32>
    %553 = arith.mulf %552, %552 : vector<8x32xf32>
    %cst_211 = arith.constant dense<0.000000e+00> : vector<8xf32>
    %554 = vector.multi_reduction <add>, %553, %cst_211 [1] : vector<8x32xf32> to vector<8xf32>
    %555 = vector.shape_cast %554 : vector<8xf32> to vector<8x1xf32>
    %cst_212 = arith.constant 3.200000e+01 : f32
    %556 = vector.broadcast %cst_212 : f32 to vector<8x1xf32>
    %557 = arith.divf %555, %556 : vector<8x1xf32>
    %558 = vector.broadcast %550 : vector<8x1xf32> to vector<8x32xf32>
    %559 = arith.subf %546, %558 : vector<8x32xf32>
    %cst_213 = arith.constant 9.99999997E-7 : f32
    %560 = vector.broadcast %cst_213 : f32 to vector<8x1xf32>
    %561 = arith.addf %557, %560 : vector<8x1xf32>
    %562 = math.rsqrt %561 : vector<8x1xf32>
    %563 = vector.broadcast %562 : vector<8x1xf32> to vector<8x32xf32>
    %564 = arith.mulf %559, %563 : vector<8x32xf32>
    %c4 = arith.constant 4 : index
    %c0_214 = arith.constant 0 : index
    %c0_215 = arith.constant 0 : index
    %565 = vector.load %arg16[%c4, %c0_214, %c0_215] : memref<8x2x32xf32, #tpu.memory_space<vmem>>, vector<1x2x32xf32>
    %566 = vector.shape_cast %565 : vector<1x2x32xf32> to vector<2x32xf32>
    %567 = vector.extract_strided_slice %566 {offsets = [0, 0], sizes = [1, 32], strides = [1, 1]} : vector<2x32xf32> to vector<1x32xf32>
    %568 = vector.broadcast %567 : vector<1x32xf32> to vector<8x32xf32>
    %569 = arith.mulf %564, %568 : vector<8x32xf32>
    %570 = vector.extract_strided_slice %566 {offsets = [1, 0], sizes = [1, 32], strides = [1, 1]} : vector<2x32xf32> to vector<1x32xf32>
    %571 = vector.broadcast %570 : vector<1x32xf32> to vector<8x32xf32>
    %572 = arith.addf %569, %571 : vector<8x32xf32>
    %c4_216 = arith.constant 4 : index
    %c0_217 = arith.constant 0 : index
    %c0_218 = arith.constant 0 : index
    %573 = vector.load %arg10[%c4_216, %c0_217, %c0_218] : memref<6x32x128xf32, #tpu.memory_space<vmem>>, vector<1x32x128xf32>
    %574 = vector.shape_cast %573 : vector<1x32x128xf32> to vector<32x128xf32>
    %c4_219 = arith.constant 4 : index
    %c0_220 = arith.constant 0 : index
    %c0_221 = arith.constant 0 : index
    %575 = vector.load %arg11[%c4_219, %c0_220, %c0_221] : memref<6x1x128xf32, #tpu.memory_space<vmem>>, vector<1x1x128xf32>
    %576 = vector.shape_cast %575 : vector<1x1x128xf32> to vector<1x128xf32>
    %577 = vector.extract_strided_slice %574 {offsets = [0, 0], sizes = [32, 32], strides = [1, 1]} : vector<32x128xf32> to vector<32x32xf32>
    %cst_222 = arith.constant dense<0.000000e+00> : vector<8x32xf32>
    %578 = tpu.matmul %572, %577, %cst_222 {dimension_numbers = #tpu.dot_dimension_numbers<[1], [0], [0], [1], [0, 0, 1, 1], [], []>} : vector<8x32xf32>, vector<32x32xf32>, vector<8x32xf32> -> vector<8x32xf32>
    %579 = vector.extract_strided_slice %576 {offsets = [0, 0], sizes = [1, 32], strides = [1, 1]} : vector<1x128xf32> to vector<1x32xf32>
    %580 = vector.broadcast %579 : vector<1x32xf32> to vector<8x32xf32>
    %581 = arith.addf %578, %580 : vector<8x32xf32>
    %582 = vector.extract_strided_slice %574 {offsets = [0, 32], sizes = [32, 64], strides = [1, 1]} : vector<32x128xf32> to vector<32x64xf32>
    %cst_223 = arith.constant dense<0.000000e+00> : vector<8x64xf32>
    %583 = tpu.matmul %7, %582, %cst_223 {dimension_numbers = #tpu.dot_dimension_numbers<[1], [0], [0], [1], [0, 0, 1, 1], [], []>} : vector<8x32xf32>, vector<32x64xf32>, vector<8x64xf32> -> vector<8x64xf32>
    %584 = vector.extract_strided_slice %576 {offsets = [0, 32], sizes = [1, 64], strides = [1, 1]} : vector<1x128xf32> to vector<1x64xf32>
    %585 = vector.broadcast %584 : vector<1x64xf32> to vector<8x64xf32>
    %586 = arith.addf %583, %585 : vector<8x64xf32>
    %587 = vector.extract_strided_slice %586 {offsets = [0, 0], sizes = [8, 32], strides = [1, 1]} : vector<8x64xf32> to vector<8x32xf32>
    %588 = vector.extract_strided_slice %586 {offsets = [0, 32], sizes = [8, 32], strides = [1, 1]} : vector<8x64xf32> to vector<8x32xf32>
    %589 = vector.extract_strided_slice %581 {offsets = [0, 0], sizes = [8, 8], strides = [1, 1]} : vector<8x32xf32> to vector<8x8xf32>
    %590 = vector.extract_strided_slice %587 {offsets = [0, 0], sizes = [8, 8], strides = [1, 1]} : vector<8x32xf32> to vector<8x8xf32>
    %591 = vector.extract_strided_slice %588 {offsets = [0, 0], sizes = [8, 8], strides = [1, 1]} : vector<8x32xf32> to vector<8x8xf32>
    %cst_224 = arith.constant dense<0.000000e+00> : vector<8x8xf32>
    %592 = tpu.matmul %589, %590, %cst_224 {dimension_numbers = #tpu.dot_dimension_numbers<[1], [1], [0], [0], [0, 0, 1, 0], [], []>} : vector<8x8xf32>, vector<8x8xf32>, vector<8x8xf32> -> vector<8x8xf32>
    %cst_225 = arith.constant 0.353553385 : f32
    %593 = vector.broadcast %cst_225 : f32 to vector<8x8xf32>
    %594 = arith.mulf %592, %593 : vector<8x8xf32>
    %cst_226 = arith.constant -1.000000e+09 : f32
    %595 = vector.broadcast %cst_226 : f32 to vector<8x8xf32>
    %596 = arith.select %21, %594, %595 : vector<8x8xi1>, vector<8x8xf32>
    %cst_227 = arith.constant dense<0xFF800000> : vector<8xf32>
    %597 = vector.multi_reduction <maximumf>, %596, %cst_227 [1] : vector<8x8xf32> to vector<8xf32>
    %598 = vector.shape_cast %597 : vector<8xf32> to vector<8x1xf32>
    %599 = vector.broadcast %598 : vector<8x1xf32> to vector<8x8xf32>
    %600 = arith.subf %596, %599 : vector<8x8xf32>
    %601 = math.exp %600 : vector<8x8xf32>
    %cst_228 = arith.constant dense<0.000000e+00> : vector<8xf32>
    %602 = vector.multi_reduction <add>, %601, %cst_228 [1] : vector<8x8xf32> to vector<8xf32>
    %603 = vector.shape_cast %602 : vector<8xf32> to vector<8x1xf32>
    %604 = tpu.reciprocal %603 {approx = true} : vector<8x1xf32> -> vector<8x1xf32>
    %605 = vector.broadcast %604 : vector<8x1xf32> to vector<8x8xf32>
    %606 = arith.mulf %601, %605 : vector<8x8xf32>
    %cst_229 = arith.constant dense<0.000000e+00> : vector<8x8xf32>
    %607 = tpu.matmul %606, %591, %cst_229 {dimension_numbers = #tpu.dot_dimension_numbers<[1], [0], [0], [1], [0, 0, 1, 1], [], []>} : vector<8x8xf32>, vector<8x8xf32>, vector<8x8xf32> -> vector<8x8xf32>
    %608 = vector.extract_strided_slice %581 {offsets = [0, 8], sizes = [8, 8], strides = [1, 1]} : vector<8x32xf32> to vector<8x8xf32>
    %609 = vector.extract_strided_slice %587 {offsets = [0, 8], sizes = [8, 8], strides = [1, 1]} : vector<8x32xf32> to vector<8x8xf32>
    %610 = vector.extract_strided_slice %588 {offsets = [0, 8], sizes = [8, 8], strides = [1, 1]} : vector<8x32xf32> to vector<8x8xf32>
    %cst_230 = arith.constant dense<0.000000e+00> : vector<8x8xf32>
    %611 = tpu.matmul %608, %609, %cst_230 {dimension_numbers = #tpu.dot_dimension_numbers<[1], [1], [0], [0], [0, 0, 1, 0], [], []>} : vector<8x8xf32>, vector<8x8xf32>, vector<8x8xf32> -> vector<8x8xf32>
    %cst_231 = arith.constant 0.353553385 : f32
    %612 = vector.broadcast %cst_231 : f32 to vector<8x8xf32>
    %613 = arith.mulf %611, %612 : vector<8x8xf32>
    %cst_232 = arith.constant -1.000000e+09 : f32
    %614 = vector.broadcast %cst_232 : f32 to vector<8x8xf32>
    %615 = arith.select %21, %613, %614 : vector<8x8xi1>, vector<8x8xf32>
    %cst_233 = arith.constant dense<0xFF800000> : vector<8xf32>
    %616 = vector.multi_reduction <maximumf>, %615, %cst_233 [1] : vector<8x8xf32> to vector<8xf32>
    %617 = vector.shape_cast %616 : vector<8xf32> to vector<8x1xf32>
    %618 = vector.broadcast %617 : vector<8x1xf32> to vector<8x8xf32>
    %619 = arith.subf %615, %618 : vector<8x8xf32>
    %620 = math.exp %619 : vector<8x8xf32>
    %cst_234 = arith.constant dense<0.000000e+00> : vector<8xf32>
    %621 = vector.multi_reduction <add>, %620, %cst_234 [1] : vector<8x8xf32> to vector<8xf32>
    %622 = vector.shape_cast %621 : vector<8xf32> to vector<8x1xf32>
    %623 = tpu.reciprocal %622 {approx = true} : vector<8x1xf32> -> vector<8x1xf32>
    %624 = vector.broadcast %623 : vector<8x1xf32> to vector<8x8xf32>
    %625 = arith.mulf %620, %624 : vector<8x8xf32>
    %cst_235 = arith.constant dense<0.000000e+00> : vector<8x8xf32>
    %626 = tpu.matmul %625, %610, %cst_235 {dimension_numbers = #tpu.dot_dimension_numbers<[1], [0], [0], [1], [0, 0, 1, 1], [], []>} : vector<8x8xf32>, vector<8x8xf32>, vector<8x8xf32> -> vector<8x8xf32>
    %627 = vector.extract_strided_slice %581 {offsets = [0, 16], sizes = [8, 8], strides = [1, 1]} : vector<8x32xf32> to vector<8x8xf32>
    %628 = vector.extract_strided_slice %587 {offsets = [0, 16], sizes = [8, 8], strides = [1, 1]} : vector<8x32xf32> to vector<8x8xf32>
    %629 = vector.extract_strided_slice %588 {offsets = [0, 16], sizes = [8, 8], strides = [1, 1]} : vector<8x32xf32> to vector<8x8xf32>
    %cst_236 = arith.constant dense<0.000000e+00> : vector<8x8xf32>
    %630 = tpu.matmul %627, %628, %cst_236 {dimension_numbers = #tpu.dot_dimension_numbers<[1], [1], [0], [0], [0, 0, 1, 0], [], []>} : vector<8x8xf32>, vector<8x8xf32>, vector<8x8xf32> -> vector<8x8xf32>
    %cst_237 = arith.constant 0.353553385 : f32
    %631 = vector.broadcast %cst_237 : f32 to vector<8x8xf32>
    %632 = arith.mulf %630, %631 : vector<8x8xf32>
    %cst_238 = arith.constant -1.000000e+09 : f32
    %633 = vector.broadcast %cst_238 : f32 to vector<8x8xf32>
    %634 = arith.select %21, %632, %633 : vector<8x8xi1>, vector<8x8xf32>
    %cst_239 = arith.constant dense<0xFF800000> : vector<8xf32>
    %635 = vector.multi_reduction <maximumf>, %634, %cst_239 [1] : vector<8x8xf32> to vector<8xf32>
    %636 = vector.shape_cast %635 : vector<8xf32> to vector<8x1xf32>
    %637 = vector.broadcast %636 : vector<8x1xf32> to vector<8x8xf32>
    %638 = arith.subf %634, %637 : vector<8x8xf32>
    %639 = math.exp %638 : vector<8x8xf32>
    %cst_240 = arith.constant dense<0.000000e+00> : vector<8xf32>
    %640 = vector.multi_reduction <add>, %639, %cst_240 [1] : vector<8x8xf32> to vector<8xf32>
    %641 = vector.shape_cast %640 : vector<8xf32> to vector<8x1xf32>
    %642 = tpu.reciprocal %641 {approx = true} : vector<8x1xf32> -> vector<8x1xf32>
    %643 = vector.broadcast %642 : vector<8x1xf32> to vector<8x8xf32>
    %644 = arith.mulf %639, %643 : vector<8x8xf32>
    %cst_241 = arith.constant dense<0.000000e+00> : vector<8x8xf32>
    %645 = tpu.matmul %644, %629, %cst_241 {dimension_numbers = #tpu.dot_dimension_numbers<[1], [0], [0], [1], [0, 0, 1, 1], [], []>} : vector<8x8xf32>, vector<8x8xf32>, vector<8x8xf32> -> vector<8x8xf32>
    %646 = vector.extract_strided_slice %581 {offsets = [0, 24], sizes = [8, 8], strides = [1, 1]} : vector<8x32xf32> to vector<8x8xf32>
    %647 = vector.extract_strided_slice %587 {offsets = [0, 24], sizes = [8, 8], strides = [1, 1]} : vector<8x32xf32> to vector<8x8xf32>
    %648 = vector.extract_strided_slice %588 {offsets = [0, 24], sizes = [8, 8], strides = [1, 1]} : vector<8x32xf32> to vector<8x8xf32>
    %cst_242 = arith.constant dense<0.000000e+00> : vector<8x8xf32>
    %649 = tpu.matmul %646, %647, %cst_242 {dimension_numbers = #tpu.dot_dimension_numbers<[1], [1], [0], [0], [0, 0, 1, 0], [], []>} : vector<8x8xf32>, vector<8x8xf32>, vector<8x8xf32> -> vector<8x8xf32>
    %cst_243 = arith.constant 0.353553385 : f32
    %650 = vector.broadcast %cst_243 : f32 to vector<8x8xf32>
    %651 = arith.mulf %649, %650 : vector<8x8xf32>
    %cst_244 = arith.constant -1.000000e+09 : f32
    %652 = vector.broadcast %cst_244 : f32 to vector<8x8xf32>
    %653 = arith.select %21, %651, %652 : vector<8x8xi1>, vector<8x8xf32>
    %cst_245 = arith.constant dense<0xFF800000> : vector<8xf32>
    %654 = vector.multi_reduction <maximumf>, %653, %cst_245 [1] : vector<8x8xf32> to vector<8xf32>
    %655 = vector.shape_cast %654 : vector<8xf32> to vector<8x1xf32>
    %656 = vector.broadcast %655 : vector<8x1xf32> to vector<8x8xf32>
    %657 = arith.subf %653, %656 : vector<8x8xf32>
    %658 = math.exp %657 : vector<8x8xf32>
    %cst_246 = arith.constant dense<0.000000e+00> : vector<8xf32>
    %659 = vector.multi_reduction <add>, %658, %cst_246 [1] : vector<8x8xf32> to vector<8xf32>
    %660 = vector.shape_cast %659 : vector<8xf32> to vector<8x1xf32>
    %661 = tpu.reciprocal %660 {approx = true} : vector<8x1xf32> -> vector<8x1xf32>
    %662 = vector.broadcast %661 : vector<8x1xf32> to vector<8x8xf32>
    %663 = arith.mulf %658, %662 : vector<8x8xf32>
    %cst_247 = arith.constant dense<0.000000e+00> : vector<8x8xf32>
    %664 = tpu.matmul %663, %648, %cst_247 {dimension_numbers = #tpu.dot_dimension_numbers<[1], [0], [0], [1], [0, 0, 1, 1], [], []>} : vector<8x8xf32>, vector<8x8xf32>, vector<8x8xf32> -> vector<8x8xf32>
    %665 = tpu.concatenate %607, %626, %645, %664 in 1 : vector<8x8xf32>, vector<8x8xf32>, vector<8x8xf32>, vector<8x8xf32> -> vector<8x32xf32>
    %666 = vector.extract_strided_slice %574 {offsets = [0, 96], sizes = [32, 32], strides = [1, 1]} : vector<32x128xf32> to vector<32x32xf32>
    %cst_248 = arith.constant dense<0.000000e+00> : vector<8x32xf32>
    %667 = tpu.matmul %665, %666, %cst_248 {dimension_numbers = #tpu.dot_dimension_numbers<[1], [0], [0], [1], [0, 0, 1, 1], [], []>} : vector<8x32xf32>, vector<32x32xf32>, vector<8x32xf32> -> vector<8x32xf32>
    %668 = vector.extract_strided_slice %576 {offsets = [0, 96], sizes = [1, 32], strides = [1, 1]} : vector<1x128xf32> to vector<1x32xf32>
    %669 = vector.broadcast %668 : vector<1x32xf32> to vector<8x32xf32>
    %670 = arith.addf %667, %669 : vector<8x32xf32>
    %671 = arith.addf %572, %670 : vector<8x32xf32>
    %cst_249 = arith.constant dense<0.000000e+00> : vector<8xf32>
    %672 = vector.multi_reduction <add>, %671, %cst_249 [1] : vector<8x32xf32> to vector<8xf32>
    %673 = vector.shape_cast %672 : vector<8xf32> to vector<8x1xf32>
    %cst_250 = arith.constant 3.200000e+01 : f32
    %674 = vector.broadcast %cst_250 : f32 to vector<8x1xf32>
    %675 = arith.divf %673, %674 : vector<8x1xf32>
    %676 = vector.broadcast %675 : vector<8x1xf32> to vector<8x32xf32>
    %677 = arith.subf %671, %676 : vector<8x32xf32>
    %678 = arith.mulf %677, %677 : vector<8x32xf32>
    %cst_251 = arith.constant dense<0.000000e+00> : vector<8xf32>
    %679 = vector.multi_reduction <add>, %678, %cst_251 [1] : vector<8x32xf32> to vector<8xf32>
    %680 = vector.shape_cast %679 : vector<8xf32> to vector<8x1xf32>
    %cst_252 = arith.constant 3.200000e+01 : f32
    %681 = vector.broadcast %cst_252 : f32 to vector<8x1xf32>
    %682 = arith.divf %680, %681 : vector<8x1xf32>
    %683 = vector.broadcast %675 : vector<8x1xf32> to vector<8x32xf32>
    %684 = arith.subf %671, %683 : vector<8x32xf32>
    %cst_253 = arith.constant 9.99999997E-7 : f32
    %685 = vector.broadcast %cst_253 : f32 to vector<8x1xf32>
    %686 = arith.addf %682, %685 : vector<8x1xf32>
    %687 = math.rsqrt %686 : vector<8x1xf32>
    %688 = vector.broadcast %687 : vector<8x1xf32> to vector<8x32xf32>
    %689 = arith.mulf %684, %688 : vector<8x32xf32>
    %c5 = arith.constant 5 : index
    %c0_254 = arith.constant 0 : index
    %c0_255 = arith.constant 0 : index
    %690 = vector.load %arg16[%c5, %c0_254, %c0_255] : memref<8x2x32xf32, #tpu.memory_space<vmem>>, vector<1x2x32xf32>
    %691 = vector.shape_cast %690 : vector<1x2x32xf32> to vector<2x32xf32>
    %692 = vector.extract_strided_slice %691 {offsets = [0, 0], sizes = [1, 32], strides = [1, 1]} : vector<2x32xf32> to vector<1x32xf32>
    %693 = vector.broadcast %692 : vector<1x32xf32> to vector<8x32xf32>
    %694 = arith.mulf %689, %693 : vector<8x32xf32>
    %695 = vector.extract_strided_slice %691 {offsets = [1, 0], sizes = [1, 32], strides = [1, 1]} : vector<2x32xf32> to vector<1x32xf32>
    %696 = vector.broadcast %695 : vector<1x32xf32> to vector<8x32xf32>
    %697 = arith.addf %694, %696 : vector<8x32xf32>
    %c5_256 = arith.constant 5 : index
    %c0_257 = arith.constant 0 : index
    %c0_258 = arith.constant 0 : index
    %698 = vector.load %arg10[%c5_256, %c0_257, %c0_258] : memref<6x32x128xf32, #tpu.memory_space<vmem>>, vector<1x32x128xf32>
    %699 = vector.shape_cast %698 : vector<1x32x128xf32> to vector<32x128xf32>
    %c5_259 = arith.constant 5 : index
    %c0_260 = arith.constant 0 : index
    %c0_261 = arith.constant 0 : index
    %700 = vector.load %arg11[%c5_259, %c0_260, %c0_261] : memref<6x1x128xf32, #tpu.memory_space<vmem>>, vector<1x1x128xf32>
    %701 = vector.shape_cast %700 : vector<1x1x128xf32> to vector<1x128xf32>
    %702 = vector.extract_strided_slice %699 {offsets = [0, 0], sizes = [32, 32], strides = [1, 1]} : vector<32x128xf32> to vector<32x32xf32>
    %cst_262 = arith.constant dense<0.000000e+00> : vector<8x32xf32>
    %703 = tpu.matmul %697, %702, %cst_262 {dimension_numbers = #tpu.dot_dimension_numbers<[1], [0], [0], [1], [0, 0, 1, 1], [], []>} : vector<8x32xf32>, vector<32x32xf32>, vector<8x32xf32> -> vector<8x32xf32>
    %704 = vector.extract_strided_slice %701 {offsets = [0, 0], sizes = [1, 32], strides = [1, 1]} : vector<1x128xf32> to vector<1x32xf32>
    %705 = vector.broadcast %704 : vector<1x32xf32> to vector<8x32xf32>
    %706 = arith.addf %703, %705 : vector<8x32xf32>
    %707 = vector.extract_strided_slice %699 {offsets = [0, 32], sizes = [32, 64], strides = [1, 1]} : vector<32x128xf32> to vector<32x64xf32>
    %cst_263 = arith.constant dense<0.000000e+00> : vector<8x64xf32>
    %708 = tpu.matmul %9, %707, %cst_263 {dimension_numbers = #tpu.dot_dimension_numbers<[1], [0], [0], [1], [0, 0, 1, 1], [], []>} : vector<8x32xf32>, vector<32x64xf32>, vector<8x64xf32> -> vector<8x64xf32>
    %709 = vector.extract_strided_slice %701 {offsets = [0, 32], sizes = [1, 64], strides = [1, 1]} : vector<1x128xf32> to vector<1x64xf32>
    %710 = vector.broadcast %709 : vector<1x64xf32> to vector<8x64xf32>
    %711 = arith.addf %708, %710 : vector<8x64xf32>
    %712 = vector.extract_strided_slice %711 {offsets = [0, 0], sizes = [8, 32], strides = [1, 1]} : vector<8x64xf32> to vector<8x32xf32>
    %713 = vector.extract_strided_slice %711 {offsets = [0, 32], sizes = [8, 32], strides = [1, 1]} : vector<8x64xf32> to vector<8x32xf32>
    %714 = vector.extract_strided_slice %706 {offsets = [0, 0], sizes = [8, 8], strides = [1, 1]} : vector<8x32xf32> to vector<8x8xf32>
    %715 = vector.extract_strided_slice %712 {offsets = [0, 0], sizes = [8, 8], strides = [1, 1]} : vector<8x32xf32> to vector<8x8xf32>
    %716 = vector.extract_strided_slice %713 {offsets = [0, 0], sizes = [8, 8], strides = [1, 1]} : vector<8x32xf32> to vector<8x8xf32>
    %cst_264 = arith.constant dense<0.000000e+00> : vector<8x8xf32>
    %717 = tpu.matmul %714, %715, %cst_264 {dimension_numbers = #tpu.dot_dimension_numbers<[1], [1], [0], [0], [0, 0, 1, 0], [], []>} : vector<8x8xf32>, vector<8x8xf32>, vector<8x8xf32> -> vector<8x8xf32>
    %cst_265 = arith.constant 0.353553385 : f32
    %718 = vector.broadcast %cst_265 : f32 to vector<8x8xf32>
    %719 = arith.mulf %717, %718 : vector<8x8xf32>
    %cst_266 = arith.constant -1.000000e+09 : f32
    %720 = vector.broadcast %cst_266 : f32 to vector<8x8xf32>
    %721 = arith.select %25, %719, %720 : vector<8x8xi1>, vector<8x8xf32>
    %cst_267 = arith.constant dense<0xFF800000> : vector<8xf32>
    %722 = vector.multi_reduction <maximumf>, %721, %cst_267 [1] : vector<8x8xf32> to vector<8xf32>
    %723 = vector.shape_cast %722 : vector<8xf32> to vector<8x1xf32>
    %724 = vector.broadcast %723 : vector<8x1xf32> to vector<8x8xf32>
    %725 = arith.subf %721, %724 : vector<8x8xf32>
    %726 = math.exp %725 : vector<8x8xf32>
    %cst_268 = arith.constant dense<0.000000e+00> : vector<8xf32>
    %727 = vector.multi_reduction <add>, %726, %cst_268 [1] : vector<8x8xf32> to vector<8xf32>
    %728 = vector.shape_cast %727 : vector<8xf32> to vector<8x1xf32>
    %729 = tpu.reciprocal %728 {approx = true} : vector<8x1xf32> -> vector<8x1xf32>
    %730 = vector.broadcast %729 : vector<8x1xf32> to vector<8x8xf32>
    %731 = arith.mulf %726, %730 : vector<8x8xf32>
    %cst_269 = arith.constant dense<0.000000e+00> : vector<8x8xf32>
    %732 = tpu.matmul %731, %716, %cst_269 {dimension_numbers = #tpu.dot_dimension_numbers<[1], [0], [0], [1], [0, 0, 1, 1], [], []>} : vector<8x8xf32>, vector<8x8xf32>, vector<8x8xf32> -> vector<8x8xf32>
    %733 = vector.extract_strided_slice %706 {offsets = [0, 8], sizes = [8, 8], strides = [1, 1]} : vector<8x32xf32> to vector<8x8xf32>
    %734 = vector.extract_strided_slice %712 {offsets = [0, 8], sizes = [8, 8], strides = [1, 1]} : vector<8x32xf32> to vector<8x8xf32>
    %735 = vector.extract_strided_slice %713 {offsets = [0, 8], sizes = [8, 8], strides = [1, 1]} : vector<8x32xf32> to vector<8x8xf32>
    %cst_270 = arith.constant dense<0.000000e+00> : vector<8x8xf32>
    %736 = tpu.matmul %733, %734, %cst_270 {dimension_numbers = #tpu.dot_dimension_numbers<[1], [1], [0], [0], [0, 0, 1, 0], [], []>} : vector<8x8xf32>, vector<8x8xf32>, vector<8x8xf32> -> vector<8x8xf32>
    %cst_271 = arith.constant 0.353553385 : f32
    %737 = vector.broadcast %cst_271 : f32 to vector<8x8xf32>
    %738 = arith.mulf %736, %737 : vector<8x8xf32>
    %cst_272 = arith.constant -1.000000e+09 : f32
    %739 = vector.broadcast %cst_272 : f32 to vector<8x8xf32>
    %740 = arith.select %25, %738, %739 : vector<8x8xi1>, vector<8x8xf32>
    %cst_273 = arith.constant dense<0xFF800000> : vector<8xf32>
    %741 = vector.multi_reduction <maximumf>, %740, %cst_273 [1] : vector<8x8xf32> to vector<8xf32>
    %742 = vector.shape_cast %741 : vector<8xf32> to vector<8x1xf32>
    %743 = vector.broadcast %742 : vector<8x1xf32> to vector<8x8xf32>
    %744 = arith.subf %740, %743 : vector<8x8xf32>
    %745 = math.exp %744 : vector<8x8xf32>
    %cst_274 = arith.constant dense<0.000000e+00> : vector<8xf32>
    %746 = vector.multi_reduction <add>, %745, %cst_274 [1] : vector<8x8xf32> to vector<8xf32>
    %747 = vector.shape_cast %746 : vector<8xf32> to vector<8x1xf32>
    %748 = tpu.reciprocal %747 {approx = true} : vector<8x1xf32> -> vector<8x1xf32>
    %749 = vector.broadcast %748 : vector<8x1xf32> to vector<8x8xf32>
    %750 = arith.mulf %745, %749 : vector<8x8xf32>
    %cst_275 = arith.constant dense<0.000000e+00> : vector<8x8xf32>
    %751 = tpu.matmul %750, %735, %cst_275 {dimension_numbers = #tpu.dot_dimension_numbers<[1], [0], [0], [1], [0, 0, 1, 1], [], []>} : vector<8x8xf32>, vector<8x8xf32>, vector<8x8xf32> -> vector<8x8xf32>
    %752 = vector.extract_strided_slice %706 {offsets = [0, 16], sizes = [8, 8], strides = [1, 1]} : vector<8x32xf32> to vector<8x8xf32>
    %753 = vector.extract_strided_slice %712 {offsets = [0, 16], sizes = [8, 8], strides = [1, 1]} : vector<8x32xf32> to vector<8x8xf32>
    %754 = vector.extract_strided_slice %713 {offsets = [0, 16], sizes = [8, 8], strides = [1, 1]} : vector<8x32xf32> to vector<8x8xf32>
    %cst_276 = arith.constant dense<0.000000e+00> : vector<8x8xf32>
    %755 = tpu.matmul %752, %753, %cst_276 {dimension_numbers = #tpu.dot_dimension_numbers<[1], [1], [0], [0], [0, 0, 1, 0], [], []>} : vector<8x8xf32>, vector<8x8xf32>, vector<8x8xf32> -> vector<8x8xf32>
    %cst_277 = arith.constant 0.353553385 : f32
    %756 = vector.broadcast %cst_277 : f32 to vector<8x8xf32>
    %757 = arith.mulf %755, %756 : vector<8x8xf32>
    %cst_278 = arith.constant -1.000000e+09 : f32
    %758 = vector.broadcast %cst_278 : f32 to vector<8x8xf32>
    %759 = arith.select %25, %757, %758 : vector<8x8xi1>, vector<8x8xf32>
    %cst_279 = arith.constant dense<0xFF800000> : vector<8xf32>
    %760 = vector.multi_reduction <maximumf>, %759, %cst_279 [1] : vector<8x8xf32> to vector<8xf32>
    %761 = vector.shape_cast %760 : vector<8xf32> to vector<8x1xf32>
    %762 = vector.broadcast %761 : vector<8x1xf32> to vector<8x8xf32>
    %763 = arith.subf %759, %762 : vector<8x8xf32>
    %764 = math.exp %763 : vector<8x8xf32>
    %cst_280 = arith.constant dense<0.000000e+00> : vector<8xf32>
    %765 = vector.multi_reduction <add>, %764, %cst_280 [1] : vector<8x8xf32> to vector<8xf32>
    %766 = vector.shape_cast %765 : vector<8xf32> to vector<8x1xf32>
    %767 = tpu.reciprocal %766 {approx = true} : vector<8x1xf32> -> vector<8x1xf32>
    %768 = vector.broadcast %767 : vector<8x1xf32> to vector<8x8xf32>
    %769 = arith.mulf %764, %768 : vector<8x8xf32>
    %cst_281 = arith.constant dense<0.000000e+00> : vector<8x8xf32>
    %770 = tpu.matmul %769, %754, %cst_281 {dimension_numbers = #tpu.dot_dimension_numbers<[1], [0], [0], [1], [0, 0, 1, 1], [], []>} : vector<8x8xf32>, vector<8x8xf32>, vector<8x8xf32> -> vector<8x8xf32>
    %771 = vector.extract_strided_slice %706 {offsets = [0, 24], sizes = [8, 8], strides = [1, 1]} : vector<8x32xf32> to vector<8x8xf32>
    %772 = vector.extract_strided_slice %712 {offsets = [0, 24], sizes = [8, 8], strides = [1, 1]} : vector<8x32xf32> to vector<8x8xf32>
    %773 = vector.extract_strided_slice %713 {offsets = [0, 24], sizes = [8, 8], strides = [1, 1]} : vector<8x32xf32> to vector<8x8xf32>
    %cst_282 = arith.constant dense<0.000000e+00> : vector<8x8xf32>
    %774 = tpu.matmul %771, %772, %cst_282 {dimension_numbers = #tpu.dot_dimension_numbers<[1], [1], [0], [0], [0, 0, 1, 0], [], []>} : vector<8x8xf32>, vector<8x8xf32>, vector<8x8xf32> -> vector<8x8xf32>
    %cst_283 = arith.constant 0.353553385 : f32
    %775 = vector.broadcast %cst_283 : f32 to vector<8x8xf32>
    %776 = arith.mulf %774, %775 : vector<8x8xf32>
    %cst_284 = arith.constant -1.000000e+09 : f32
    %777 = vector.broadcast %cst_284 : f32 to vector<8x8xf32>
    %778 = arith.select %25, %776, %777 : vector<8x8xi1>, vector<8x8xf32>
    %cst_285 = arith.constant dense<0xFF800000> : vector<8xf32>
    %779 = vector.multi_reduction <maximumf>, %778, %cst_285 [1] : vector<8x8xf32> to vector<8xf32>
    %780 = vector.shape_cast %779 : vector<8xf32> to vector<8x1xf32>
    %781 = vector.broadcast %780 : vector<8x1xf32> to vector<8x8xf32>
    %782 = arith.subf %778, %781 : vector<8x8xf32>
    %783 = math.exp %782 : vector<8x8xf32>
    %cst_286 = arith.constant dense<0.000000e+00> : vector<8xf32>
    %784 = vector.multi_reduction <add>, %783, %cst_286 [1] : vector<8x8xf32> to vector<8xf32>
    %785 = vector.shape_cast %784 : vector<8xf32> to vector<8x1xf32>
    %786 = tpu.reciprocal %785 {approx = true} : vector<8x1xf32> -> vector<8x1xf32>
    %787 = vector.broadcast %786 : vector<8x1xf32> to vector<8x8xf32>
    %788 = arith.mulf %783, %787 : vector<8x8xf32>
    %cst_287 = arith.constant dense<0.000000e+00> : vector<8x8xf32>
    %789 = tpu.matmul %788, %773, %cst_287 {dimension_numbers = #tpu.dot_dimension_numbers<[1], [0], [0], [1], [0, 0, 1, 1], [], []>} : vector<8x8xf32>, vector<8x8xf32>, vector<8x8xf32> -> vector<8x8xf32>
    %790 = tpu.concatenate %732, %751, %770, %789 in 1 : vector<8x8xf32>, vector<8x8xf32>, vector<8x8xf32>, vector<8x8xf32> -> vector<8x32xf32>
    %791 = vector.extract_strided_slice %699 {offsets = [0, 96], sizes = [32, 32], strides = [1, 1]} : vector<32x128xf32> to vector<32x32xf32>
    %cst_288 = arith.constant dense<0.000000e+00> : vector<8x32xf32>
    %792 = tpu.matmul %790, %791, %cst_288 {dimension_numbers = #tpu.dot_dimension_numbers<[1], [0], [0], [1], [0, 0, 1, 1], [], []>} : vector<8x32xf32>, vector<32x32xf32>, vector<8x32xf32> -> vector<8x32xf32>
    %793 = vector.extract_strided_slice %701 {offsets = [0, 96], sizes = [1, 32], strides = [1, 1]} : vector<1x128xf32> to vector<1x32xf32>
    %794 = vector.broadcast %793 : vector<1x32xf32> to vector<8x32xf32>
    %795 = arith.addf %792, %794 : vector<8x32xf32>
    %796 = arith.addf %697, %795 : vector<8x32xf32>
    %cst_289 = arith.constant dense<0.000000e+00> : vector<8xf32>
    %797 = vector.multi_reduction <add>, %796, %cst_289 [1] : vector<8x32xf32> to vector<8xf32>
    %798 = vector.shape_cast %797 : vector<8xf32> to vector<8x1xf32>
    %cst_290 = arith.constant 3.200000e+01 : f32
    %799 = vector.broadcast %cst_290 : f32 to vector<8x1xf32>
    %800 = arith.divf %798, %799 : vector<8x1xf32>
    %801 = vector.broadcast %800 : vector<8x1xf32> to vector<8x32xf32>
    %802 = arith.subf %796, %801 : vector<8x32xf32>
    %803 = arith.mulf %802, %802 : vector<8x32xf32>
    %cst_291 = arith.constant dense<0.000000e+00> : vector<8xf32>
    %804 = vector.multi_reduction <add>, %803, %cst_291 [1] : vector<8x32xf32> to vector<8xf32>
    %805 = vector.shape_cast %804 : vector<8xf32> to vector<8x1xf32>
    %cst_292 = arith.constant 3.200000e+01 : f32
    %806 = vector.broadcast %cst_292 : f32 to vector<8x1xf32>
    %807 = arith.divf %805, %806 : vector<8x1xf32>
    %808 = vector.broadcast %800 : vector<8x1xf32> to vector<8x32xf32>
    %809 = arith.subf %796, %808 : vector<8x32xf32>
    %cst_293 = arith.constant 9.99999997E-7 : f32
    %810 = vector.broadcast %cst_293 : f32 to vector<8x1xf32>
    %811 = arith.addf %807, %810 : vector<8x1xf32>
    %812 = math.rsqrt %811 : vector<8x1xf32>
    %813 = vector.broadcast %812 : vector<8x1xf32> to vector<8x32xf32>
    %814 = arith.mulf %809, %813 : vector<8x32xf32>
    %c6 = arith.constant 6 : index
    %c0_294 = arith.constant 0 : index
    %c0_295 = arith.constant 0 : index
    %815 = vector.load %arg16[%c6, %c0_294, %c0_295] : memref<8x2x32xf32, #tpu.memory_space<vmem>>, vector<1x2x32xf32>
    %816 = vector.shape_cast %815 : vector<1x2x32xf32> to vector<2x32xf32>
    %817 = vector.extract_strided_slice %816 {offsets = [0, 0], sizes = [1, 32], strides = [1, 1]} : vector<2x32xf32> to vector<1x32xf32>
    %818 = vector.broadcast %817 : vector<1x32xf32> to vector<8x32xf32>
    %819 = arith.mulf %814, %818 : vector<8x32xf32>
    %820 = vector.extract_strided_slice %816 {offsets = [1, 0], sizes = [1, 32], strides = [1, 1]} : vector<2x32xf32> to vector<1x32xf32>
    %821 = vector.broadcast %820 : vector<1x32xf32> to vector<8x32xf32>
    %822 = arith.addf %819, %821 : vector<8x32xf32>
    %c1_296 = arith.constant 1 : index
    %c0_297 = arith.constant 0 : index
    %c0_298 = arith.constant 0 : index
    %823 = vector.load %arg12[%c1_296, %c0_297, %c0_298] : memref<2x32x64xf32, #tpu.memory_space<vmem>>, vector<1x32x64xf32>
    %824 = vector.shape_cast %823 : vector<1x32x64xf32> to vector<32x64xf32>
    %cst_299 = arith.constant dense<0.000000e+00> : vector<8x64xf32>
    %825 = tpu.matmul %822, %824, %cst_299 {dimension_numbers = #tpu.dot_dimension_numbers<[1], [0], [0], [1], [0, 0, 1, 1], [], []>} : vector<8x32xf32>, vector<32x64xf32>, vector<8x64xf32> -> vector<8x64xf32>
    %c1_300 = arith.constant 1 : index
    %c0_301 = arith.constant 0 : index
    %c0_302 = arith.constant 0 : index
    %826 = vector.load %arg13[%c1_300, %c0_301, %c0_302] : memref<2x1x64xf32, #tpu.memory_space<vmem>>, vector<1x1x64xf32>
    %827 = vector.shape_cast %826 : vector<1x1x64xf32> to vector<1x64xf32>
    %828 = vector.broadcast %827 : vector<1x64xf32> to vector<8x64xf32>
    %829 = arith.addf %825, %828 : vector<8x64xf32>
    %cst_303 = arith.constant 0.000000e+00 : f32
    %830 = vector.broadcast %cst_303 : f32 to vector<8x64xf32>
    %831 = arith.maximumf %829, %830 : vector<8x64xf32>
    %c1_304 = arith.constant 1 : index
    %c0_305 = arith.constant 0 : index
    %c0_306 = arith.constant 0 : index
    %832 = vector.load %arg14[%c1_304, %c0_305, %c0_306] : memref<2x64x32xf32, #tpu.memory_space<vmem>>, vector<1x64x32xf32>
    %833 = vector.shape_cast %832 : vector<1x64x32xf32> to vector<64x32xf32>
    %cst_307 = arith.constant dense<0.000000e+00> : vector<8x32xf32>
    %834 = tpu.matmul %831, %833, %cst_307 {dimension_numbers = #tpu.dot_dimension_numbers<[1], [0], [0], [1], [0, 0, 1, 1], [], []>} : vector<8x64xf32>, vector<64x32xf32>, vector<8x32xf32> -> vector<8x32xf32>
    %c1_308 = arith.constant 1 : index
    %c0_309 = arith.constant 0 : index
    %c0_310 = arith.constant 0 : index
    %835 = vector.load %arg15[%c1_308, %c0_309, %c0_310] : memref<2x1x32xf32, #tpu.memory_space<vmem>>, vector<1x1x32xf32>
    %836 = vector.shape_cast %835 : vector<1x1x32xf32> to vector<1x32xf32>
    %837 = vector.broadcast %836 : vector<1x32xf32> to vector<8x32xf32>
    %838 = arith.addf %834, %837 : vector<8x32xf32>
    %839 = arith.addf %822, %838 : vector<8x32xf32>
    %cst_311 = arith.constant dense<0.000000e+00> : vector<8xf32>
    %840 = vector.multi_reduction <add>, %839, %cst_311 [1] : vector<8x32xf32> to vector<8xf32>
    %841 = vector.shape_cast %840 : vector<8xf32> to vector<8x1xf32>
    %cst_312 = arith.constant 3.200000e+01 : f32
    %842 = vector.broadcast %cst_312 : f32 to vector<8x1xf32>
    %843 = arith.divf %841, %842 : vector<8x1xf32>
    %844 = vector.broadcast %843 : vector<8x1xf32> to vector<8x32xf32>
    %845 = arith.subf %839, %844 : vector<8x32xf32>
    %846 = arith.mulf %845, %845 : vector<8x32xf32>
    %cst_313 = arith.constant dense<0.000000e+00> : vector<8xf32>
    %847 = vector.multi_reduction <add>, %846, %cst_313 [1] : vector<8x32xf32> to vector<8xf32>
    %848 = vector.shape_cast %847 : vector<8xf32> to vector<8x1xf32>
    %cst_314 = arith.constant 3.200000e+01 : f32
    %849 = vector.broadcast %cst_314 : f32 to vector<8x1xf32>
    %850 = arith.divf %848, %849 : vector<8x1xf32>
    %851 = vector.broadcast %843 : vector<8x1xf32> to vector<8x32xf32>
    %852 = arith.subf %839, %851 : vector<8x32xf32>
    %cst_315 = arith.constant 9.99999997E-7 : f32
    %853 = vector.broadcast %cst_315 : f32 to vector<8x1xf32>
    %854 = arith.addf %850, %853 : vector<8x1xf32>
    %855 = math.rsqrt %854 : vector<8x1xf32>
    %856 = vector.broadcast %855 : vector<8x1xf32> to vector<8x32xf32>
    %857 = arith.mulf %852, %856 : vector<8x32xf32>
    %c7 = arith.constant 7 : index
    %c0_316 = arith.constant 0 : index
    %c0_317 = arith.constant 0 : index
    %858 = vector.load %arg16[%c7, %c0_316, %c0_317] : memref<8x2x32xf32, #tpu.memory_space<vmem>>, vector<1x2x32xf32>
    %859 = vector.shape_cast %858 : vector<1x2x32xf32> to vector<2x32xf32>
    %860 = vector.extract_strided_slice %859 {offsets = [0, 0], sizes = [1, 32], strides = [1, 1]} : vector<2x32xf32> to vector<1x32xf32>
    %861 = vector.broadcast %860 : vector<1x32xf32> to vector<8x32xf32>
    %862 = arith.mulf %857, %861 : vector<8x32xf32>
    %863 = vector.extract_strided_slice %859 {offsets = [1, 0], sizes = [1, 32], strides = [1, 1]} : vector<2x32xf32> to vector<1x32xf32>
    %864 = vector.broadcast %863 : vector<1x32xf32> to vector<8x32xf32>
    %865 = arith.addf %862, %864 : vector<8x32xf32>
    %c0_318 = arith.constant 0 : index
    %c0_319 = arith.constant 0 : index
    %c0_320 = arith.constant 0 : index
    %866 = vector.load %arg17[%c0_318, %c0_319, %c0_320] : memref<1x8x32xf32, #tpu.memory_space<vmem>>, vector<1x8x32xf32>
    %867 = vector.shape_cast %866 : vector<1x8x32xf32> to vector<8x32xf32>
    %868 = vector.shape_cast %865 : vector<8x32xf32> to vector<1x8x32xf32>
    tpu.vector_store %arg17[%c0_318, %c0_319, %c0_320], %868 {strides = array<i32>} : memref<1x8x32xf32, #tpu.memory_space<vmem>>, vector<1x8x32xf32>,
    return
  }
  func.func @transform_0(%arg0: i32) -> (i32, i32, i32) {
    %c0_i32 = arith.constant 0 : i32
    %c0_i32_0 = arith.constant 0 : i32
    %c0_i32_1 = arith.constant 0 : i32
    return %arg0, %c0_i32, %c0_i32_0 : i32, i32, i32
  }
  func.func @transform_1(%arg0: i32) -> (i32, i32, i32) {
    %c0_i32 = arith.constant 0 : i32
    %c0_i32_0 = arith.constant 0 : i32
    %c0_i32_1 = arith.constant 0 : i32
    return %arg0, %c0_i32, %c0_i32_0 : i32, i32, i32
  }
  func.func @transform_2(%arg0: i32) -> (i32, i32, i32) {
    %c0_i32 = arith.constant 0 : i32
    %c0_i32_0 = arith.constant 0 : i32
    %c0_i32_1 = arith.constant 0 : i32
    return %arg0, %c0_i32, %c0_i32_0 : i32, i32, i32
  }
  func.func @transform_3(%arg0: i32) -> (i32, i32, i32) {
    %c0_i32 = arith.constant 0 : i32
    %c0_i32_0 = arith.constant 0 : i32
    %c0_i32_1 = arith.constant 0 : i32
    return %arg0, %c0_i32, %c0_i32_0 : i32, i32, i32
  }
  func.func @transform_4(%arg0: i32) -> (i32, i32, i32) {
    %c0_i32 = arith.constant 0 : i32
    %c0_i32_0 = arith.constant 0 : i32
    %c0_i32_1 = arith.constant 0 : i32
    return %arg0, %c0_i32, %c0_i32_0 : i32, i32, i32
  }
  func.func @transform_5(%arg0: i32) -> (i32, i32, i32, i32) {
    %c0_i32 = arith.constant 0 : i32
    %c0_i32_0 = arith.constant 0 : i32
    %c0_i32_1 = arith.constant 0 : i32
    %c0_i32_2 = arith.constant 0 : i32
    return %arg0, %c0_i32, %c0_i32_0, %c0_i32_1 : i32, i32, i32, i32
  }
  func.func @transform_6(%arg0: i32) -> (i32, i32, i32, i32) {
    %c0_i32 = arith.constant 0 : i32
    %c0_i32_0 = arith.constant 0 : i32
    %c0_i32_1 = arith.constant 0 : i32
    %c0_i32_2 = arith.constant 0 : i32
    return %arg0, %c0_i32, %c0_i32_0, %c0_i32_1 : i32, i32, i32, i32
  }
  func.func @transform_7(%arg0: i32) -> (i32, i32, i32, i32) {
    %c0_i32 = arith.constant 0 : i32
    %c0_i32_0 = arith.constant 0 : i32
    %c0_i32_1 = arith.constant 0 : i32
    %c0_i32_2 = arith.constant 0 : i32
    return %arg0, %c0_i32, %c0_i32_0, %c0_i32_1 : i32, i32, i32, i32
  }
  func.func @transform_8(%arg0: i32) -> (i32, i32, i32, i32) {
    %c0_i32 = arith.constant 0 : i32
    %c0_i32_0 = arith.constant 0 : i32
    %c0_i32_1 = arith.constant 0 : i32
    %c0_i32_2 = arith.constant 0 : i32
    return %arg0, %c0_i32, %c0_i32_0, %c0_i32_1 : i32, i32, i32, i32
  }
  func.func @transform_9(%arg0: i32) -> (i32, i32, i32) {
    %c0_i32 = arith.constant 0 : i32
    %c0_i32_0 = arith.constant 0 : i32
    %c0_i32_1 = arith.constant 0 : i32
    %c0_i32_2 = arith.constant 0 : i32
    return %c0_i32, %c0_i32_0, %c0_i32_1 : i32, i32, i32
  }
  func.func @transform_10(%arg0: i32) -> (i32, i32, i32) {
    %c0_i32 = arith.constant 0 : i32
    %c0_i32_0 = arith.constant 0 : i32
    %c0_i32_1 = arith.constant 0 : i32
    %c0_i32_2 = arith.constant 0 : i32
    return %c0_i32, %c0_i32_0, %c0_i32_1 : i32, i32, i32
  }
  func.func @transform_11(%arg0: i32) -> (i32, i32, i32) {
    %c0_i32 = arith.constant 0 : i32
    %c0_i32_0 = arith.constant 0 : i32
    %c0_i32_1 = arith.constant 0 : i32
    %c0_i32_2 = arith.constant 0 : i32
    return %c0_i32, %c0_i32_0, %c0_i32_1 : i32, i32, i32
  }
  func.func @transform_12(%arg0: i32) -> (i32, i32, i32) {
    %c0_i32 = arith.constant 0 : i32
    %c0_i32_0 = arith.constant 0 : i32
    %c0_i32_1 = arith.constant 0 : i32
    %c0_i32_2 = arith.constant 0 : i32
    return %c0_i32, %c0_i32_0, %c0_i32_1 : i32, i32, i32
  }
  func.func @transform_13(%arg0: i32) -> (i32, i32, i32) {
    %c0_i32 = arith.constant 0 : i32
    %c0_i32_0 = arith.constant 0 : i32
    %c0_i32_1 = arith.constant 0 : i32
    %c0_i32_2 = arith.constant 0 : i32
    return %c0_i32, %c0_i32_0, %c0_i32_1 : i32, i32, i32
  }
  func.func @transform_14(%arg0: i32) -> (i32, i32, i32) {
    %c0_i32 = arith.constant 0 : i32
    %c0_i32_0 = arith.constant 0 : i32
    %c0_i32_1 = arith.constant 0 : i32
    %c0_i32_2 = arith.constant 0 : i32
    return %c0_i32, %c0_i32_0, %c0_i32_1 : i32, i32, i32
  }
  func.func @transform_15(%arg0: i32) -> (i32, i32, i32) {
    %c0_i32 = arith.constant 0 : i32
    %c0_i32_0 = arith.constant 0 : i32
    %c0_i32_1 = arith.constant 0 : i32
    %c0_i32_2 = arith.constant 0 : i32
    return %c0_i32, %c0_i32_0, %c0_i32_1 : i32, i32, i32
  }
  func.func @transform_16(%arg0: i32) -> (i32, i32, i32) {
    %c0_i32 = arith.constant 0 : i32
    %c0_i32_0 = arith.constant 0 : i32
    %c0_i32_1 = arith.constant 0 : i32
    return %arg0, %c0_i32, %c0_i32_0 : i32, i32, i32
  }
}

</mosaic_0001>

<bundles_post_ra>
// kernel: encoder_decoder_forward.1
= control target key start
LH: loop header
LB: loop body
LE: loop exit
PB: predicated region body
PF: predicated region fallthrough
CT: control target
= control target key end

     0   :  { %s9646_s0 = inlined_call_operand.vmem [shape: f32[2,8,32], index: 0, kind: input, shape index: {}]   ;;  %s9647_s1 = inlined_call_operand.vmem [shape: f32[2,8,32], index: 1, kind: input, shape index: {}]   ;;  %s9648_s2 = inlined_call_operand.vmem [shape: f32[2,8,32], index: 2, kind: input, shape index: {}]   ;;  %s9649_s3 = inlined_call_operand.vmem [shape: f32[2,8,32], index: 3, kind: input, shape index: {}]   ;;  %s9650_s4 = inlined_call_operand.vmem [shape: f32[2,8,32], index: 4, kind: input, shape index: {}]   ;;  %s9651_s5 = inlined_call_operand.vmem [shape: f32[2,1,8,8], index: 5, kind: input, shape index: {}]   ;;  %s9652_s6 = inlined_call_operand.vmem [shape: f32[2,1,8,8], index: 6, kind: input, shape index: {}]   ;;  %s9653_s7 = inlined_call_operand.vmem [shape: f32[2,1,8,8], index: 7, kind: input, shape index: {}]   ;;  %s9654_s8 = inlined_call_operand.vmem [shape: f32[2,1,8,8], index: 8, kind: input, shape index: {}]   ;;  %s9655_s9 = inlined_call_operand.vmem [shape: f32[6,32,128], index: 9, kind: input, shape index: {}]   ;;  %s9656_s10 = inlined_call_operand.vmem [shape: f32[6,1,128], index: 10, kind: input, shape index: {}]   ;;  %s9657_s11 = inlined_call_operand.vmem [shape: f32[2,32,64], index: 11, kind: input, shape index: {}]   ;;  %s9658_s12 = inlined_call_operand.vmem [shape: f32[2,1,64], index: 12, kind: input, shape index: {}]   ;;  %s9659_s13 = inlined_call_operand.vmem [shape: f32[2,64,32], index: 13, kind: input, shape index: {}]   ;;  %s9660_s14 = inlined_call_operand.vmem [shape: f32[2,1,32], index: 14, kind: input, shape index: {}]   ;;  %s9661_s15 = inlined_call_operand.vmem [shape: f32[8,2,32], index: 15, kind: input, shape index: {}]   ;;  %s9662_s16 = inlined_call_operand.hbm [shape: f32[2,8,32], index: 16, kind: output, shape index: {}]  }
   0x1   :  { %9694 = sst [smem:[#allocation12_spill]] %s9646_s0 }
   0x2   :  { %9695 = sst [smem:[#allocation13_spill]] %s9647_s1 }
   0x3   :  { %9696 = sst [smem:[#allocation14_spill]] %s9648_s2 }
   0x4   :  { %9697 = sst [smem:[#allocation15_spill]] %s9651_s5 }
   0x5   :  { %9698 = sst [smem:[#allocation16_spill]] %s9652_s6 }
   0x6   :  { %9699 = sst [smem:[#allocation17_spill]] %s9662_s16 }
   0x7   :  { %21 = vsyncpa [#allocation3], 0 }
   0x8   :  { %23 = vsyncpa [#allocation3 + $0x1], 0  ;;  %s8552_s21 = smov 0   ;;  %s8554_s22 = smov 0  }
   0x9   :  { %s8556_s23 = smov 0   ;;  %s8558_s24 = smov 0  }
   0xa LB: > { %9700 = sst [smem:[#allocation5_spill]] %s8438_s21  ;;  %s8573_s25 = sadd.s32 4294967295, %s8450_s24   ;;  %s8450_s24 = sphi %s8558_s24, %s9731_s24   ;;  %s8446_s23 = sphi %s8556_s23, %s9733_s23   ;;  %s8442_s22 = sphi %s8554_s22, %s9735_s22   ;;  %s8438_s21 = sphi %s8552_s21, %s9734_s21  }
   0xb   : > { %9701 = sst [smem:[#allocation6_spill]] %s8446_s23  ;;  %s7079_s26 = sadd.s32 4294967294, %s8450_s24  }
   0xc   : > { %9702 = sst [smem:[#allocation7_spill]] %s8450_s24  ;;  %s8577_s27 = sadd.s32 1, %s8450_s24  }
   0xd   : > { %9703 = sst [smem:[#allocation8_spill]] %s8577_s27  ;;  %s417_s28 = sadd.s32 1, %s8446_s23 }
   0xe   : > { %s414_s29 = ssub.s32 %s8450_s24, %s8577_s27  ;;  %p427_p0 = scmp.ne.s32.totalorder %s8446_s23, %s8442_s22 }
   0xf   : > { %p415_p1 = scmp.eq.s32.totalorder %s414_s29, 0  ;;  %p428_p2 = scmp.eq.s32.totalorder %s8573_s25, 1 }
  0x10   : > { %p433_p3 = scmp.ne.s32.totalorder %s8442_s22, %s8438_s21  ;;  %p434_p4 = scmp.eq.s32.totalorder %s7079_s26, 1 }
  0x11   : > { %s8588_s30 = scalar_select %p415_p1, %s8446_s23, %s417_s28  }
  0x12   : > { %p8590_p5 = por %p428_p2, %p427_p0  ;;  %p8594_p6 = por %p434_p4, %p433_p3 }
  0x13   : > { %9704 = sst [smem:[#allocation9_spill]] %s8588_s30  ;;  %p7082_p7 = scmp.ge.s32.totalorder %s8450_s24, 1 }
  0x14   : > { %s9705_s0 = scalar_select %p8590_p5, 1, 0 }
  0x15   : > { %s9707_s17 = scalar_select %p8594_p6, 1, 0 }
  0x16   : > { %9706 = sst [smem:[#allocation10_spill]] %s9705_s0  ;;  %p536_p8 = scmp.lt.s32.totalorder %s8450_s24, 3 }
  0x17   : > { %9708 = sst [smem:[#allocation11_spill]] %s9707_s17 }
  0x18   : > { %p537_p9 = pnand %p7082_p7, %p536_p8 }
  0x19   : > { %v666_v0 = vld [vmem:[%s9655_s9] sm:$0xff] (!%p537_p9)  ;;  %v667_v1 = vld [vmem:[%s9655_s9 + $0x8] sm:$0xff] (!%p537_p9)  ;;  %v668_v2 = vld [vmem:[%s9655_s9 + $0x10] sm:$0xff] (!%p537_p9)  ;;  %v8452_v5 = vmov (!%p537_p9), 0.0|0.0   ;;  %p617_p10 = scmp.lt.s32.totalorder (!%p537_p9), %s8573_s25, 1  ;;  %vm8453_vm0 = vmmov (!%p537_p9), 0  }
  0x1a   : > { %540 = sbr.rel (%p537_p9) target bundleno = 11492 (0x2ce4), region = 84  ;;  %v8609_v3 = vpack.i.bf16 (!%p537_p9), %v667_v1, %v666_v0  ;;  %v669_v4 = vld [vmem:[%s9655_s9 + $0x18] sm:$0xff] (!%p537_p9)  ;;  %7959 = vmatprep.subr.bf16.mxu1 (!%p537_p9), %v8452_v5  ;;  %v7960_v6 = vpack.c.bf16 (!%p537_p9), %v667_v1, %v666_v0  ;;  %v8619_v7 = vld [vmem:[%s9656_s10] ss:$0 sm:$0xff] (!%p537_p9)  ;;  %v8454_v8 = vmov (!%p537_p9), 0.0   ;;  %s9684_s20 = smov (!%p537_p9), 96  }
  0x1b   : > { %7469 = vmatprep.mubr.msk.f32.mxu1 (!%p537_p9), %vm8453_vm0, %v8454_v8  ;;  %767 = vrot.lane.b32.xlu1 (!%p537_p9), %v8619_v7, %s9684_s20  ;;  %v8627_v9 = vpack.i.bf16 (!%p537_p9), %v669_v4, %v668_v2  ;;  %v7963_v10 = vpack.c.bf16 (!%p537_p9), %v669_v4, %v668_v2  ;;  %s9709_s29 = sld [smem:[#allocation12_spill]] (!%p537_p9)  ;;  %vm677_vm1 = vcmask (!%p537_p9), 261120   ;;  %s9682_s19 = smov (!%p537_p9), 120   ;;  %vm840_vm2 = vcmask (!%p537_p9), 64512  }
  0x1c   : > { %8157 = vrot.lane.b32.xlu0 (!%p537_p9), %v8609_v3, %s9684_s20  ;;  %7961 = vmatpush3.bf16.msra.mxu1 (!%p537_p9), %v7960_v6  ;;  %s9670_s26 = smov (!%p537_p9), 104   ;;  %s9710_s5 = sld [smem:[#allocation15_spill]] (!%p537_p9)  ;;  %vm1520_vm4 = vcmask (!%p537_p9), 130048   ;;  %vm1522_vm5 = vcmask (!%p537_p9), 195584   ;;  %vm1738_vm6 = vcmask (!%p537_p9), 523264  }
  0x1d   : > { %7962 = vmatprep.subr.bf16.mxu1 (!%p537_p9), %v8452_v5  ;;  %7483 = vmatprep.subr.mxu0 (!%p537_p9), %v8454_v8  ;;  %s9664_s28 = smov (!%p537_p9), 88   ;;  %s9712_s1 = sld [smem:[#allocation13_spill]] (!%p537_p9) }
  0x1e   : > { %7485 = vmatprep.mubr.msk.f32.mxu0 (!%p537_p9), %vm8453_vm0, %v8454_v8  ;;  %s9713_s27 = smov (!%p537_p9), 120   ;;  %s9716_s6 = sld [smem:[#allocation16_spill]] (!%p537_p9) }
  0x1f   : > { %s9721_s2 = sld [smem:[#allocation14_spill]] (!%p537_p9)  ;;  %s9722_s16 = smov (!%p537_p9), 8  }
  0x20   : > { %8162 = vrot.lane.b32.xlu0 (!%p537_p9), %v8627_v9, %s9684_s20  ;;  %7964 = vmatpush3.bf16.msra.mxu1 (!%p537_p9), %v7963_v10  ;;  %s9723_s21 = smov (!%p537_p9), 16   ;;  %s9724_s24 = smov (!%p537_p9), 24  }
  0x21   : > { %s618_s23 = scalar_select %p617_p10, %s8573_s25, 1  ;;  %7965 = vmatprep.subr.bf16.mxu1 %v8452_v5 }
  0x23   : > { %s8632_s30 = sshll.u32 %s618_s23, 3  ;;  %s9680_s23 = smov 112  }
  0x24   : > { %s620_s18 = scalar_lea.vmem %s9709_s29, %s8632_s30  ;;  %s9668_s29 = smov 80  }
  0x25   : > { %v8642_v11 = vld [vmem:[%s620_s18] sm:$0xff]  ;;  %s640_s18 = scalar_lea.vmem %s9710_s5, %s8632_s30  ;;  %s9720_s5 = smov 32  }
  0x26   : > { %7470 = vmatmul.mubr.msk.f32.vlgmr.msra.gmra.mrb[0].mxu1 %vm677_vm1, %v8642_v11  ;;  %v8692_v33 = vld [vmem:[%s640_s18] sm:$0xff]  ;;  %s9666_s18 = smov 72   ;;  %s628_s17 = scalar_lea.vmem %s9721_s2, %s8632_s30 }
  0x27   : > { %7480 = vmatprep.mubr.msk.f32.mxu1 %vm8453_vm0, %v8454_v8  ;;  %vm659_vm3 = vcmp.gt.f32.partialorder %v8692_v33, 0.0  ;;  %s648_s0 = scalar_lea.vmem %s9653_s7, %s8632_s30 }
  0x8d   : > { %v768_v23 = vpop.permute.xlu1 %767 }
  0x8e   : > { %v8158_v12 = vpop.permute.xlu0 %8157 }
  0x8f   : > { %v8160_v13 = vunpack.i.h.bf16 %v8158_v12  ;;  %v8159_v14 = vunpack.i.l.bf16 %v8158_v12 }
  0x91   : > { %v7966_v15 = vpack.c.bf16 %v8160_v13, %v8159_v14 }
  0x92   : > { %v8163_v16 = vpop.permute.xlu0 %8162 }
  0x93   : > { %v8165_v17 = vunpack.i.h.bf16 %v8163_v16  ;;  %v8164_v18 = vunpack.i.l.bf16 %v8163_v16  ;;  %7967 = vmatpush3.bf16.msra.mxu1 %v7966_v15 }
  0x94   : > { %7968 = vmatprep.subr.bf16.mxu1 %v8452_v5 }
  0x95   : > { %v7969_v19 = vpack.c.bf16 %v8165_v17, %v8164_v18 }
  0x97   : > { %7970 = vmatpush3.bf16.msra.mxu1 %v7969_v19 }
  0x98   : > { %7488 = vmatprep.subr.mxu1 %v8454_v8 }
  0x9a   : > { %7481 = vmatmul.mubr.msk.f32.vlgmr.msra.gmra.mrb[2].mxu1 %vm677_vm1, %v8642_v11 }
  0x9b   : > { %7490 = vmatprep.mubr.msk.f32.mxu1 %vm8453_vm0, %v8454_v8 }
  0xf9   : > { %v747_v20 = vpop.f32.mrb[0].mxu1 }
  0xfa   : > { %v748_v21 = vadd.f32 %v8619_v7, %v747_v20  ;;  %v7471_v22 = vpop.f32.mrb[1].mxu1 }
  0xfc   : > { %1006 = vrot.lane.b32.xlu0 %v748_v21, %s9682_s19 }
 0x100   : > { %1173 = vrot.lane.b32.xlu0 %v748_v21, %s9680_s23 }
 0x104   : > { %1340 = vrot.lane.b32.xlu0 %v748_v21, %s9670_s26 }
 0x16d   : > { %v836_v24 = vpop.f32.mrb[2].mxu1 }
 0x16e   : > { %v8659_v25 = vadd.f32 %v836_v24, %v768_v23  ;;  %v7482_v26 = vpop.f32.mrb[3].mxu1  ;;  %v1007_v27 = vpop.permute.xlu0 %1006 }
 0x170   : > { %1008 = vrot.lane.b32.xlu1 %v8659_v25, %s9682_s19  ;;  %7484 = vmatpush3.xpose.msk.msra.mxu0 %vm840_vm2, %v8659_v25  ;;  %s9715_s19 = smov 104  }
 0x171   : > { %7493 = vmatprep.subr.mxu0 %v8454_v8 }
 0x172   : > { %v1174_v30 = vpop.permute.xlu0 %1173 }
 0x173   : > { %7486 = vmatmul.mubr.msk.f32.vlgmr.msra.gmra.mrb[0].mxu0 %vm840_vm2, %v748_v21 }
 0x174   : > { %1175 = vrot.lane.b32.xlu1 %v8659_v25, %s9680_s23  ;;  %7495 = vmatprep.mubr.msk.f32.mxu0 %vm8453_vm0, %v8454_v8  ;;  %s9719_s23 = smov 88  }
 0x176   : > { %v1341_v32 = vpop.permute.xlu0 %1340 }
 0x178   : > { %1342 = vrot.lane.b32.xlu1 %v8659_v25, %s9670_s26  ;;  %s9672_s26 = smov 24  }
 0x1e2   : > { %v1009_v28 = vpop.permute.xlu1 %1008 }
 0x1e3   : > { %7494 = vmatpush3.xpose.msk.msra.mxu0 %vm840_vm2, %v1009_v28 }
 0x1e4   : > { %7503 = vmatprep.subr.mxu0 %v8454_v8 }
 0x1e6   : > { %v1176_v29 = vpop.permute.xlu1 %1175  ;;  %7496 = vmatmul.mubr.msk.f32.vlgmr.msra.gmra.mrb[2].mxu0 %vm840_vm2, %v1007_v27 }
 0x1e7   : > { %7504 = vmatpush3.xpose.msk.msra.mxu0 %vm840_vm2, %v1176_v29  ;;  %7505 = vmatprep.mubr.msk.f32.mxu0 %vm8453_vm0, %v8454_v8 }
 0x1e8   : > { %7513 = vmatprep.subr.mxu0 %v8454_v8 }
 0x1ea   : > { %v1343_v31 = vpop.permute.xlu1 %1342  ;;  %7506 = vmatmul.mubr.msk.f32.vlgmr.msra.gmra.mrb[4].mxu0 %vm840_vm2, %v1174_v30 }
 0x1eb   : > { %7514 = vmatpush3.xpose.msk.msra.mxu0 %vm840_vm2, %v1343_v31  ;;  %7515 = vmatprep.mubr.msk.f32.mxu0 %vm8453_vm0, %v8454_v8 }
 0x1ec   : > { %7971 = vmatprep.subr.bf16.mxu0 %v8452_v5 }
 0x1ee   : > { %7516 = vmatmul.mubr.msk.f32.vlgmr.msra.gmra.mrb[6].mxu0 %vm840_vm2, %v1341_v32 }
 0x1ef   : > { %7531 = vmatprep.mubr.msk.f32.mxu0 %vm8453_vm0, %v8454_v8 }
 0x246   : > { %v913_v34 = vpop.f32.mrb[0].mxu0 }
 0x247   : > { %v917_v35 = vmul.f32 0.35355338, %v913_v34  ;;  %v7487_v36 = vpop.f32.mrb[1].mxu0 }
 0x249   : > { %v918_v37 = vsel %vm659_vm3, %v917_v35, -1e+09 }
 0x24a   : > { %v919_v38 = vsel %vm840_vm2, %v918_v37, -inf }
 0x24b   : > { %920 = vmax.xlane.f32.xlu1 %v919_v38 }
 0x2b9   : > { %v1080_v39 = vpop.f32.mrb[2].mxu0 }
 0x2ba   : > { %v1084_v40 = vmul.f32 0.35355338, %v1080_v39  ;;  %v7497_v41 = vpop.f32.mrb[3].mxu0 }
 0x2bc   : > { %v1085_v42 = vsel %vm659_vm3, %v1084_v40, -1e+09 }
 0x2bd   : > { %v1247_v43 = vpop.f32.mrb[4].mxu0  ;;  %v1086_v44 = vsel %vm840_vm2, %v1085_v42, -inf }
 0x2be   : > { %v1251_v45 = vmul.f32 0.35355338, %v1247_v43  ;;  %1087 = vmax.xlane.f32.xlu0 %v1086_v44  ;;  %v7507_v46 = vpop.f32.mrb[5].mxu0 }
 0x2c0   : > { %v1252_v47 = vsel %vm659_vm3, %v1251_v45, -1e+09 }
 0x2c1   : > { %v1414_v48 = vpop.f32.mrb[6].mxu0  ;;  %v1253_v49 = vsel %vm840_vm2, %v1252_v47, -inf }
 0x2c2   : > { %v1418_v50 = vmul.f32 0.35355338, %v1414_v48  ;;  %1254 = vmax.xlane.f32.xlu0 %v1253_v49  ;;  %v7517_v51 = vpop.f32.mrb[7].mxu0 }
 0x2c4   : > { %v1419_v52 = vsel %vm659_vm3, %v1418_v50, -1e+09 }
 0x2c5   : > { %v1420_v53 = vsel %vm840_vm2, %v1419_v52, -inf }
 0x2c6   : > { %1421 = vmax.xlane.f32.xlu1 %v1420_v53 }
 0x2d7   : > { %1097 = vrot.lane.b32.xlu1 %v8659_v25, %s9664_s28  ;;  %s9678_s28 = smov 32  }
 0x2d8   : > { %v921_v54 = vpop.xlane.xlu1 %920 }
 0x2d9   : > { %v922_v55 = vsub.f32 %v918_v37, %v921_v54 }
 0x2db   : > { %v923_v56 = vmul.f32 1.442695, %v922_v55 }
 0x2dd   : > { %8276 = vpow2.f32 %v923_v56 }
 0x2e7   : > { %v8277_v57 = vpop.eup %8276 }
 0x2e8   : > { %v925_v58 = vsel %vm840_vm2, %v8277_v57, 0.0 }
 0x2e9   : > { %926 = vadd.xlane.f32.xlu0 %v925_v58 }
 0x2ff   : > { %930 = vrot.lane.b32.xlu0 %v8659_v25, %s9684_s20  ;;  %s9711_s20 = smov 96  }
 0x34b   : > { %v1088_v59 = vpop.xlane.xlu0 %1087 }
 0x34c   : > { %v1089_v60 = vsub.f32 %v1085_v42, %v1088_v59 }
 0x34e   : > { %v1090_v61 = vmul.f32 1.442695, %v1089_v60 }
 0x34f   : > { %v1255_v62 = vpop.xlane.xlu0 %1254 }
 0x350   : > { %8278 = vpow2.f32 %v1090_v61  ;;  %v1256_v63 = vsub.f32 %v1252_v47, %v1255_v62 }
 0x352   : > { %v1257_v0 = vmul.f32 1.442695, %v1256_v63  ;;  %v1638_v63 = vld [vmem:[%s9657_s11] sm:$0xff] }
 0x353   : > { %v1422_v1 = vpop.xlane.xlu1 %1421 }
 0x354   : > { %8280 = vpow2.f32 %v1257_v0  ;;  %v1423_v2 = vsub.f32 %v1419_v52, %v1422_v1  ;;  %v1639_v0 = vld [vmem:[%s9657_s11 + $0x8] sm:$0xff] }
 0x355   : > { %v7978_v1 = vpack.c.bf16 %v1639_v0, %v1638_v63 }
 0x356   : > { %v1424_v4 = vmul.f32 1.442695, %v1423_v2  ;;  %v1641_v2 = vld [vmem:[%s9657_s11 + $0x18] sm:$0xff] }
 0x357   : > { %v1098_v20 = vpop.permute.xlu1 %1097 }
 0x358   : > { %8282 = vpow2.f32 %v1424_v4 }
 0x35a   : > { %v8279_v6 = vpop.eup %8278 }
 0x35b   : > { %v1092_v10 = vsel %vm840_vm2, %v8279_v6, 0.0 }
 0x35c   : > { %1093 = vadd.xlane.f32.xlu1 %v1092_v10  ;;  %v1724_v10 = vld [vmem:[%s9659_s13 + $0x8] sm:$0xff] }
 0x35e   : > { %v8281_v12 = vpop.eup %8280 }
 0x35f   : > { %v1259_v13 = vsel %vm840_vm2, %v8281_v12, 0.0 }
 0x360   : > { %1260 = vadd.xlane.f32.xlu0 %v1259_v13 }
 0x362   : > { %v8283_v14 = vpop.eup %8282 }
 0x363   : > { %v1426_v15 = vsel %vm840_vm2, %v8283_v14, 0.0 }
 0x364   : > { %1427 = vadd.xlane.f32.xlu1 %v1426_v15 }
 0x375   : > { %1264 = vrot.lane.b32.xlu1 %v8659_v25, %s9668_s29  ;;  %s9674_s29 = smov 16  }
 0x376   : > { %1431 = vrot.lane.b32.xlu0 %v8659_v25, %s9666_s18  ;;  %v927_v16 = vpop.xlane.xlu0 %926  ;;  %s9676_s18 = smov 8  }
 0x377   : > { %8284 = vrcp.f32 %v927_v16  ;;  %v1727_v16 = vld [vmem:[%s9659_s13 + $0x20] sm:$0xff] }
 0x379   : > { %8167 = vrot.lane.b32.xlu1 %v8609_v3, %s9678_s28 }
 0x37a   : > { %v931_v17 = vpop.permute.xlu0 %930  ;;  %8172 = vrot.lane.b32.xlu0 %v8627_v9, %s9678_s28 }
 0x37b   : > { %7489 = vmatpush3.msra.mxu1 %v931_v17  ;;  %v1728_v17 = vld [vmem:[%s9659_s13 + $0x28] sm:$0xff] }
 0x37c   : > { %7498 = vmatprep.subr.mxu1 %v8454_v8 }
 0x381   : > { %v8285_v18 = vpop.eup %8284 }
 0x382   : > { %v929_v19 = vmul.f32 %v8285_v18, %v8277_v57  ;;  %v7990_v18 = vpack.c.bf16 %v1728_v17, %v1727_v16 }
 0x384   : > { %7491 = vmatmul.mubr.msk.f32.vlgmr.msra.gmra.mrb[4].mxu1 %vm840_vm2, %v929_v19 }
 0x385   : > { %7499 = vmatpush3.msra.mxu1 %v1098_v20  ;;  %7500 = vmatprep.mubr.msk.f32.mxu1 %vm8453_vm0, %v8454_v8 }
 0x386   : > { %7508 = vmatprep.subr.mxu1 %v8454_v8 }
 0x3e9   : > { %v1094_v21 = vpop.xlane.xlu1 %1093 }
 0x3ea   : > { %8286 = vrcp.f32 %v1094_v21  ;;  %v1628_v21 = vlaneseq }
 0x3ed   : > { %v1261_v22 = vpop.xlane.xlu0 %1260 }
 0x3ee   : > { %8288 = vrcp.f32 %v1261_v22 }
 0x3f1   : > { %v1428_v23 = vpop.xlane.xlu1 %1427  ;;  %v1432_v3 = vpop.permute.xlu0 %1431 }
 0x3f2   : > { %8290 = vrcp.f32 %v1428_v23  ;;  %v8791_v23 = vshrl.u32 %v1628_v21, 7 }
 0x3f4   : > { %v8287_v24 = vpop.eup %8286 }
 0x3f5   : > { %v1265_v25 = vpop.permute.xlu1 %1264  ;;  %v1096_v26 = vmul.f32 %v8287_v24, %v8279_v6  ;;  %v8173_v38 = vpop.permute.xlu0 %8172  ;;  %v1723_v6 = vld [vmem:[%s9659_s13] sm:$0xff]  ;;  %v8794_v24 = vsub.s32 0, %v8791_v23 }
 0x3f6   : > { %v8175_v39 = vunpack.i.h.bf16 %v8173_v38  ;;  %v8174_v40 = vunpack.i.l.bf16 %v8173_v38  ;;  %v7984_v13 = vpack.c.bf16 %v1724_v10, %v1723_v6 }
 0x3f7   : > { %7501 = vmatmul.mubr.msk.f32.vlgmr.msra.gmra.mrb[6].mxu1 %vm840_vm2, %v1096_v26  ;;  %v8800_v26 = vsub.s32 1, %v8791_v23 }
 0x3f8   : > { %v8289_v27 = vpop.eup %8288  ;;  %7509 = vmatpush3.msra.mxu1 %v1265_v25  ;;  %7510 = vmatprep.mubr.msk.f32.mxu1 %vm8453_vm0, %v8454_v8  ;;  %v7975_v41 = vpack.c.bf16 %v8175_v39, %v8174_v40  ;;  %v1627_v25 = vld [vmem:[%s9661_s15] sm:$0x3] }
 0x3f9   : > { %7518 = vmatprep.subr.mxu1 %v8454_v8  ;;  %v1263_v28 = vmul.f32 %v8289_v27, %v8281_v12  ;;  %v8168_v31 = vpop.permute.xlu1 %8167  ;;  %v1725_v12 = vld [vmem:[%s9659_s13 + $0x10] sm:$0xff]  ;;  %v1631_v27 = vrot.slane %v1627_v25, %v8794_v24 }
 0x3fa   : > { %v8170_v32 = vunpack.i.h.bf16 %v8168_v31  ;;  %v8169_v34 = vunpack.i.l.bf16 %v8168_v31 }
 0x3fb   : > { %7511 = vmatmul.mubr.msk.f32.vlgmr.msra.gmra.mrb[8].mxu1 %vm840_vm2, %v1263_v28 }
 0x3fc   : > { %v8291_v29 = vpop.eup %8290  ;;  %7519 = vmatpush3.msra.mxu1 %v1432_v3  ;;  %7520 = vmatprep.mubr.msk.f32.mxu1 %vm8453_vm0, %v8454_v8  ;;  %v7972_v35 = vpack.c.bf16 %v8170_v32, %v8169_v34  ;;  %v1729_v32 = vld [vmem:[%s9659_s13 + $0x30] sm:$0xff]  ;;  %v1730_v34 = vld [vmem:[%s9659_s13 + $0x38] sm:$0xff] }
 0x3fd   : > { %v1430_v30 = vmul.f32 %v8291_v29, %v8283_v14  ;;  %7977 = vmatprep.subr.bf16.mxu1 %v8452_v5  ;;  %v1726_v14 = vld [vmem:[%s9659_s13 + $0x18] sm:$0xff]  ;;  %v1636_v29 = vrot.slane %v1627_v25, %v8800_v26 }
 0x3fe   : > { %7973 = vmatpush3.bf16.msra.mxu0 %v7972_v35  ;;  %v7987_v15 = vpack.c.bf16 %v1726_v14, %v1725_v12  ;;  %v7993_v35 = vpack.c.bf16 %v1730_v34, %v1729_v32 }
 0x3ff   : > { %7521 = vmatmul.mubr.msk.f32.vlgmr.msra.gmra.mrb[10].mxu1 %vm840_vm2, %v1430_v30  ;;  %7974 = vmatprep.subr.bf16.mxu0 %v8452_v5 }
 0x400   : > { %7542 = vmatprep.mubr.msk.f32.mxu1 %vm8453_vm0, %v8454_v8  ;;  %7979 = vmatpush3.bf16.msra.mxu1 %v7978_v1 }
 0x401   : > { %7980 = vmatprep.subr.bf16.mxu1 %v8452_v5 }
 0x402   : > { %7976 = vmatpush3.bf16.msra.mxu0 %v7975_v41  ;;  %v7111_v41 = vld [vmem:[%s9660_s14] ss:$0 sm:$0xff] }
 0x403   : > { %7983 = vmatprep.subr.bf16.mxu0 %v8452_v5 }
 0x457   : > { %v1002_v36 = vpop.f32.mrb[4].mxu1 }
 0x458   : > { %v7492_v37 = vpop.f32.mrb[5].mxu1 }
 0x4ca   : > { %v1169_v42 = vpop.f32.mrb[6].mxu1 }
 0x4cb   : > { %1508 = vrot.lane.b32.xlu1 %v1169_v42, %s9676_s18  ;;  %v7502_v9 = vpop.f32.mrb[7].mxu1  ;;  %s9714_s18 = smov 112  }
 0x4ce   : > { %v1336_v43 = vpop.f32.mrb[8].mxu1 }
 0x4cf   : > { %1512 = vrot.lane.b32.xlu0 %v1336_v43, %s9674_s29  ;;  %v7512_v44 = vpop.f32.mrb[9].mxu1  ;;  %s9717_s29 = smov 80  }
 0x4d2   : > { %v1503_v45 = vpop.f32.mrb[10].mxu1 }
 0x4d3   : > { %1516 = vrot.lane.b32.xlu1 %v1503_v45, %s9672_s26  ;;  %v7522_v46 = vpop.f32.mrb[11].mxu1  ;;  %1536 = vrot.lane.b32.xlu0 %v8619_v7, %s9678_s28  ;;  %s624_s28 = scalar_lea.vmem %s9712_s1, %s8632_s30  ;;  %s644_s26 = scalar_lea.vmem %s9716_s6, %s8632_s30 }
 0x4d4   : > { %v7114_v46 = vld [vmem:[%s9655_s9 + $0x20] sm:$0xff] }
 0x53d   : > { %v1509_v47 = vpop.permute.xlu1 %1508 }
 0x53e   : > { %v1519_v49 = vsel %vm840_vm2, %v1002_v36, %v1509_v47  ;;  %v7109_v36 = vld [vmem:[%s9658_s12] ss:$0 sm:$0xff]  ;;  %v7115_v47 = vld [vmem:[%s9655_s9 + $0x28] sm:$0xff] }
 0x541   : > { %v1513_v48 = vpop.permute.xlu0 %1512 }
 0x542   : > { %v1521_v50 = vsel %vm1520_vm4, %v1519_v49, %v1513_v48  ;;  %v8830_v48 = vpack.i.bf16 %v7115_v47, %v7114_v46 }
 0x545   : > { %v1517_v51 = vpop.permute.xlu1 %1516  ;;  %v1537_v53 = vpop.permute.xlu0 %1536 }
 0x546   : > { %v1523_v52 = vsel %vm1522_vm5, %v1521_v50, %v1517_v51 }
 0x547   : > { %7532 = vmatmul.mubr.msk.f32.vlgmr.msra.gmra.mrb[8].mxu0 %vm677_vm1, %v1523_v52 }
 0x548   : > { %7561 = vmatprep.mubr.msk.f32.mxu0 %vm8453_vm0, %v8454_v8  ;;  %7985 = vmatpush3.bf16.msra.mxu0 %v7984_v13 }
 0x549   : > { %7986 = vmatprep.subr.bf16.mxu0 %v8452_v5 }
 0x54c   : > { %7988 = vmatpush3.bf16.msra.mxu0 %v7987_v15 }
 0x54d   : > { %7989 = vmatprep.subr.bf16.mxu0 %v8452_v5 }
 0x550   : > { %7991 = vmatpush3.bf16.msra.mxu0 %v7990_v18  ;;  %v654_v18 = vld [vmem:[%s624_s28] sm:$0xff]  ;;  %s9718_s28 = smov 72  }
 0x551   : > { %7992 = vmatprep.subr.bf16.mxu0 %v8452_v5 }
 0x554   : > { %7994 = vmatpush3.bf16.msra.mxu0 %v7993_v35 }
 0x555   : > { %7586 = vmatprep.subr.mxu0 %v8454_v8 }
 0x61a   : > { %v1608_v54 = vpop.f32.mrb[8].mxu0 }
 0x61b   : > { %v1609_v55 = vadd.f32 %v1608_v54, %v1537_v53  ;;  %v7533_v7 = vpop.f32.mrb[9].mxu0  ;;  %v7116_v54 = vld [vmem:[%s9655_s9 + $0x30] sm:$0xff] }
 0x61d   : > { %v1612_v56 = vadd.f32 %v1609_v55, %v8642_v11  ;;  %v1640_v11 = vld [vmem:[%s9657_s11 + $0x10] sm:$0xff]  ;;  %v7117_v55 = vld [vmem:[%s9655_s9 + $0x38] sm:$0xff] }
 0x61e   : > { %v7981_v4 = vpack.c.bf16 %v1641_v2, %v1640_v11  ;;  %v8841_v7 = vpack.i.bf16 %v7117_v55, %v7116_v54 }
 0x61f   : > { %v1613_v57 = vsel %vm677_vm1, %v1612_v56, 0.0 }
 0x620   : > { %1614 = vadd.xlane.f32.xlu1 %v1613_v57  ;;  %7982 = vmatpush3.bf16.msra.mxu1 %v7981_v4  ;;  %v7999_v57 = vpack.c.bf16 %v7117_v55, %v7116_v54 }
 0x621   : > { %7995 = vmatprep.subr.bf16.mxu1 %v8452_v5 }
 0x6ad   : > { %v1615_v58 = vpop.xlane.xlu1 %1614 }
 0x6ae   : > { %v1617_v59 = vmul.f32 0.03125, %v1615_v58  ;;  %v8850_v58 = vld [vmem:[%s9656_s10 + $0x1] ss:$0 sm:$0xff] }
 0x6b0   : > { %v1618_v60 = vsub.f32 %v1612_v56, %v1617_v59  ;;  %v7996_v56 = vpack.c.bf16 %v7115_v47, %v7114_v46 }
 0x6b2   : > { %v1619_v61 = vmul.f32 %v1618_v60, %v1618_v60 }
 0x6b4   : > { %v1620_v62 = vsel %vm677_vm1, %v1619_v61, 0.0 }
 0x6b5   : > { %1621 = vadd.xlane.f32.xlu0 %v1620_v62  ;;  %v7113_v62 = vld [vmem:[%s9661_s15 + $0x2] sm:$0x3] }
 0x6b6   : > { %v1831_v0 = vrot.slane %v7113_v62, %v8794_v24  ;;  %v1836_v10 = vrot.slane %v7113_v62, %v8800_v26 }
 0x742   : > { %v1622_v19 = vpop.xlane.xlu0 %1621 }
 0x743   : > { %v1623_v20 = vmul.f32 0.03125, %v1622_v19 }
 0x745   : > { %v1624_v22 = vadd.f32 1e-06, %v1623_v20 }
 0x747   : > { %8292 = vrsqrt.f32 %v1624_v22 }
 0x751   : > { %v8293_v28 = vpop.eup %8292 }
 0x752   : > { %v1626_v3 = vmul.f32 %v8293_v28, %v1618_v60 }
 0x754   : > { %v1632_v30 = vmul.f32 %v1631_v27, %v1626_v3 }
 0x756   : > { %v1637_v31 = vadd.f32 %v1636_v29, %v1632_v30 }
 0x758   : > { %7543 = vmatmul.mubr.msk.f32.vlgmr.msra.gmra.mrb[12].mxu1 %vm677_vm1, %v1637_v31 }
 0x759   : > { %7572 = vmatprep.mubr.msk.f32.mxu1 %vm8453_vm0, %v8454_v8  ;;  %7997 = vmatpush3.bf16.msra.mxu1 %v7996_v56 }
 0x75a   : > { %7998 = vmatprep.subr.bf16.mxu1 %v8452_v5 }
 0x75d   : > { %8000 = vmatpush3.bf16.msra.mxu1 %v7999_v57 }
 0x75e   : > { %8001 = vmatprep.subr.bf16.mxu1 %v8452_v5 }
 0x82b   : > { %v1718_v37 = vpop.f32.mrb[12].mxu1 }
 0x82c   : > { %v1719_v38 = vadd.f32 %v7109_v36, %v1718_v37  ;;  %v7544_v39 = vpop.f32.mrb[13].mxu1  ;;  %v660_v36 = vld [vmem:[%s644_s26] sm:$0xff]  ;;  %s632_s26 = scalar_lea.vmem %s9649_s3, %s8632_s30 }
 0x82d   : > { %vm661_vm7 = vcmp.gt.f32.partialorder %v660_v36, 0.0 }
 0x82e   : > { %v1722_v40 = vmax.f32 %v1719_v38, 0.0 }
 0x830   : > { %7562 = vmatmul.mubr.msk.f32.vlgmr.msra.gmra.mrb[10].mxu0 %vm1738_vm6, %v1722_v40 }
 0x831   : > { %7588 = vmatprep.mubr.msk.f32.mxu0 %vm8453_vm0, %v8454_v8 }
 0x903   : > { %v1808_v42 = vpop.f32.mrb[10].mxu0 }
 0x904   : > { %v1809_v9 = vadd.f32 %v7111_v41, %v1808_v42  ;;  %v7563_v43 = vpop.f32.mrb[11].mxu0 }
 0x906   : > { %v1812_v44 = vadd.f32 %v1809_v9, %v1637_v31 }
 0x908   : > { %v1813_v45 = vsel %vm677_vm1, %v1812_v44, 0.0 }
 0x909   : > { %1814 = vadd.xlane.f32.xlu0 %v1813_v45 }
 0x91f   : > { %8177 = vrot.lane.b32.xlu0 %v8830_v48, %s9711_s20 }
 0x996   : > { %v1815_v49 = vpop.xlane.xlu0 %1814 }
 0x997   : > { %v1816_v50 = vmul.f32 0.03125, %v1815_v49 }
 0x999   : > { %v1817_v51 = vsub.f32 %v1812_v44, %v1816_v50 }
 0x99a   : > { %v8178_v63 = vpop.permute.xlu0 %8177 }
 0x99b   : > { %v1818_v52 = vmul.f32 %v1817_v51, %v1817_v51  ;;  %v8180_v11 = vunpack.i.h.bf16 %v8178_v63  ;;  %v8179_v2 = vunpack.i.l.bf16 %v8178_v63 }
 0x99d   : > { %v1819_v53 = vsel %vm677_vm1, %v1818_v52, 0.0  ;;  %v8002_v13 = vpack.c.bf16 %v8180_v11, %v8179_v2 }
 0x99e   : > { %1820 = vadd.xlane.f32.xlu1 %v1819_v53 }
 0x9af   : > { %8182 = vrot.lane.b32.xlu1 %v8841_v7, %s9711_s20 }
 0x9b3   : > { %1940 = vrot.lane.b32.xlu1 %v8850_v58, %s9711_s20 }
 0xa2b   : > { %v1821_v59 = vpop.xlane.xlu1 %1820 }
 0xa2c   : > { %v1822_v60 = vmul.f32 0.03125, %v1821_v59 }
 0xa2e   : > { %v1823_v61 = vadd.f32 1e-06, %v1822_v60 }
 0xa2f   : > { %v8183_v6 = vpop.permute.xlu1 %8182 }
 0xa30   : > { %8294 = vrsqrt.f32 %v1823_v61  ;;  %v8185_v14 = vunpack.i.h.bf16 %v8183_v6  ;;  %v8184_v15 = vunpack.i.l.bf16 %v8183_v6 }
 0xa32   : > { %v8005_v17 = vpack.c.bf16 %v8185_v14, %v8184_v15 }
 0xa33   : > { %v1941_v25 = vpop.permute.xlu1 %1940 }
 0xa3a   : > { %v8295_v1 = vpop.eup %8294 }
 0xa3b   : > { %v1825_v4 = vmul.f32 %v8295_v1, %v1817_v51 }
 0xa3d   : > { %v1832_v12 = vmul.f32 %v1831_v0, %v1825_v4 }
 0xa3f   : > { %v8859_v16 = vadd.f32 %v1836_v10, %v1832_v12 }
 0xa41   : > { %7573 = vmatmul.mubr.msk.f32.vlgmr.msra.gmra.mrb[14].mxu1 %vm677_vm1, %v8859_v16 }
 0xa42   : > { %8003 = vmatpush3.bf16.msra.mxu1 %v8002_v13  ;;  %7583 = vmatprep.mubr.msk.f32.mxu1 %vm8453_vm0, %v8454_v8 }
 0xa43   : > { %8004 = vmatprep.subr.bf16.mxu1 %v8452_v5 }
 0xa46   : > { %8006 = vmatpush3.bf16.msra.mxu1 %v8005_v17 }
 0xa47   : > { %7591 = vmatprep.subr.mxu1 %v8454_v8 }
 0xa49   : > { %7584 = vmatmul.mubr.msk.f32.vlgmr.msra.gmra.mrb[16].mxu1 %vm677_vm1, %v654_v18 }
 0xa4a   : > { %7593 = vmatprep.mubr.msk.f32.mxu1 %vm8453_vm0, %v8454_v8 }
 0xb14   : > { %v1920_v19 = vpop.f32.mrb[14].mxu1 }
 0xb15   : > { %v1921_v20 = vadd.f32 %v8850_v58, %v1920_v19  ;;  %v7574_v22 = vpop.f32.mrb[15].mxu1 }
 0xb17   : > { %2181 = vrot.lane.b32.xlu1 %v1921_v20, %s9713_s27 }
 0xb1b   : > { %2348 = vrot.lane.b32.xlu1 %v1921_v20, %s9714_s18 }
 0xb1c   : > { %v2012_v27 = vpop.f32.mrb[16].mxu1 }
 0xb1d   : > { %v8877_v28 = vadd.f32 %v2012_v27, %v1941_v25  ;;  %v7585_v3 = vpop.f32.mrb[17].mxu1 }
 0xb1f   : > { %2183 = vrot.lane.b32.xlu0 %v8877_v28, %s9713_s27  ;;  %7587 = vmatpush3.xpose.msk.msra.mxu0 %vm840_vm2, %v8877_v28 }
 0xb20   : > { %2515 = vrot.lane.b32.xlu1 %v1921_v20, %s9715_s19  ;;  %7596 = vmatprep.subr.mxu0 %v8454_v8 }
 0xb22   : > { %7589 = vmatmul.mubr.msk.f32.vlgmr.msra.gmra.mrb[12].mxu0 %vm840_vm2, %v1921_v20 }
 0xb23   : > { %2350 = vrot.lane.b32.xlu0 %v8877_v28, %s9714_s18  ;;  %7598 = vmatprep.mubr.msk.f32.mxu0 %vm8453_vm0, %v8454_v8 }
 0xb27   : > { %2517 = vrot.lane.b32.xlu0 %v8877_v28, %s9715_s19 }
 0xb89   : > { %v2182_v29 = vpop.permute.xlu1 %2181 }
 0xb8d   : > { %v2349_v32 = vpop.permute.xlu1 %2348 }
 0xb91   : > { %v2184_v30 = vpop.permute.xlu0 %2183 }
 0xb92   : > { %7597 = vmatpush3.xpose.msk.msra.mxu0 %vm840_vm2, %v2184_v30  ;;  %v2516_v35 = vpop.permute.xlu1 %2515 }
 0xb93   : > { %7606 = vmatprep.subr.mxu0 %v8454_v8 }
 0xb95   : > { %v2351_v31 = vpop.permute.xlu0 %2350  ;;  %7599 = vmatmul.mubr.msk.f32.vlgmr.msra.gmra.mrb[14].mxu0 %vm840_vm2, %v2182_v29 }
 0xb96   : > { %7607 = vmatpush3.xpose.msk.msra.mxu0 %vm840_vm2, %v2351_v31  ;;  %7608 = vmatprep.mubr.msk.f32.mxu0 %vm8453_vm0, %v8454_v8 }
 0xb97   : > { %7616 = vmatprep.subr.mxu0 %v8454_v8 }
 0xb99   : > { %v2518_v34 = vpop.permute.xlu0 %2517  ;;  %7609 = vmatmul.mubr.msk.f32.vlgmr.msra.gmra.mrb[16].mxu0 %vm840_vm2, %v2349_v32 }
 0xb9a   : > { %7617 = vmatpush3.xpose.msk.msra.mxu0 %vm840_vm2, %v2518_v34  ;;  %7618 = vmatprep.mubr.msk.f32.mxu0 %vm8453_vm0, %v8454_v8 }
 0xb9b   : > { %8007 = vmatprep.subr.bf16.mxu0 %v8452_v5 }
 0xb9d   : > { %7619 = vmatmul.mubr.msk.f32.vlgmr.msra.gmra.mrb[18].mxu0 %vm840_vm2, %v2516_v35 }
 0xb9e   : > { %7634 = vmatprep.mubr.msk.f32.mxu0 %vm8453_vm0, %v8454_v8 }
 0xbf5   : > { %v2088_v37 = vpop.f32.mrb[12].mxu0 }
 0xbf6   : > { %v2092_v38 = vmul.f32 0.35355338, %v2088_v37  ;;  %v7590_v39 = vpop.f32.mrb[13].mxu0 }
 0xbf8   : > { %v2093_v40 = vsel %vm661_vm7, %v2092_v38, -1e+09 }
 0xbf9   : > { %v2094_v41 = vsel %vm840_vm2, %v2093_v40, -inf }
 0xbfa   : > { %2095 = vmax.xlane.f32.xlu0 %v2094_v41 }
 0xc68   : > { %v2255_v42 = vpop.f32.mrb[14].mxu0 }
 0xc69   : > { %v2259_v9 = vmul.f32 0.35355338, %v2255_v42  ;;  %v7600_v43 = vpop.f32.mrb[15].mxu0 }
 0xc6b   : > { %v2260_v44 = vsel %vm661_vm7, %v2259_v9, -1e+09 }
 0xc6c   : > { %v2422_v45 = vpop.f32.mrb[16].mxu0  ;;  %v2261_v46 = vsel %vm840_vm2, %v2260_v44, -inf }
 0xc6d   : > { %v2426_v47 = vmul.f32 0.35355338, %v2422_v45  ;;  %2262 = vmax.xlane.f32.xlu1 %v2261_v46  ;;  %v7610_v49 = vpop.f32.mrb[17].mxu0 }
 0xc6f   : > { %v2427_v50 = vsel %vm661_vm7, %v2426_v47, -1e+09  ;;  %v7136_v47 = vld [vmem:[%s9655_s9 + $0x40] sm:$0xff] }
 0xc70   : > { %v2589_v51 = vpop.f32.mrb[18].mxu0  ;;  %v2428_v52 = vsel %vm840_vm2, %v2427_v50, -inf }
 0xc71   : > { %v2593_v53 = vmul.f32 0.35355338, %v2589_v51  ;;  %2429 = vmax.xlane.f32.xlu0 %v2428_v52  ;;  %v7620_v54 = vpop.f32.mrb[19].mxu0  ;;  %v7138_v51 = vld [vmem:[%s9655_s9 + $0x50] sm:$0xff]  ;;  %v7139_v52 = vld [vmem:[%s9655_s9 + $0x58] sm:$0xff] }
 0xc72   : > { %v8971_v54 = vld [vmem:[%s628_s17] sm:$0xff] }
 0xc73   : > { %v2594_v55 = vsel %vm661_vm7, %v2593_v53, -1e+09  ;;  %v8017_v53 = vpack.c.bf16 %v7139_v52, %v7138_v51 }
 0xc74   : > { %v2595_v56 = vsel %vm840_vm2, %v2594_v55, -inf }
 0xc75   : > { %2596 = vmax.xlane.f32.xlu0 %v2595_v56 }
 0xc7e   : > { %2105 = vrot.lane.b32.xlu1 %v8877_v28, %s9711_s20 }
 0xc87   : > { %v2096_v57 = vpop.xlane.xlu0 %2095 }
 0xc88   : > { %v2097_v59 = vsub.f32 %v2093_v40, %v2096_v57 }
 0xc8a   : > { %v2098_v60 = vmul.f32 1.442695, %v2097_v59 }
 0xc8c   : > { %8296 = vpow2.f32 %v2098_v60 }
 0xc96   : > { %v8297_v61 = vpop.eup %8296 }
 0xc97   : > { %v2100_v62 = vsel %vm840_vm2, %v8297_v61, 0.0 }
 0xca2   : > { %2101 = vadd.xlane.f32.xlu1 %v2100_v62 }
 0xcfa   : > { %v2263_v63 = vpop.xlane.xlu1 %2262 }
 0xcfb   : > { %v2264_v0 = vsub.f32 %v2260_v44, %v2263_v63 }
 0xcfd   : > { %v2265_v1 = vmul.f32 1.442695, %v2264_v0  ;;  %v8991_v0 = vld [vmem:[%s9656_s10 + $0x2] ss:$0 sm:$0xff] }
 0xcfe   : > { %v2106_v11 = vpop.permute.xlu1 %2105  ;;  %v2430_v2 = vpop.xlane.xlu0 %2429 }
 0xcff   : > { %8298 = vpow2.f32 %v2265_v1  ;;  %v2431_v4 = vsub.f32 %v2427_v50, %v2430_v2  ;;  %7592 = vmatpush3.msra.mxu1 %v2106_v11 }
 0xd00   : > { %7601 = vmatprep.subr.mxu1 %v8454_v8 }
 0xd01   : > { %v2432_v6 = vmul.f32 1.442695, %v2431_v4 }
 0xd02   : > { %v2597_v10 = vpop.xlane.xlu0 %2596 }
 0xd03   : > { %8300 = vpow2.f32 %v2432_v6  ;;  %v2598_v12 = vsub.f32 %v2594_v55, %v2597_v10 }
 0xd05   : > { %v2599_v13 = vmul.f32 1.442695, %v2598_v12 }
 0xd07   : > { %8302 = vpow2.f32 %v2599_v13 }
 0xd09   : > { %v8299_v14 = vpop.eup %8298 }
 0xd0a   : > { %v2267_v15 = vsel %vm840_vm2, %v8299_v14, 0.0 }
 0xd0b   : > { %2268 = vadd.xlane.f32.xlu0 %v2267_v15 }
 0xd0d   : > { %v8301_v17 = vpop.eup %8300 }
 0xd0e   : > { %v2434_v18 = vsel %vm840_vm2, %v8301_v17, 0.0 }
 0xd0f   : > { %2435 = vadd.xlane.f32.xlu1 %v2434_v18 }
 0xd11   : > { %v8303_v19 = vpop.eup %8302 }
 0xd12   : > { %v2601_v20 = vsel %vm840_vm2, %v8303_v19, 0.0 }
 0xd13   : > { %2602 = vadd.xlane.f32.xlu0 %v2601_v20 }
 0xd20   : > { %2439 = vrot.lane.b32.xlu1 %v8877_v28, %s9717_s29 }
 0xd24   : > { %2606 = vrot.lane.b32.xlu1 %v8877_v28, %s9718_s28 }
 0xd28   : > { %8192 = vrot.lane.b32.xlu1 %v8841_v7, %s9720_s5  ;;  %v7137_v7 = vld [vmem:[%s9655_s9 + $0x48] sm:$0xff] }
 0xd29   : > { %2272 = vrot.lane.b32.xlu0 %v8877_v28, %s9719_s23  ;;  %v8014_v50 = vpack.c.bf16 %v7137_v7, %v7136_v47  ;;  %v8976_v57 = vpack.i.bf16 %v7137_v7, %v7136_v47 }
 0xd2d   : > { %8187 = vrot.lane.b32.xlu0 %v8830_v48, %s9720_s5 }
 0xd2f   : > { %v2102_v22 = vpop.xlane.xlu1 %2101 }
 0xd30   : > { %8304 = vrcp.f32 %v2102_v22 }
 0xd3a   : > { %v8305_v25 = vpop.eup %8304 }
 0xd3b   : > { %v2104_v27 = vmul.f32 %v8305_v25, %v8297_v61  ;;  %v8983_v61 = vpack.i.bf16 %v7139_v52, %v7138_v51 }
 0xd3d   : > { %7594 = vmatmul.mubr.msk.f32.vlgmr.msra.gmra.mrb[18].mxu1 %vm840_vm2, %v2104_v27 }
 0xd3e   : > { %7603 = vmatprep.mubr.msk.f32.mxu1 %vm8453_vm0, %v8454_v8 }
 0xd98   : > { %v2269_v3 = vpop.xlane.xlu0 %2268 }
 0xd99   : > { %8306 = vrcp.f32 %v2269_v3 }
 0xd9c   : > { %v2436_v29 = vpop.xlane.xlu1 %2435 }
 0xd9d   : > { %8308 = vrcp.f32 %v2436_v29 }
 0xda0   : > { %v2603_v30 = vpop.xlane.xlu0 %2602  ;;  %v2440_v28 = vpop.permute.xlu1 %2439 }
 0xda1   : > { %8310 = vrcp.f32 %v2603_v30 }
 0xda3   : > { %v8307_v31 = vpop.eup %8306 }
 0xda4   : > { %v2273_v32 = vpop.permute.xlu0 %2272  ;;  %v2271_v34 = vmul.f32 %v8307_v31, %v8299_v14  ;;  %v2607_v36 = vpop.permute.xlu1 %2606 }
 0xda5   : > { %7602 = vmatpush3.msra.mxu1 %v2273_v32 }
 0xda6   : > { %7604 = vmatmul.mubr.msk.f32.vlgmr.msra.gmra.mrb[20].mxu1 %vm840_vm2, %v2271_v34  ;;  %7611 = vmatprep.subr.mxu1 %v8454_v8 }
 0xda7   : > { %v8309_v35 = vpop.eup %8308  ;;  %7612 = vmatpush3.msra.mxu1 %v2440_v28  ;;  %7613 = vmatprep.mubr.msk.f32.mxu1 %vm8453_vm0, %v8454_v8 }
 0xda8   : > { %7621 = vmatprep.subr.mxu1 %v8454_v8  ;;  %v2438_v48 = vmul.f32 %v8309_v35, %v8301_v17  ;;  %v8188_v39 = vpop.permute.xlu0 %8187  ;;  %v8193_v44 = vpop.permute.xlu1 %8192 }
 0xda9   : > { %v8190_v40 = vunpack.i.h.bf16 %v8188_v39  ;;  %v8189_v41 = vunpack.i.l.bf16 %v8188_v39  ;;  %v8195_v45 = vunpack.i.h.bf16 %v8193_v44  ;;  %v8194_v46 = vunpack.i.l.bf16 %v8193_v44 }
 0xdaa   : > { %7614 = vmatmul.mubr.msk.f32.vlgmr.msra.gmra.mrb[22].mxu1 %vm840_vm2, %v2438_v48  ;;  %v2815_v39 = vand.u32 127, %v1628_v21 }
 0xdab   : > { %v8311_v37 = vpop.eup %8310  ;;  %7622 = vmatpush3.msra.mxu1 %v2607_v36  ;;  %7623 = vmatprep.mubr.msk.f32.mxu1 %vm8453_vm0, %v8454_v8  ;;  %v8008_v42 = vpack.c.bf16 %v8190_v40, %v8189_v41  ;;  %v8011_v49 = vpack.c.bf16 %v8195_v45, %v8194_v46 }
 0xdac   : > { %v2605_v38 = vmul.f32 %v8311_v37, %v8303_v19  ;;  %8013 = vmatprep.subr.bf16.mxu1 %v8452_v5  ;;  %vm2816_vm8 = vcmp.ge.s32.totalorder %v8791_v23, %v2815_v39 }
 0xdad   : > { %8009 = vmatpush3.bf16.msra.mxu0 %v8008_v42 }
 0xdae   : > { %7624 = vmatmul.mubr.msk.f32.vlgmr.msra.gmra.mrb[24].mxu1 %vm840_vm2, %v2605_v38  ;;  %8010 = vmatprep.subr.bf16.mxu0 %v8452_v5 }
 0xdaf   : > { %7645 = vmatprep.mubr.msk.f32.mxu1 %vm8453_vm0, %v8454_v8  ;;  %8015 = vmatpush3.bf16.msra.mxu1 %v8014_v50 }
 0xdb0   : > { %8016 = vmatprep.subr.bf16.mxu1 %v8452_v5 }
 0xdb1   : > { %8012 = vmatpush3.bf16.msra.mxu0 %v8011_v49 }
 0xdb2   : > { %8019 = vmatprep.subr.bf16.mxu0 %v8452_v5 }
 0xdb3   : > { %8018 = vmatpush3.bf16.msra.mxu1 %v8017_v53 }
 0xdb4   : > { %7659 = vmatprep.subr.mxu1 %v8454_v8 }
 0xdb6   : > { %7646 = vmatmul.mubr.msk.f32.vlgmr.msra.gmra.mrb[26].mxu1 %vm677_vm1, %v8971_v54 }
 0xdb7   : > { %7661 = vmatprep.mubr.msk.f32.mxu1 %vm8453_vm0, %v8454_v8 }
 0xe10   : > { %v2177_v9 = vpop.f32.mrb[18].mxu1 }
 0xe11   : > { %v7595_v43 = vpop.f32.mrb[19].mxu1 }
 0xe79   : > { %v2344_v55 = vpop.f32.mrb[20].mxu1 }
 0xe7a   : > { %2683 = vrot.lane.b32.xlu0 %v2344_v55, %s9722_s16  ;;  %v7605_v56 = vpop.f32.mrb[21].mxu1 }
 0xe7d   : > { %v2511_v59 = vpop.f32.mrb[22].mxu1 }
 0xe7e   : > { %2687 = vrot.lane.b32.xlu1 %v2511_v59, %s9723_s21  ;;  %v7615_v60 = vpop.f32.mrb[23].mxu1  ;;  %8197 = vrot.lane.b32.xlu0 %v8976_v57, %s9711_s20 }
 0xe81   : > { %v2678_v62 = vpop.f32.mrb[24].mxu1 }
 0xe82   : > { %2691 = vrot.lane.b32.xlu1 %v2678_v62, %s9724_s24  ;;  %v7625_v63 = vpop.f32.mrb[25].mxu1  ;;  %8202 = vrot.lane.b32.xlu0 %v8983_v61, %s9711_s20 }
 0xe86   : > { %2919 = vrot.lane.b32.xlu1 %v8991_v0, %s9711_s20 }
 0xe89   : > { %v2899_v22 = vpop.f32.mrb[26].mxu1 }
 0xe8a   : > { %v2900_v25 = vadd.f32 %v8991_v0, %v2899_v22  ;;  %v7647_v27 = vpop.f32.mrb[27].mxu1 }
 0xe8c   : > { %3157 = vrot.lane.b32.xlu1 %v2900_v25, %s9713_s27 }
 0xe90   : > { %3324 = vrot.lane.b32.xlu1 %v2900_v25, %s9714_s18 }
 0xe94   : > { %3491 = vrot.lane.b32.xlu1 %v2900_v25, %s9715_s19 }
 0xeec   : > { %v2684_v1 = vpop.permute.xlu0 %2683 }
 0xeed   : > { %v2694_v10 = vsel %vm840_vm2, %v2177_v9, %v2684_v1 }
 0xef0   : > { %v2688_v11 = vpop.permute.xlu1 %2687  ;;  %v8198_v2 = vpop.permute.xlu0 %8197 }
 0xef1   : > { %v8200_v4 = vunpack.i.h.bf16 %v8198_v2  ;;  %v8199_v6 = vunpack.i.l.bf16 %v8198_v2  ;;  %v2695_v13 = vsel %vm1520_vm4, %v2694_v10, %v2688_v11 }
 0xef3   : > { %v8020_v12 = vpack.c.bf16 %v8200_v4, %v8199_v6 }
 0xef4   : > { %v2692_v14 = vpop.permute.xlu1 %2691  ;;  %v8203_v15 = vpop.permute.xlu0 %8202 }
 0xef5   : > { %v2696_v17 = vsel %vm1522_vm5, %v2695_v13, %v2692_v14  ;;  %v8205_v18 = vunpack.i.h.bf16 %v8203_v15  ;;  %v8204_v19 = vunpack.i.l.bf16 %v8203_v15 }
 0xef6   : > { %7635 = vmatmul.mubr.msk.f32.vlgmr.msra.gmra.mrb[20].mxu0 %vm677_vm1, %v2696_v17 }
 0xef7   : > { %v8023_v20 = vpack.c.bf16 %v8205_v18, %v8204_v19  ;;  %8021 = vmatpush3.bf16.msra.mxu0 %v8020_v12  ;;  %7656 = vmatprep.mubr.msk.f32.mxu0 %vm8453_vm0, %v8454_v8 }
 0xef8   : > { %8022 = vmatprep.subr.bf16.mxu0 %v8452_v5  ;;  %v2920_v30 = vpop.permute.xlu1 %2919 }
 0xefb   : > { %8024 = vmatpush3.bf16.msra.mxu0 %v8023_v20 }
 0xefc   : > { %7669 = vmatprep.subr.mxu0 %v8454_v8 }
 0xefe   : > { %7657 = vmatmul.mubr.msk.f32.vlgmr.msra.gmra.mrb[22].mxu0 %vm677_vm1, %v8971_v54  ;;  %v3158_v34 = vpop.permute.xlu1 %3157 }
 0xeff   : > { %7671 = vmatprep.mubr.msk.f32.mxu0 %vm8453_vm0, %v8454_v8 }
 0xf02   : > { %v3325_v36 = vpop.permute.xlu1 %3324 }
 0xf06   : > { %v3492_v38 = vpop.permute.xlu1 %3491 }
 0xfc9   : > { %v9011_v3 = vpop.f32.mrb[20].mxu0 }
 0xfca   : > { %v7636_v29 = vpop.f32.mrb[21].mxu0 }
 0xfd1   : > { %v2988_v31 = vpop.f32.mrb[22].mxu0 }
 0xfd2   : > { %v9013_v28 = vadd.f32 %v2988_v31, %v2920_v30  ;;  %v7658_v32 = vpop.f32.mrb[23].mxu0 }
 0xfd4   : > { %3159 = vrot.lane.b32.xlu0 %v9013_v28, %s9713_s27  ;;  %7660 = vmatpush3.xpose.msk.msra.mxu1 %vm840_vm2, %v9013_v28 }
 0xfd5   : > { %7664 = vmatprep.subr.mxu1 %v8454_v8 }
 0xfd7   : > { %7662 = vmatmul.mubr.msk.f32.vlgmr.msra.gmra.mrb[28].mxu1 %vm840_vm2, %v2900_v25 }
 0xfd8   : > { %3326 = vrot.lane.b32.xlu0 %v9013_v28, %s9714_s18  ;;  %7666 = vmatprep.mubr.msk.f32.mxu1 %vm8453_vm0, %v8454_v8 }
 0xfdc   : > { %3493 = vrot.lane.b32.xlu0 %v9013_v28, %s9715_s19 }
0x1046   : > { %v3160_v35 = vpop.permute.xlu0 %3159 }
0x1047   : > { %7670 = vmatpush3.xpose.msk.msra.mxu0 %vm840_vm2, %v3160_v35 }
0x1048   : > { %7679 = vmatprep.subr.mxu0 %v8454_v8 }
0x104a   : > { %v3327_v48 = vpop.permute.xlu0 %3326  ;;  %7672 = vmatmul.mubr.msk.f32.vlgmr.msra.gmra.mrb[24].mxu0 %vm840_vm2, %v3158_v34 }
0x104b   : > { %7680 = vmatpush3.xpose.msk.msra.mxu0 %vm840_vm2, %v3327_v48  ;;  %7681 = vmatprep.mubr.msk.f32.mxu0 %vm8453_vm0, %v8454_v8 }
0x104c   : > { %7689 = vmatprep.subr.mxu0 %v8454_v8 }
0x104e   : > { %v3494_v37 = vpop.permute.xlu0 %3493  ;;  %7682 = vmatmul.mubr.msk.f32.vlgmr.msra.gmra.mrb[26].mxu0 %vm840_vm2, %v3325_v36 }
0x104f   : > { %7690 = vmatpush3.xpose.msk.msra.mxu0 %vm840_vm2, %v3494_v37  ;;  %7691 = vmatprep.mubr.msk.f32.mxu0 %vm8453_vm0, %v8454_v8 }
0x1050   : > { %8025 = vmatprep.subr.bf16.mxu0 %v8452_v5 }
0x1052   : > { %7692 = vmatmul.mubr.msk.f32.vlgmr.msra.gmra.mrb[28].mxu0 %vm840_vm2, %v3492_v38 }
0x1053   : > { %7707 = vmatprep.mubr.msk.f32.mxu0 %vm8453_vm0, %v8454_v8 }
0x10aa   : > { %v3064_v40 = vpop.f32.mrb[28].mxu1 }
0x10ab   : > { %v3068_v41 = vmul.f32 0.35355338, %v3064_v40  ;;  %v7663_v42 = vpop.f32.mrb[29].mxu1 }
0x10ad   : > { %v3069_v9 = vsel %vm2816_vm8, %v3068_v41, -1e+09 }
0x10ae   : > { %v3070_v43 = vsel %vm840_vm2, %v3069_v9, -inf }
0x10af   : > { %3071 = vmax.xlane.f32.xlu0 %v3070_v43 }
0x111d   : > { %v3231_v44 = vpop.f32.mrb[24].mxu0 }
0x111e   : > { %v3235_v45 = vmul.f32 0.35355338, %v3231_v44  ;;  %v7673_v46 = vpop.f32.mrb[25].mxu0 }
0x1120   : > { %v3236_v47 = vsel %vm2816_vm8, %v3235_v45, -1e+09 }
0x1121   : > { %v3398_v7 = vpop.f32.mrb[26].mxu0  ;;  %v3237_v21 = vsel %vm840_vm2, %v3236_v47, -inf }
0x1122   : > { %v3402_v49 = vmul.f32 0.35355338, %v3398_v7  ;;  %3238 = vmax.xlane.f32.xlu1 %v3237_v21  ;;  %v7683_v50 = vpop.f32.mrb[27].mxu0 }
0x1124   : > { %v3403_v51 = vsel %vm2816_vm8, %v3402_v49, -1e+09 }
0x1125   : > { %v3565_v52 = vpop.f32.mrb[28].mxu0  ;;  %v3404_v53 = vsel %vm840_vm2, %v3403_v51, -inf }
0x1126   : > { %v3569_v55 = vmul.f32 0.35355338, %v3565_v52  ;;  %v7693_v56 = vpop.f32.mrb[29].mxu0  ;;  %3405 = vmax.xlane.f32.xlu0 %v3404_v53 }
0x1128   : > { %v3570_v59 = vsel %vm2816_vm8, %v3569_v55, -1e+09 }
0x1129   : > { %v3571_v60 = vsel %vm840_vm2, %v3570_v59, -inf }
0x112a   : > { %3572 = vmax.xlane.f32.xlu0 %v3571_v60 }
0x1133   : > { %3081 = vrot.lane.b32.xlu1 %v9013_v28, %s9711_s20 }
0x113c   : > { %v3072_v62 = vpop.xlane.xlu0 %3071 }
0x113d   : > { %v3073_v63 = vsub.f32 %v3069_v9, %v3072_v62 }
0x113f   : > { %v3074_v1 = vmul.f32 1.442695, %v3073_v63 }
0x1141   : > { %8312 = vpow2.f32 %v3074_v1 }
0x114b   : > { %v8313_v11 = vpop.eup %8312 }
0x114c   : > { %v3076_v2 = vsel %vm840_vm2, %v8313_v11, 0.0 }
0x1157   : > { %3077 = vadd.xlane.f32.xlu1 %v3076_v2 }
0x11af   : > { %v3239_v4 = vpop.xlane.xlu1 %3238 }
0x11b0   : > { %v3240_v6 = vsub.f32 %v3236_v47, %v3239_v4 }
0x11b2   : > { %v3241_v10 = vmul.f32 1.442695, %v3240_v6 }
0x11b3   : > { %v3082_v12 = vpop.permute.xlu1 %3081  ;;  %v3406_v23 = vpop.xlane.xlu0 %3405 }
0x11b4   : > { %8314 = vpow2.f32 %v3241_v10  ;;  %v3407_v13 = vsub.f32 %v3403_v51, %v3406_v23  ;;  %7665 = vmatpush3.msra.mxu1 %v3082_v12 }
0x11b5   : > { %7674 = vmatprep.subr.mxu1 %v8454_v8 }
0x11b6   : > { %v3408_v14 = vmul.f32 1.442695, %v3407_v13 }
0x11b7   : > { %v3573_v15 = vpop.xlane.xlu0 %3572 }
0x11b8   : > { %8316 = vpow2.f32 %v3408_v14  ;;  %v3574_v17 = vsub.f32 %v3570_v59, %v3573_v15 }
0x11ba   : > { %v3575_v18 = vmul.f32 1.442695, %v3574_v17 }
0x11bc   : > { %8318 = vpow2.f32 %v3575_v18 }
0x11be   : > { %v8315_v19 = vpop.eup %8314 }
0x11bf   : > { %v3243_v20 = vsel %vm840_vm2, %v8315_v19, 0.0 }
0x11c0   : > { %3244 = vadd.xlane.f32.xlu0 %v3243_v20  ;;  %v7158_v20 = vld [vmem:[%s9655_s9 + $0x60] sm:$0xff] }
0x11c2   : > { %v8317_v22 = vpop.eup %8316 }
0x11c3   : > { %v3410_v25 = vsel %vm840_vm2, %v8317_v22, 0.0 }
0x11c4   : > { %3411 = vadd.xlane.f32.xlu1 %v3410_v25 }
0x11c6   : > { %v8319_v27 = vpop.eup %8318 }
0x11c7   : > { %v3577_v29 = vsel %vm840_vm2, %v8319_v27, 0.0 }
0x11c8   : > { %3578 = vadd.xlane.f32.xlu0 %v3577_v29 }
0x11d5   : > { %3415 = vrot.lane.b32.xlu1 %v9013_v28, %s9717_s29 }
0x11d9   : > { %3582 = vrot.lane.b32.xlu1 %v9013_v28, %s9718_s28 }
0x11dd   : > { %8212 = vrot.lane.b32.xlu1 %v8983_v61, %s9720_s5 }
0x11de   : > { %3248 = vrot.lane.b32.xlu0 %v9013_v28, %s9719_s23 }
0x11e2   : > { %8207 = vrot.lane.b32.xlu0 %v8976_v57, %s9720_s5 }
0x11e4   : > { %v3078_v30 = vpop.xlane.xlu1 %3077 }
0x11e5   : > { %8320 = vrcp.f32 %v3078_v30 }
0x11ef   : > { %v8321_v31 = vpop.eup %8320 }
0x11f0   : > { %v3080_v32 = vmul.f32 %v8321_v31, %v8313_v11 }
0x11f2   : > { %7667 = vmatmul.mubr.msk.f32.vlgmr.msra.gmra.mrb[30].mxu1 %vm840_vm2, %v3080_v32 }
0x11f3   : > { %7676 = vmatprep.mubr.msk.f32.mxu1 %vm8453_vm0, %v8454_v8 }
0x124d   : > { %v3245_v34 = vpop.xlane.xlu0 %3244 }
0x124e   : > { %8322 = vrcp.f32 %v3245_v34  ;;  %v7160_v34 = vld [vmem:[%s9655_s9 + $0x70] sm:$0xff] }
0x1251   : > { %v3412_v35 = vpop.xlane.xlu1 %3411 }
0x1252   : > { %8324 = vrcp.f32 %v3412_v35  ;;  %v7161_v35 = vld [vmem:[%s9655_s9 + $0x78] sm:$0xff] }
0x1255   : > { %v3579_v48 = vpop.xlane.xlu0 %3578  ;;  %v3416_v28 = vpop.permute.xlu1 %3415 }
0x1256   : > { %8326 = vrcp.f32 %v3579_v48  ;;  %v9126_v48 = vpack.i.bf16 %v7161_v35, %v7160_v34 }
0x1258   : > { %v8323_v36 = vpop.eup %8322 }
0x1259   : > { %v3249_v37 = vpop.permute.xlu0 %3248  ;;  %v3247_v38 = vmul.f32 %v8323_v36, %v8315_v19  ;;  %v3583_v40 = vpop.permute.xlu1 %3582 }
0x125a   : > { %7675 = vmatpush3.msra.mxu1 %v3249_v37 }
0x125b   : > { %7677 = vmatmul.mubr.msk.f32.vlgmr.msra.gmra.mrb[32].mxu1 %vm840_vm2, %v3247_v38  ;;  %7684 = vmatprep.subr.mxu1 %v8454_v8 }
0x125c   : > { %v8325_v39 = vpop.eup %8324  ;;  %7685 = vmatpush3.msra.mxu1 %v3416_v28  ;;  %7686 = vmatprep.mubr.msk.f32.mxu1 %vm8453_vm0, %v8454_v8 }
0x125d   : > { %7694 = vmatprep.subr.mxu1 %v8454_v8  ;;  %v3414_v57 = vmul.f32 %v8325_v39, %v8317_v22  ;;  %v8208_v9 = vpop.permute.xlu0 %8207  ;;  %v8213_v7 = vpop.permute.xlu1 %8212  ;;  %v7159_v22 = vld [vmem:[%s9655_s9 + $0x68] sm:$0xff] }
0x125e   : > { %v8210_v43 = vunpack.i.h.bf16 %v8208_v9  ;;  %v8209_v44 = vunpack.i.l.bf16 %v8208_v9  ;;  %v8215_v21 = vunpack.i.h.bf16 %v8213_v7  ;;  %v8214_v49 = vunpack.i.l.bf16 %v8213_v7 }
0x125f   : > { %7687 = vmatmul.mubr.msk.f32.vlgmr.msra.gmra.mrb[34].mxu1 %vm840_vm2, %v3414_v57  ;;  %v9115_v25 = vpack.i.bf16 %v7159_v22, %v7158_v20  ;;  %v8032_v39 = vpack.c.bf16 %v7159_v22, %v7158_v20  ;;  %v8035_v57 = vpack.c.bf16 %v7161_v35, %v7160_v34 }
0x1260   : > { %v8327_v41 = vpop.eup %8326  ;;  %7695 = vmatpush3.msra.mxu1 %v3583_v40  ;;  %7696 = vmatprep.mubr.msk.f32.mxu1 %vm8453_vm0, %v8454_v8  ;;  %v8026_v45 = vpack.c.bf16 %v8210_v43, %v8209_v44  ;;  %v8029_v50 = vpack.c.bf16 %v8215_v21, %v8214_v49  ;;  %v9136_v40 = vld [vmem:[%s9656_s10 + $0x3] ss:$0 sm:$0xff]  ;;  %v7135_v43 = vld [vmem:[%s9661_s15 + $0x4] sm:$0x3] }
0x1261   : > { %v3581_v42 = vmul.f32 %v8327_v41, %v8319_v27  ;;  %8031 = vmatprep.subr.bf16.mxu1 %v8452_v5  ;;  %v2804_v44 = vrot.slane %v7135_v43, %v8794_v24  ;;  %v2809_v21 = vrot.slane %v7135_v43, %v8800_v26 }
0x1262   : > { %8027 = vmatpush3.bf16.msra.mxu0 %v8026_v45 }
0x1263   : > { %7697 = vmatmul.mubr.msk.f32.vlgmr.msra.gmra.mrb[36].mxu1 %vm840_vm2, %v3581_v42  ;;  %8028 = vmatprep.subr.bf16.mxu0 %v8452_v5 }
0x1264   : > { %7718 = vmatprep.mubr.msk.f32.mxu1 %vm8453_vm0, %v8454_v8  ;;  %8033 = vmatpush3.bf16.msra.mxu1 %v8032_v39 }
0x1265   : > { %8034 = vmatprep.subr.bf16.mxu1 %v8452_v5 }
0x1266   : > { %8030 = vmatpush3.bf16.msra.mxu0 %v8029_v50 }
0x1267   : > { %8037 = vmatprep.subr.bf16.mxu0 %v8452_v5 }
0x1268   : > { %8036 = vmatpush3.bf16.msra.mxu1 %v8035_v57 }
0x1269   : > { %7732 = vmatprep.subr.mxu1 %v8454_v8 }
0x12c5   : > { %v3153_v46 = vpop.f32.mrb[30].mxu1 }
0x12c6   : > { %v7668_v47 = vpop.f32.mrb[31].mxu1 }
0x132e   : > { %v3320_v51 = vpop.f32.mrb[32].mxu1 }
0x132f   : > { %3659 = vrot.lane.b32.xlu0 %v3320_v51, %s9722_s16  ;;  %v7678_v61 = vpop.f32.mrb[33].mxu1 }
0x1332   : > { %v3487_v52 = vpop.f32.mrb[34].mxu1 }
0x1333   : > { %3663 = vrot.lane.b32.xlu1 %v3487_v52, %s9723_s21  ;;  %v7688_v53 = vpop.f32.mrb[35].mxu1 }
0x1336   : > { %v3654_v55 = vpop.f32.mrb[36].mxu1 }
0x1337   : > { %2709 = vrot.lane.b32.xlu1 %v8850_v58, %s9720_s5  ;;  %3667 = vrot.lane.b32.xlu0 %v3654_v55, %s9724_s24  ;;  %v7698_v56 = vpop.f32.mrb[37].mxu1 }
0x1338   : > { %v7157_v56 = vld [vmem:[%s9661_s15 + $0x6] sm:$0x3] }
0x133b   : > { %3685 = vrot.lane.b32.xlu0 %v8991_v0, %s9720_s5 }
0x13a1   : > { %v3660_v59 = vpop.permute.xlu0 %3659 }
0x13a2   : > { %v3670_v62 = vsel %vm840_vm2, %v3153_v46, %v3660_v59  ;;  %v3780_v59 = vrot.slane %v7157_v56, %v8794_v24 }
0x13a5   : > { %v3664_v60 = vpop.permute.xlu1 %3663 }
0x13a6   : > { %v3671_v63 = vsel %vm1520_vm4, %v3670_v62, %v3664_v60 }
0x13a9   : > { %v2710_v1 = vpop.permute.xlu1 %2709  ;;  %v3668_v11 = vpop.permute.xlu0 %3667 }
0x13aa   : > { %v2782_v2 = vadd.f32 %v9011_v3, %v2710_v1  ;;  %v3672_v4 = vsel %vm1522_vm5, %v3671_v63, %v3668_v11  ;;  %v3785_v63 = vrot.slane %v7157_v56, %v8800_v26 }
0x13ab   : > { %7708 = vmatmul.mubr.msk.f32.vlgmr.msra.gmra.mrb[30].mxu0 %vm677_vm1, %v3672_v4 }
0x13ac   : > { %v2785_v58 = vadd.f32 %v2782_v2, %v8859_v16  ;;  %7729 = vmatprep.mubr.msk.f32.mxu0 %vm8453_vm0, %v8454_v8 }
0x13ad   : > { %v3686_v12 = vpop.permute.xlu0 %3685 }
0x13ae   : > { %v2786_v0 = vsel %vm677_vm1, %v2785_v58, 0.0 }
0x13af   : > { %2787 = vadd.xlane.f32.xlu1 %v2786_v0 }
0x143c   : > { %v2788_v6 = vpop.xlane.xlu1 %2787 }
0x143d   : > { %v2789_v10 = vmul.f32 0.03125, %v2788_v6 }
0x143f   : > { %v2790_v13 = vsub.f32 %v2785_v58, %v2789_v10 }
0x1441   : > { %v2791_v18 = vmul.f32 %v2790_v13, %v2790_v13 }
0x1443   : > { %v2792_v19 = vsel %vm677_vm1, %v2791_v18, 0.0 }
0x147e   : > { %v3757_v23 = vpop.f32.mrb[30].mxu0 }
0x147f   : > { %v3758_v14 = vadd.f32 %v3757_v23, %v3686_v12  ;;  %v7709_v15 = vpop.f32.mrb[31].mxu0 }
0x1481   : > { %v3761_v3 = vadd.f32 %v3758_v14, %v8971_v54 }
0x1483   : > { %v3762_v17 = vsel %vm677_vm1, %v3761_v3, 0.0 }
0x1484   : > { %3763 = vadd.xlane.f32.xlu0 %v3762_v17 }
0x1488   : > { %2793 = vadd.xlane.f32.xlu0 %v2792_v19 }
0x149e   : > { %8217 = vrot.lane.b32.xlu0 %v9115_v25, %s9711_s20 }
0x1511   : > { %v3764_v54 = vpop.xlane.xlu0 %3763 }
0x1512   : > { %v3765_v27 = vmul.f32 0.03125, %v3764_v54 }
0x1514   : > { %v3766_v29 = vsub.f32 %v3761_v3, %v3765_v27 }
0x1515   : > { %v2794_v32 = vpop.xlane.xlu0 %2793 }
0x1516   : > { %v3767_v30 = vmul.f32 %v3766_v29, %v3766_v29  ;;  %v2795_v41 = vmul.f32 0.03125, %v2794_v32 }
0x1518   : > { %v3768_v31 = vsel %vm677_vm1, %v3767_v30, 0.0  ;;  %v2796_v42 = vadd.f32 1e-06, %v2795_v41 }
0x1519   : > { %3769 = vadd.xlane.f32.xlu1 %v3768_v31  ;;  %v8218_v36 = vpop.permute.xlu0 %8217 }
0x151a   : > { %v8220_v28 = vunpack.i.h.bf16 %v8218_v36  ;;  %v8219_v37 = vunpack.i.l.bf16 %v8218_v36  ;;  %8328 = vrsqrt.f32 %v2796_v42 }
0x151c   : > { %v8038_v38 = vpack.c.bf16 %v8220_v28, %v8219_v37 }
0x151e   : > { %8039 = vmatpush3.bf16.msra.mxu0 %v8038_v38 }
0x151f   : > { %8040 = vmatprep.subr.bf16.mxu0 %v8452_v5 }
0x1524   : > { %v8329_v9 = vpop.eup %8328 }
0x1525   : > { %v2798_v45 = vmul.f32 %v8329_v9, %v2790_v13 }
0x1527   : > { %v2805_v7 = vmul.f32 %v2804_v44, %v2798_v45 }
0x1529   : > { %v2810_v52 = vadd.f32 %v2809_v21, %v2805_v7 }
0x152a   : > { %8222 = vrot.lane.b32.xlu1 %v9126_v48, %s9711_s20 }
0x152b   : > { %v2811_v55 = vadd.f32 %v2810_v52, %v8859_v16 }
0x152e   : > { %3889 = vrot.lane.b32.xlu1 %v9136_v40, %s9711_s20 }
0x15a6   : > { %v3770_v46 = vpop.xlane.xlu1 %3769 }
0x15a7   : > { %v3771_v47 = vmul.f32 0.03125, %v3770_v46 }
0x15a9   : > { %v3772_v49 = vadd.f32 1e-06, %v3771_v47 }
0x15aa   : > { %v8223_v50 = vpop.permute.xlu1 %8222 }
0x15ab   : > { %8330 = vrsqrt.f32 %v3772_v49  ;;  %v8225_v51 = vunpack.i.h.bf16 %v8223_v50  ;;  %v8224_v61 = vunpack.i.l.bf16 %v8223_v50 }
0x15ad   : > { %v8041_v53 = vpack.c.bf16 %v8225_v51, %v8224_v61 }
0x15ae   : > { %v3890_v16 = vpop.permute.xlu1 %3889 }
0x15af   : > { %8042 = vmatpush3.bf16.msra.mxu0 %v8041_v53 }
0x15b0   : > { %7742 = vmatprep.subr.mxu0 %v8454_v8 }
0x15b2   : > { %7730 = vmatmul.mubr.msk.f32.vlgmr.msra.gmra.mrb[32].mxu0 %vm677_vm1, %v2811_v55 }
0x15b3   : > { %7744 = vmatprep.mubr.msk.f32.mxu0 %vm8453_vm0, %v8454_v8 }
0x15b5   : > { %v8331_v60 = vpop.eup %8330 }
0x15b6   : > { %v3774_v62 = vmul.f32 %v8331_v60, %v3766_v29 }
0x15b8   : > { %v3781_v1 = vmul.f32 %v3780_v59, %v3774_v62 }
0x15ba   : > { %v9155_v11 = vadd.f32 %v3785_v63, %v3781_v1 }
0x15bc   : > { %7719 = vmatmul.mubr.msk.f32.vlgmr.msra.gmra.mrb[38].mxu1 %vm677_vm1, %v9155_v11 }
0x15bd   : > { %7734 = vmatprep.mubr.msk.f32.mxu1 %vm8453_vm0, %v8454_v8 }
0x1685   : > { %v3961_v2 = vpop.f32.mrb[32].mxu0 }
0x1686   : > { %v9161_v4 = vadd.f32 %v3961_v2, %v3890_v16  ;;  %v7731_v58 = vpop.f32.mrb[33].mxu0 }
0x1688   : > { %4132 = vrot.lane.b32.xlu0 %v9161_v4, %s9713_s27  ;;  %7733 = vmatpush3.xpose.msk.msra.mxu1 %vm840_vm2, %v9161_v4 }
0x1689   : > { %7737 = vmatprep.subr.mxu1 %v8454_v8 }
0x168c   : > { %4299 = vrot.lane.b32.xlu0 %v9161_v4, %s9714_s18 }
0x168f   : > { %v3869_v0 = vpop.f32.mrb[38].mxu1 }
0x1690   : > { %v3870_v6 = vadd.f32 %v9136_v40, %v3869_v0  ;;  %4466 = vrot.lane.b32.xlu0 %v9161_v4, %s9715_s19  ;;  %v7720_v10 = vpop.f32.mrb[39].mxu1 }
0x1692   : > { %4130 = vrot.lane.b32.xlu1 %v3870_v6, %s9713_s27  ;;  %7735 = vmatmul.mubr.msk.f32.vlgmr.msra.gmra.mrb[40].mxu1 %vm840_vm2, %v3870_v6 }
0x1693   : > { %7739 = vmatprep.mubr.msk.f32.mxu1 %vm8453_vm0, %v8454_v8 }
0x1696   : > { %4297 = vrot.lane.b32.xlu1 %v3870_v6, %s9714_s18 }
0x169a   : > { %4464 = vrot.lane.b32.xlu1 %v3870_v6, %s9715_s19 }
0x16fa   : > { %v4133_v12 = vpop.permute.xlu0 %4132 }
0x16fb   : > { %7743 = vmatpush3.xpose.msk.msra.mxu0 %vm840_vm2, %v4133_v12 }
0x16fc   : > { %7752 = vmatprep.subr.mxu0 %v8454_v8 }
0x16fe   : > { %v4300_v23 = vpop.permute.xlu0 %4299 }
0x1702   : > { %v4467_v15 = vpop.permute.xlu0 %4466 }
0x1704   : > { %v4131_v13 = vpop.permute.xlu1 %4130 }
0x1705   : > { %7745 = vmatmul.mubr.msk.f32.vlgmr.msra.gmra.mrb[34].mxu0 %vm840_vm2, %v4131_v13 }
0x1706   : > { %7753 = vmatpush3.xpose.msk.msra.mxu0 %vm840_vm2, %v4300_v23  ;;  %7754 = vmatprep.mubr.msk.f32.mxu0 %vm8453_vm0, %v8454_v8 }
0x1707   : > { %7762 = vmatprep.subr.mxu0 %v8454_v8 }
0x1708   : > { %v4298_v14 = vpop.permute.xlu1 %4297 }
0x1709   : > { %7755 = vmatmul.mubr.msk.f32.vlgmr.msra.gmra.mrb[36].mxu0 %vm840_vm2, %v4298_v14 }
0x170a   : > { %7763 = vmatpush3.xpose.msk.msra.mxu0 %vm840_vm2, %v4467_v15  ;;  %7764 = vmatprep.mubr.msk.f32.mxu0 %vm8453_vm0, %v8454_v8 }
0x170b   : > { %8043 = vmatprep.subr.bf16.mxu0 %v8452_v5 }
0x170c   : > { %v4465_v3 = vpop.permute.xlu1 %4464 }
0x170d   : > { %7765 = vmatmul.mubr.msk.f32.vlgmr.msra.gmra.mrb[38].mxu0 %vm840_vm2, %v4465_v3 }
0x170e   : > { %7780 = vmatprep.mubr.msk.f32.mxu0 %vm8453_vm0, %v8454_v8 }
0x1765   : > { %v4037_v17 = vpop.f32.mrb[40].mxu1 }
0x1766   : > { %v4041_v18 = vmul.f32 0.35355338, %v4037_v17  ;;  %v7736_v19 = vpop.f32.mrb[41].mxu1 }
0x1768   : > { %v4042_v20 = vsel %vm659_vm3, %v4041_v18, -1e+09 }
0x1769   : > { %v4043_v22 = vsel %vm840_vm2, %v4042_v20, -inf }
0x176a   : > { %4044 = vmax.xlane.f32.xlu0 %v4043_v22 }
0x17d8   : > { %v4204_v54 = vpop.f32.mrb[34].mxu0 }
0x17d9   : > { %v4208_v27 = vmul.f32 0.35355338, %v4204_v54  ;;  %v7746_v29 = vpop.f32.mrb[35].mxu0 }
0x17db   : > { %v4209_v30 = vsel %vm659_vm3, %v4208_v27, -1e+09 }
0x17dc   : > { %v4371_v31 = vpop.f32.mrb[36].mxu0  ;;  %v4210_v32 = vsel %vm840_vm2, %v4209_v30, -inf }
0x17dd   : > { %v4375_v34 = vmul.f32 0.35355338, %v4371_v31  ;;  %4211 = vmax.xlane.f32.xlu1 %v4210_v32  ;;  %v7756_v35 = vpop.f32.mrb[37].mxu0 }
0x17df   : > { %v4376_v36 = vsel %vm659_vm3, %v4375_v34, -1e+09 }
0x17e0   : > { %v4538_v28 = vpop.f32.mrb[38].mxu0  ;;  %v4377_v37 = vsel %vm840_vm2, %v4376_v36, -inf }
0x17e1   : > { %v4542_v38 = vmul.f32 0.35355338, %v4538_v28  ;;  %v7766_v39 = vpop.f32.mrb[39].mxu0  ;;  %4378 = vmax.xlane.f32.xlu0 %v4377_v37 }
0x17e3   : > { %v4543_v57 = vsel %vm659_vm3, %v4542_v38, -1e+09 }
0x17e4   : > { %v4544_v41 = vsel %vm840_vm2, %v4543_v57, -inf }
0x17e5   : > { %4545 = vmax.xlane.f32.xlu0 %v4544_v41 }
0x17ee   : > { %4054 = vrot.lane.b32.xlu1 %v9161_v4, %s9711_s20 }
0x17f7   : > { %v4045_v42 = vpop.xlane.xlu0 %4044 }
0x17f8   : > { %v4046_v9 = vsub.f32 %v4042_v20, %v4045_v42 }
0x17fa   : > { %v4047_v43 = vmul.f32 1.442695, %v4046_v9 }
0x17fc   : > { %8332 = vpow2.f32 %v4047_v43 }
0x1806   : > { %v8333_v44 = vpop.eup %8332 }
0x1807   : > { %v4049_v45 = vsel %vm840_vm2, %v8333_v44, 0.0 }
0x1812   : > { %4050 = vadd.xlane.f32.xlu1 %v4049_v45 }
0x186a   : > { %v4212_v46 = vpop.xlane.xlu1 %4211 }
0x186b   : > { %v4213_v47 = vsub.f32 %v4209_v30, %v4212_v46  ;;  %v7180_v46 = vld [vmem:[%s9655_s9 + $0x80] sm:$0xff] }
0x186d   : > { %v4214_v7 = vmul.f32 1.442695, %v4213_v47  ;;  %v7181_v47 = vld [vmem:[%s9655_s9 + $0x88] sm:$0xff] }
0x186e   : > { %v4055_v21 = vpop.permute.xlu1 %4054  ;;  %v4379_v33 = vpop.xlane.xlu0 %4378 }
0x186f   : > { %8334 = vpow2.f32 %v4214_v7  ;;  %v4380_v49 = vsub.f32 %v4376_v36, %v4379_v33  ;;  %7738 = vmatpush3.msra.mxu1 %v4055_v21  ;;  %v9259_v7 = vpack.i.bf16 %v7181_v47, %v7180_v46 }
0x1870   : > { %7747 = vmatprep.subr.mxu1 %v8454_v8 }
0x1871   : > { %v4381_v50 = vmul.f32 1.442695, %v4380_v49 }
0x1872   : > { %v4546_v51 = vpop.xlane.xlu0 %4545 }
0x1873   : > { %8336 = vpow2.f32 %v4381_v50  ;;  %v4547_v61 = vsub.f32 %v4543_v57, %v4546_v51  ;;  %v7182_v51 = vld [vmem:[%s9655_s9 + $0x90] sm:$0xff] }
0x1875   : > { %v4548_v52 = vmul.f32 1.442695, %v4547_v61  ;;  %v7183_v61 = vld [vmem:[%s9655_s9 + $0x98] sm:$0xff] }
0x1877   : > { %8338 = vpow2.f32 %v4548_v52  ;;  %v9270_v52 = vpack.i.bf16 %v7183_v61, %v7182_v51 }
0x1879   : > { %v8335_v53 = vpop.eup %8334 }
0x187a   : > { %v4216_v55 = vsel %vm840_vm2, %v8335_v53, 0.0 }
0x187b   : > { %4217 = vadd.xlane.f32.xlu0 %v4216_v55 }
0x187d   : > { %v8337_v56 = vpop.eup %8336 }
0x187e   : > { %v4383_v59 = vsel %vm840_vm2, %v8337_v56, 0.0 }
0x187f   : > { %4384 = vadd.xlane.f32.xlu1 %v4383_v59 }
0x1881   : > { %v8339_v60 = vpop.eup %8338 }
0x1882   : > { %v4550_v62 = vsel %vm840_vm2, %v8339_v60, 0.0 }
0x1883   : > { %4551 = vadd.xlane.f32.xlu0 %v4550_v62  ;;  %v8053_v62 = vpack.c.bf16 %v7183_v61, %v7182_v51 }
0x1890   : > { %4388 = vrot.lane.b32.xlu1 %v9161_v4, %s9717_s29 }
0x1894   : > { %4555 = vrot.lane.b32.xlu1 %v9161_v4, %s9718_s28 }
0x1898   : > { %8232 = vrot.lane.b32.xlu1 %v9126_v48, %s9720_s5 }
0x1899   : > { %4221 = vrot.lane.b32.xlu0 %v9161_v4, %s9719_s23 }
0x189d   : > { %8227 = vrot.lane.b32.xlu0 %v9115_v25, %s9720_s5 }
0x189f   : > { %v4051_v63 = vpop.xlane.xlu1 %4050 }
0x18a0   : > { %8340 = vrcp.f32 %v4051_v63  ;;  %v9280_v63 = vld [vmem:[%s9656_s10 + $0x4] ss:$0 sm:$0xff] }
0x18aa   : > { %v8341_v1 = vpop.eup %8340 }
0x18ab   : > { %v4053_v16 = vmul.f32 %v8341_v1, %v8333_v44 }
0x18ad   : > { %7740 = vmatmul.mubr.msk.f32.vlgmr.msra.gmra.mrb[42].mxu1 %vm840_vm2, %v4053_v16 }
0x18ae   : > { %7749 = vmatprep.mubr.msk.f32.mxu1 %vm8453_vm0, %v8454_v8 }
0x1908   : > { %v4218_v2 = vpop.xlane.xlu0 %4217 }
0x1909   : > { %8342 = vrcp.f32 %v4218_v2 }
0x190c   : > { %v4385_v58 = vpop.xlane.xlu1 %4384 }
0x190d   : > { %8344 = vrcp.f32 %v4385_v58 }
0x1910   : > { %v4552_v0 = vpop.xlane.xlu0 %4551  ;;  %v4389_v10 = vpop.permute.xlu1 %4388 }
0x1911   : > { %8346 = vrcp.f32 %v4552_v0 }
0x1913   : > { %v8343_v6 = vpop.eup %8342 }
0x1914   : > { %v4220_v4 = vmul.f32 %v8343_v6, %v8335_v53  ;;  %v4222_v12 = vpop.permute.xlu0 %4221  ;;  %v4556_v13 = vpop.permute.xlu1 %4555 }
0x1915   : > { %7748 = vmatpush3.msra.mxu1 %v4222_v12  ;;  %v7179_v12 = vld [vmem:[%s9661_s15 + $0x8] sm:$0x3] }
0x1916   : > { %7750 = vmatmul.mubr.msk.f32.vlgmr.msra.gmra.mrb[44].mxu1 %vm840_vm2, %v4220_v4  ;;  %7757 = vmatprep.subr.mxu1 %v8454_v8 }
0x1917   : > { %v8345_v23 = vpop.eup %8344  ;;  %7758 = vmatpush3.msra.mxu1 %v4389_v10  ;;  %7759 = vmatprep.mubr.msk.f32.mxu1 %vm8453_vm0, %v8454_v8  ;;  %v656_v10 = vld [vmem:[%s632_s26] sm:$0xff]  ;;  %s636_s26 = scalar_lea.vmem %s9650_s4, %s8632_s30 }
0x1918   : > { %v4387_v25 = vmul.f32 %v8345_v23, %v8337_v56  ;;  %7767 = vmatprep.subr.mxu1 %v8454_v8  ;;  %v8228_v3 = vpop.permute.xlu0 %8227  ;;  %v8233_v54 = vpop.permute.xlu1 %8232  ;;  %v4753_v23 = vrot.slane %v7179_v12, %v8794_v24 }
0x1919   : > { %v8230_v17 = vunpack.i.h.bf16 %v8228_v3  ;;  %v8229_v18 = vunpack.i.l.bf16 %v8228_v3  ;;  %v8235_v27 = vunpack.i.h.bf16 %v8233_v54  ;;  %v8234_v29 = vunpack.i.l.bf16 %v8233_v54 }
0x191a   : > { %7760 = vmatmul.mubr.msk.f32.vlgmr.msra.gmra.mrb[46].mxu1 %vm840_vm2, %v4387_v25 }
0x191b   : > { %v8347_v14 = vpop.eup %8346  ;;  %7768 = vmatpush3.msra.mxu1 %v4556_v13  ;;  %7769 = vmatprep.mubr.msk.f32.mxu1 %vm8453_vm0, %v8454_v8  ;;  %v8044_v19 = vpack.c.bf16 %v8230_v17, %v8229_v18  ;;  %v8047_v30 = vpack.c.bf16 %v8235_v27, %v8234_v29 }
0x191c   : > { %v4554_v15 = vmul.f32 %v8347_v14, %v8339_v60  ;;  %8049 = vmatprep.subr.bf16.mxu1 %v8452_v5  ;;  %v8050_v60 = vpack.c.bf16 %v7181_v47, %v7180_v46  ;;  %v4758_v14 = vrot.slane %v7179_v12, %v8800_v26 }
0x191d   : > { %8045 = vmatpush3.bf16.msra.mxu0 %v8044_v19 }
0x191e   : > { %7770 = vmatmul.mubr.msk.f32.vlgmr.msra.gmra.mrb[48].mxu1 %vm840_vm2, %v4554_v15  ;;  %8046 = vmatprep.subr.bf16.mxu0 %v8452_v5 }
0x191f   : > { %7791 = vmatprep.mubr.msk.f32.mxu1 %vm8453_vm0, %v8454_v8  ;;  %8051 = vmatpush3.bf16.msra.mxu1 %v8050_v60 }
0x1920   : > { %8052 = vmatprep.subr.bf16.mxu1 %v8452_v5 }
0x1921   : > { %8048 = vmatpush3.bf16.msra.mxu0 %v8047_v30 }
0x1922   : > { %8055 = vmatprep.subr.bf16.mxu0 %v8452_v5 }
0x1923   : > { %8054 = vmatpush3.bf16.msra.mxu1 %v8053_v62 }
0x1924   : > { %7805 = vmatprep.subr.mxu1 %v8454_v8 }
0x1980   : > { %v4126_v20 = vpop.f32.mrb[42].mxu1 }
0x1981   : > { %v7741_v22 = vpop.f32.mrb[43].mxu1 }
0x19e9   : > { %v4293_v31 = vpop.f32.mrb[44].mxu1 }
0x19ea   : > { %4632 = vrot.lane.b32.xlu0 %v4293_v31, %s9722_s16  ;;  %v7751_v48 = vpop.f32.mrb[45].mxu1 }
0x19ed   : > { %v4460_v32 = vpop.f32.mrb[46].mxu1 }
0x19ee   : > { %4636 = vrot.lane.b32.xlu1 %v4460_v32, %s9723_s21  ;;  %v7761_v34 = vpop.f32.mrb[47].mxu1 }
0x19f1   : > { %v4627_v35 = vpop.f32.mrb[48].mxu1 }
0x19f2   : > { %4640 = vrot.lane.b32.xlu0 %v4627_v35, %s9724_s24  ;;  %v7771_v36 = vpop.f32.mrb[49].mxu1  ;;  %4658 = vrot.lane.b32.xlu1 %v9136_v40, %s9720_s5  ;;  %v662_v35 = vld [vmem:[%s648_s0] sm:$0xff] }
0x19f3   : > { %vm663_vm9 = vcmp.gt.f32.partialorder %v662_v35, 0.0 }
0x1a5c   : > { %v4633_v28 = vpop.permute.xlu0 %4632 }
0x1a5d   : > { %v4643_v38 = vsel %vm840_vm2, %v4126_v20, %v4633_v28 }
0x1a60   : > { %v4637_v37 = vpop.permute.xlu1 %4636 }
0x1a61   : > { %v4644_v39 = vsel %vm1520_vm4, %v4643_v38, %v4637_v37 }
0x1a64   : > { %v4641_v57 = vpop.permute.xlu0 %4640  ;;  %v4659_v42 = vpop.permute.xlu1 %4658 }
0x1a65   : > { %v4645_v41 = vsel %vm1522_vm5, %v4644_v39, %v4641_v57 }
0x1a66   : > { %7781 = vmatmul.mubr.msk.f32.vlgmr.msra.gmra.mrb[40].mxu0 %vm677_vm1, %v4645_v41 }
0x1a67   : > { %7802 = vmatprep.mubr.msk.f32.mxu0 %vm8453_vm0, %v8454_v8 }
0x1b39   : > { %v4730_v9 = vpop.f32.mrb[40].mxu0 }
0x1b3a   : > { %v4731_v43 = vadd.f32 %v4730_v9, %v4659_v42  ;;  %v7782_v44 = vpop.f32.mrb[41].mxu0 }
0x1b3c   : > { %v4734_v40 = vadd.f32 %v4731_v43, %v9155_v11 }
0x1b3e   : > { %v4735_v45 = vsel %vm677_vm1, %v4734_v40, 0.0 }
0x1b3f   : > { %4736 = vadd.xlane.f32.xlu0 %v4735_v45 }
0x1b55   : > { %8237 = vrot.lane.b32.xlu0 %v9259_v7, %s9711_s20 }
0x1b59   : > { %4862 = vrot.lane.b32.xlu0 %v9280_v63, %s9711_s20 }
0x1bcc   : > { %v4737_v21 = vpop.xlane.xlu0 %4736 }
0x1bcd   : > { %v4738_v33 = vmul.f32 0.03125, %v4737_v21 }
0x1bcf   : > { %v4739_v49 = vsub.f32 %v4734_v40, %v4738_v33 }
0x1bd0   : > { %v8238_v53 = vpop.permute.xlu0 %8237 }
0x1bd1   : > { %v4740_v11 = vmul.f32 %v4739_v49, %v4739_v49  ;;  %v8240_v55 = vunpack.i.h.bf16 %v8238_v53  ;;  %v8239_v56 = vunpack.i.l.bf16 %v8238_v53 }
0x1bd3   : > { %v4741_v50 = vsel %vm677_vm1, %v4740_v11, 0.0  ;;  %v8056_v59 = vpack.c.bf16 %v8240_v55, %v8239_v56 }
0x1bd4   : > { %4742 = vadd.xlane.f32.xlu1 %v4741_v50  ;;  %v4863_v17 = vpop.permute.xlu0 %4862 }
0x1bd5   : > { %8057 = vmatpush3.bf16.msra.mxu0 %v8056_v59 }
0x1bd6   : > { %8058 = vmatprep.subr.bf16.mxu0 %v8452_v5 }
0x1be5   : > { %8242 = vrot.lane.b32.xlu1 %v9270_v52, %s9711_s20 }
0x1c61   : > { %v4743_v1 = vpop.xlane.xlu1 %4742 }
0x1c62   : > { %v4744_v16 = vmul.f32 0.03125, %v4743_v1 }
0x1c64   : > { %v4745_v2 = vadd.f32 1e-06, %v4744_v16 }
0x1c65   : > { %v8243_v58 = vpop.permute.xlu1 %8242 }
0x1c66   : > { %8348 = vrsqrt.f32 %v4745_v2  ;;  %v8245_v0 = vunpack.i.h.bf16 %v8243_v58  ;;  %v8244_v6 = vunpack.i.l.bf16 %v8243_v58 }
0x1c68   : > { %v8059_v4 = vpack.c.bf16 %v8245_v0, %v8244_v6 }
0x1c6a   : > { %8060 = vmatpush3.bf16.msra.mxu0 %v8059_v4 }
0x1c6b   : > { %7815 = vmatprep.subr.mxu0 %v8454_v8 }
0x1c6d   : > { %7803 = vmatmul.mubr.msk.f32.vlgmr.msra.gmra.mrb[42].mxu0 %vm677_vm1, %v656_v10 }
0x1c6e   : > { %7817 = vmatprep.mubr.msk.f32.mxu0 %vm8453_vm0, %v8454_v8 }
0x1c70   : > { %v8349_v25 = vpop.eup %8348 }
0x1c71   : > { %v4747_v13 = vmul.f32 %v8349_v25, %v4739_v49 }
0x1c73   : > { %v4754_v15 = vmul.f32 %v4753_v23, %v4747_v13 }
0x1c75   : > { %v9297_v3 = vadd.f32 %v4758_v14, %v4754_v15 }
0x1c77   : > { %7792 = vmatmul.mubr.msk.f32.vlgmr.msra.gmra.mrb[50].mxu1 %vm677_vm1, %v9297_v3 }
0x1c78   : > { %7807 = vmatprep.mubr.msk.f32.mxu1 %vm8453_vm0, %v8454_v8 }
0x1d40   : > { %v4934_v18 = vpop.f32.mrb[42].mxu0 }
0x1d41   : > { %v9303_v19 = vadd.f32 %v4934_v18, %v4863_v17  ;;  %v7804_v20 = vpop.f32.mrb[43].mxu0 }
0x1d43   : > { %5105 = vrot.lane.b32.xlu1 %v9303_v19, %s9713_s27  ;;  %7806 = vmatpush3.xpose.msk.msra.mxu1 %vm840_vm2, %v9303_v19 }
0x1d44   : > { %7810 = vmatprep.subr.mxu1 %v8454_v8 }
0x1d47   : > { %5272 = vrot.lane.b32.xlu1 %v9303_v19, %s9714_s18 }
0x1d4a   : > { %v4842_v22 = vpop.f32.mrb[50].mxu1 }
0x1d4b   : > { %v4843_v54 = vadd.f32 %v9280_v63, %v4842_v22  ;;  %5439 = vrot.lane.b32.xlu1 %v9303_v19, %s9715_s19  ;;  %v7793_v27 = vpop.f32.mrb[51].mxu1 }
0x1d4d   : > { %5103 = vrot.lane.b32.xlu0 %v4843_v54, %s9713_s27  ;;  %7808 = vmatmul.mubr.msk.f32.vlgmr.msra.gmra.mrb[52].mxu1 %vm840_vm2, %v4843_v54 }
0x1d4e   : > { %7812 = vmatprep.mubr.msk.f32.mxu1 %vm8453_vm0, %v8454_v8 }
0x1d51   : > { %5270 = vrot.lane.b32.xlu0 %v4843_v54, %s9714_s18 }
0x1d55   : > { %5437 = vrot.lane.b32.xlu0 %v4843_v54, %s9715_s19 }
0x1db5   : > { %v5106_v29 = vpop.permute.xlu1 %5105 }
0x1db6   : > { %7816 = vmatpush3.xpose.msk.msra.mxu0 %vm840_vm2, %v5106_v29 }
0x1db7   : > { %7825 = vmatprep.subr.mxu0 %v8454_v8 }
0x1db9   : > { %v5273_v30 = vpop.permute.xlu1 %5272 }
0x1dbd   : > { %v5440_v32 = vpop.permute.xlu1 %5439 }
0x1dbf   : > { %v5104_v31 = vpop.permute.xlu0 %5103 }
0x1dc0   : > { %7818 = vmatmul.mubr.msk.f32.vlgmr.msra.gmra.mrb[44].mxu0 %vm840_vm2, %v5104_v31 }
0x1dc1   : > { %7826 = vmatpush3.xpose.msk.msra.mxu0 %vm840_vm2, %v5273_v30  ;;  %7827 = vmatprep.mubr.msk.f32.mxu0 %vm8453_vm0, %v8454_v8 }
0x1dc2   : > { %7835 = vmatprep.subr.mxu0 %v8454_v8 }
0x1dc3   : > { %v5271_v48 = vpop.permute.xlu0 %5270 }
0x1dc4   : > { %7828 = vmatmul.mubr.msk.f32.vlgmr.msra.gmra.mrb[46].mxu0 %vm840_vm2, %v5271_v48 }
0x1dc5   : > { %7836 = vmatpush3.xpose.msk.msra.mxu0 %vm840_vm2, %v5440_v32  ;;  %7837 = vmatprep.mubr.msk.f32.mxu0 %vm8453_vm0, %v8454_v8 }
0x1dc6   : > { %8061 = vmatprep.subr.bf16.mxu0 %v8452_v5 }
0x1dc7   : > { %v5438_v34 = vpop.permute.xlu0 %5437 }
0x1dc8   : > { %7838 = vmatmul.mubr.msk.f32.vlgmr.msra.gmra.mrb[48].mxu0 %vm840_vm2, %v5438_v34 }
0x1dc9   : > { %7853 = vmatprep.mubr.msk.f32.mxu0 %vm8453_vm0, %v8454_v8 }
0x1e20   : > { %v5010_v36 = vpop.f32.mrb[52].mxu1 }
0x1e21   : > { %v5014_v28 = vmul.f32 0.35355338, %v5010_v36  ;;  %v7809_v37 = vpop.f32.mrb[53].mxu1 }
0x1e23   : > { %v5015_v38 = vsel %vm663_vm9, %v5014_v28, -1e+09 }
0x1e24   : > { %v5016_v39 = vsel %vm840_vm2, %v5015_v38, -inf }
0x1e25   : > { %5017 = vmax.xlane.f32.xlu1 %v5016_v39 }
0x1e93   : > { %v5177_v57 = vpop.f32.mrb[44].mxu0 }
0x1e94   : > { %v5181_v41 = vmul.f32 0.35355338, %v5177_v57  ;;  %v7819_v42 = vpop.f32.mrb[45].mxu0 }
0x1e96   : > { %v5182_v9 = vsel %vm663_vm9, %v5181_v41, -1e+09 }
0x1e97   : > { %v5344_v43 = vpop.f32.mrb[46].mxu0  ;;  %v5183_v44 = vsel %vm840_vm2, %v5182_v9, -inf }
0x1e98   : > { %v5348_v40 = vmul.f32 0.35355338, %v5344_v43  ;;  %5184 = vmax.xlane.f32.xlu0 %v5183_v44  ;;  %v7829_v45 = vpop.f32.mrb[47].mxu0 }
0x1e9a   : > { %v5349_v46 = vsel %vm663_vm9, %v5348_v40, -1e+09 }
0x1e9b   : > { %v5511_v47 = vpop.f32.mrb[48].mxu0  ;;  %v5350_v21 = vsel %vm840_vm2, %v5349_v46, -inf }
0x1e9c   : > { %v5515_v33 = vmul.f32 0.35355338, %v5511_v47  ;;  %5351 = vmax.xlane.f32.xlu0 %v5350_v21  ;;  %v7839_v49 = vpop.f32.mrb[49].mxu0 }
0x1e9e   : > { %v5516_v11 = vsel %vm663_vm9, %v5515_v33, -1e+09 }
0x1e9f   : > { %v5517_v50 = vsel %vm840_vm2, %v5516_v11, -inf }
0x1ea0   : > { %5518 = vmax.xlane.f32.xlu1 %v5517_v50 }
0x1eb1   : > { %5194 = vrot.lane.b32.xlu1 %v9303_v19, %s9719_s23 }
0x1eb2   : > { %v5018_v51 = vpop.xlane.xlu1 %5017 }
0x1eb3   : > { %v5019_v61 = vsub.f32 %v5015_v38, %v5018_v51 }
0x1eb5   : > { %v5020_v53 = vmul.f32 1.442695, %v5019_v61 }
0x1eb7   : > { %8350 = vpow2.f32 %v5020_v53 }
0x1ec1   : > { %v8351_v55 = vpop.eup %8350 }
0x1ec2   : > { %v5022_v56 = vsel %vm840_vm2, %v8351_v55, 0.0 }
0x1ec3   : > { %5023 = vadd.xlane.f32.xlu0 %v5022_v56 }
0x1ed9   : > { %5027 = vrot.lane.b32.xlu0 %v9303_v19, %s9711_s20 }
0x1f25   : > { %v5185_v59 = vpop.xlane.xlu0 %5184 }
0x1f26   : > { %v5186_v60 = vsub.f32 %v5182_v9, %v5185_v59  ;;  %v7204_v59 = vld [vmem:[%s9655_s9 + $0xb0] sm:$0xff] }
0x1f28   : > { %v5187_v62 = vmul.f32 1.442695, %v5186_v60  ;;  %v7205_v60 = vld [vmem:[%s9655_s9 + $0xb8] sm:$0xff] }
0x1f29   : > { %v5352_v1 = vpop.xlane.xlu0 %5351 }
0x1f2a   : > { %8352 = vpow2.f32 %v5187_v62  ;;  %v5353_v16 = vsub.f32 %v5349_v46, %v5352_v1  ;;  %v9401_v62 = vpack.i.bf16 %v7205_v60, %v7204_v59 }
0x1f2c   : > { %v5354_v2 = vmul.f32 1.442695, %v5353_v16 }
0x1f2d   : > { %v5519_v58 = vpop.xlane.xlu1 %5518 }
0x1f2e   : > { %8354 = vpow2.f32 %v5354_v2  ;;  %v5520_v0 = vsub.f32 %v5516_v11, %v5519_v58 }
0x1f30   : > { %v5521_v6 = vmul.f32 1.442695, %v5520_v0  ;;  %v7202_v0 = vld [vmem:[%s9655_s9 + $0xa0] sm:$0xff] }
0x1f31   : > { %v5195_v20 = vpop.permute.xlu1 %5194 }
0x1f32   : > { %8356 = vpow2.f32 %v5521_v6  ;;  %v7203_v6 = vld [vmem:[%s9655_s9 + $0xa8] sm:$0xff] }
0x1f34   : > { %v8353_v4 = vpop.eup %8352 }
0x1f35   : > { %v5189_v10 = vsel %vm840_vm2, %v8353_v4, 0.0 }
0x1f36   : > { %5190 = vadd.xlane.f32.xlu1 %v5189_v10  ;;  %v8068_v10 = vpack.c.bf16 %v7203_v6, %v7202_v0 }
0x1f38   : > { %v8355_v12 = vpop.eup %8354 }
0x1f39   : > { %v5356_v23 = vsel %vm840_vm2, %v8355_v12, 0.0 }
0x1f3a   : > { %5357 = vadd.xlane.f32.xlu0 %v5356_v23  ;;  %v9421_v23 = vld [vmem:[%s9656_s10 + $0x5] ss:$0 sm:$0xff] }
0x1f3c   : > { %v8357_v25 = vpop.eup %8356 }
0x1f3d   : > { %v5523_v13 = vsel %vm840_vm2, %v8357_v25, 0.0 }
0x1f3e   : > { %5524 = vadd.xlane.f32.xlu1 %v5523_v13 }
0x1f4f   : > { %5361 = vrot.lane.b32.xlu1 %v9303_v19, %s9717_s29 }
0x1f50   : > { %5528 = vrot.lane.b32.xlu0 %v9303_v19, %s9718_s28  ;;  %v5024_v14 = vpop.xlane.xlu0 %5023 }
0x1f51   : > { %8358 = vrcp.f32 %v5024_v14 }
0x1f53   : > { %8247 = vrot.lane.b32.xlu1 %v9259_v7, %s9720_s5 }
0x1f54   : > { %v5028_v15 = vpop.permute.xlu0 %5027  ;;  %8252 = vrot.lane.b32.xlu0 %v9270_v52, %s9720_s5 }
0x1f55   : > { %7811 = vmatpush3.msra.mxu1 %v5028_v15 }
0x1f56   : > { %7820 = vmatprep.subr.mxu1 %v8454_v8 }
0x1f5b   : > { %v8359_v17 = vpop.eup %8358 }
0x1f5c   : > { %v5026_v18 = vmul.f32 %v8359_v17, %v8351_v55 }
0x1f5e   : > { %7813 = vmatmul.mubr.msk.f32.vlgmr.msra.gmra.mrb[54].mxu1 %vm840_vm2, %v5026_v18 }
0x1f5f   : > { %7821 = vmatpush3.msra.mxu1 %v5195_v20  ;;  %7822 = vmatprep.mubr.msk.f32.mxu1 %vm8453_vm0, %v8454_v8 }
0x1f60   : > { %7830 = vmatprep.subr.mxu1 %v8454_v8 }
0x1fc3   : > { %v5191_v19 = vpop.xlane.xlu1 %5190 }
0x1fc4   : > { %8360 = vrcp.f32 %v5191_v19 }
0x1fc7   : > { %v5358_v22 = vpop.xlane.xlu0 %5357 }
0x1fc8   : > { %8362 = vrcp.f32 %v5358_v22 }
0x1fcb   : > { %v5525_v54 = vpop.xlane.xlu1 %5524  ;;  %v5529_v7 = vpop.permute.xlu0 %5528 }
0x1fcc   : > { %8364 = vrcp.f32 %v5525_v54 }
0x1fce   : > { %v8361_v27 = vpop.eup %8360 }
0x1fcf   : > { %v5193_v29 = vmul.f32 %v8361_v27, %v8353_v4  ;;  %v5362_v30 = vpop.permute.xlu1 %5361  ;;  %v8253_v57 = vpop.permute.xlu0 %8252  ;;  %v9412_v4 = vpack.i.bf16 %v7203_v6, %v7202_v0 }
0x1fd0   : > { %v8255_v41 = vunpack.i.h.bf16 %v8253_v57  ;;  %v8254_v42 = vunpack.i.l.bf16 %v8253_v57 }
0x1fd1   : > { %7823 = vmatmul.mubr.msk.f32.vlgmr.msra.gmra.mrb[56].mxu1 %vm840_vm2, %v5193_v29  ;;  %v7201_v29 = vld [vmem:[%s9661_s15 + $0xa] sm:$0x3] }
0x1fd2   : > { %v8363_v31 = vpop.eup %8362  ;;  %7831 = vmatpush3.msra.mxu1 %v5362_v30  ;;  %7832 = vmatprep.mubr.msk.f32.mxu1 %vm8453_vm0, %v8454_v8  ;;  %v8065_v9 = vpack.c.bf16 %v8255_v41, %v8254_v42  ;;  %v657_v30 = vld [vmem:[%s636_s26] sm:$0xff]  ;;  %s614_s26 = sand.u32 1, %s8442_s22  }
0x1fd3   : > { %v5360_v48 = vmul.f32 %v8363_v31, %v8355_v12  ;;  %7840 = vmatprep.subr.mxu1 %v8454_v8  ;;  %v8248_v35 = vpop.permute.xlu1 %8247  ;;  %v8071_v12 = vpack.c.bf16 %v7205_v60, %v7204_v59  ;;  %v5726_v31 = vrot.slane %v7201_v29, %v8794_v24  ;;  %s7083_s1 = sshll.u32 %s614_s26, 3 }
0x1fd4   : > { %v8250_v36 = vunpack.i.h.bf16 %v8248_v35  ;;  %v8249_v28 = vunpack.i.l.bf16 %v8248_v35 }
0x1fd5   : > { %7833 = vmatmul.mubr.msk.f32.vlgmr.msra.gmra.mrb[58].mxu1 %vm840_vm2, %v5360_v48 }
0x1fd6   : > { %v8365_v32 = vpop.eup %8364  ;;  %7841 = vmatpush3.msra.mxu1 %v5529_v7  ;;  %7842 = vmatprep.mubr.msk.f32.mxu1 %vm8453_vm0, %v8454_v8  ;;  %v8062_v37 = vpack.c.bf16 %v8250_v36, %v8249_v28 }
0x1fd7   : > { %v5527_v34 = vmul.f32 %v8365_v32, %v8357_v25  ;;  %8067 = vmatprep.subr.bf16.mxu1 %v8452_v5  ;;  %v5731_v32 = vrot.slane %v7201_v29, %v8800_v26 }
0x1fd8   : > { %8063 = vmatpush3.bf16.msra.mxu0 %v8062_v37 }
0x1fd9   : > { %7843 = vmatmul.mubr.msk.f32.vlgmr.msra.gmra.mrb[60].mxu1 %vm840_vm2, %v5527_v34  ;;  %8064 = vmatprep.subr.bf16.mxu0 %v8452_v5 }
0x1fda   : > { %7864 = vmatprep.mubr.msk.f32.mxu1 %vm8453_vm0, %v8454_v8  ;;  %8069 = vmatpush3.bf16.msra.mxu1 %v8068_v10 }
0x1fdb   : > { %8070 = vmatprep.subr.bf16.mxu1 %v8452_v5 }
0x1fdc   : > { %8066 = vmatpush3.bf16.msra.mxu0 %v8065_v9 }
0x1fdd   : > { %8073 = vmatprep.subr.bf16.mxu0 %v8452_v5 }
0x1fde   : > { %8072 = vmatpush3.bf16.msra.mxu1 %v8071_v12 }
0x1fdf   : > { %7878 = vmatprep.subr.mxu1 %v8454_v8 }
0x2031   : > { %v5099_v38 = vpop.f32.mrb[54].mxu1 }
0x2032   : > { %v7814_v39 = vpop.f32.mrb[55].mxu1 }
0x20a4   : > { %v5266_v43 = vpop.f32.mrb[56].mxu1 }
0x20a5   : > { %5605 = vrot.lane.b32.xlu1 %v5266_v43, %s9722_s16  ;;  %v7824_v52 = vpop.f32.mrb[57].mxu1 }
0x20a8   : > { %v5433_v44 = vpop.f32.mrb[58].mxu1 }
0x20a9   : > { %5609 = vrot.lane.b32.xlu0 %v5433_v44, %s9723_s21  ;;  %v7834_v40 = vpop.f32.mrb[59].mxu1 }
0x20ac   : > { %v5600_v45 = vpop.f32.mrb[60].mxu1 }
0x20ad   : > { %5613 = vrot.lane.b32.xlu1 %v5600_v45, %s9724_s24  ;;  %v7844_v46 = vpop.f32.mrb[61].mxu1  ;;  %5631 = vrot.lane.b32.xlu0 %v9280_v63, %s9720_s5 }
0x2117   : > { %v5606_v47 = vpop.permute.xlu1 %5605 }
0x2118   : > { %v5616_v33 = vsel %vm840_vm2, %v5099_v38, %v5606_v47 }
0x211b   : > { %v5610_v21 = vpop.permute.xlu0 %5609 }
0x211c   : > { %v5617_v49 = vsel %vm1520_vm4, %v5616_v33, %v5610_v21 }
0x211f   : > { %v5614_v11 = vpop.permute.xlu1 %5613  ;;  %v5632_v51 = vpop.permute.xlu0 %5631 }
0x2120   : > { %v5618_v50 = vsel %vm1522_vm5, %v5617_v49, %v5614_v11 }
0x2121   : > { %7854 = vmatmul.mubr.msk.f32.vlgmr.msra.gmra.mrb[50].mxu0 %vm677_vm1, %v5618_v50 }
0x2122   : > { %7875 = vmatprep.mubr.msk.f32.mxu0 %vm8453_vm0, %v8454_v8 }
0x21f4   : > { %v5703_v61 = vpop.f32.mrb[50].mxu0 }
0x21f5   : > { %v5704_v53 = vadd.f32 %v5703_v61, %v5632_v51  ;;  %v7855_v55 = vpop.f32.mrb[51].mxu0 }
0x21f7   : > { %v5707_v63 = vadd.f32 %v5704_v53, %v9297_v3 }
0x21f9   : > { %v5708_v56 = vsel %vm677_vm1, %v5707_v63, 0.0 }
0x21fa   : > { %5709 = vadd.xlane.f32.xlu1 %v5708_v56 }
0x220b   : > { %8262 = vrot.lane.b32.xlu1 %v9401_v62, %s9711_s20 }
0x220f   : > { %5835 = vrot.lane.b32.xlu1 %v9421_v23, %s9711_s20 }
0x2287   : > { %v5710_v1 = vpop.xlane.xlu1 %5709 }
0x2288   : > { %v5711_v16 = vmul.f32 0.03125, %v5710_v1 }
0x228a   : > { %v5712_v2 = vsub.f32 %v5707_v63, %v5711_v16 }
0x228b   : > { %v8263_v14 = vpop.permute.xlu1 %8262 }
0x228c   : > { %v5713_v3 = vmul.f32 %v5712_v2, %v5712_v2  ;;  %v8265_v18 = vunpack.i.h.bf16 %v8263_v14  ;;  %v8264_v22 = vunpack.i.l.bf16 %v8263_v14 }
0x228e   : > { %v5714_v58 = vsel %vm677_vm1, %v5713_v3, 0.0  ;;  %v8077_v27 = vpack.c.bf16 %v8265_v18, %v8264_v22 }
0x228f   : > { %5715 = vadd.xlane.f32.xlu0 %v5714_v58  ;;  %v5836_v36 = vpop.permute.xlu1 %5835 }
0x22a5   : > { %8257 = vrot.lane.b32.xlu0 %v9412_v4, %s9711_s20 }
0x231c   : > { %v5716_v25 = vpop.xlane.xlu0 %5715 }
0x231d   : > { %v5717_v13 = vmul.f32 0.03125, %v5716_v25 }
0x231f   : > { %v5718_v15 = vadd.f32 1e-06, %v5717_v13 }
0x2320   : > { %v8258_v17 = vpop.permute.xlu0 %8257 }
0x2321   : > { %8366 = vrsqrt.f32 %v5718_v15  ;;  %v8260_v20 = vunpack.i.h.bf16 %v8258_v17  ;;  %v8259_v19 = vunpack.i.l.bf16 %v8258_v17 }
0x2323   : > { %v8074_v54 = vpack.c.bf16 %v8260_v20, %v8259_v19 }
0x2325   : > { %8075 = vmatpush3.bf16.msra.mxu0 %v8074_v54 }
0x2326   : > { %8076 = vmatprep.subr.bf16.mxu0 %v8452_v5 }
0x2329   : > { %8078 = vmatpush3.bf16.msra.mxu0 %v8077_v27 }
0x232a   : > { %7888 = vmatprep.subr.mxu0 %v8454_v8 }
0x232b   : > { %v8367_v48 = vpop.eup %8366 }
0x232c   : > { %v5720_v7 = vmul.f32 %v8367_v48, %v5712_v2  ;;  %7876 = vmatmul.mubr.msk.f32.vlgmr.msra.gmra.mrb[52].mxu0 %vm677_vm1, %v657_v30 }
0x232d   : > { %7890 = vmatprep.mubr.msk.f32.mxu0 %vm8453_vm0, %v8454_v8 }
0x232e   : > { %v5727_v34 = vmul.f32 %v5726_v31, %v5720_v7 }
0x2330   : > { %v9439_v35 = vadd.f32 %v5731_v32, %v5727_v34 }
0x2332   : > { %7865 = vmatmul.mubr.msk.f32.vlgmr.msra.gmra.mrb[62].mxu1 %vm677_vm1, %v9439_v35 }
0x2333   : > { %7880 = vmatprep.mubr.msk.f32.mxu1 %vm8453_vm0, %v8454_v8 }
0x23ff   : > { %v5907_v28 = vpop.f32.mrb[52].mxu0 }
0x2400   : > { %v9445_v37 = vadd.f32 %v5907_v28, %v5836_v36  ;;  %v7877_v38 = vpop.f32.mrb[53].mxu0 }
0x2402   : > { %6078 = vrot.lane.b32.xlu0 %v9445_v37, %s9713_s27  ;;  %7879 = vmatpush3.xpose.msk.msra.mxu1 %vm840_vm2, %v9445_v37 }
0x2403   : > { %7883 = vmatprep.subr.mxu1 %v8454_v8 }
0x2405   : > { %v5815_v39 = vpop.f32.mrb[62].mxu1 }
0x2406   : > { %v5816_v57 = vadd.f32 %v9421_v23, %v5815_v39  ;;  %6245 = vrot.lane.b32.xlu0 %v9445_v37, %s9714_s18  ;;  %v7866_v41 = vpop.f32.mrb[63].mxu1 }
0x2408   : > { %6076 = vrot.lane.b32.xlu1 %v5816_v57, %s9713_s27  ;;  %7881 = vmatmul.mubr.msk.f32.vlgmr.msra.gmra.mrb[64].mxu1 %vm840_vm2, %v5816_v57 }
0x2409   : > { %7885 = vmatprep.mubr.msk.f32.mxu1 %vm8453_vm0, %v8454_v8 }
0x240a   : > { %6412 = vrot.lane.b32.xlu0 %v9445_v37, %s9715_s19 }
0x240c   : > { %6243 = vrot.lane.b32.xlu1 %v5816_v57, %s9714_s18 }
0x2410   : > { %6410 = vrot.lane.b32.xlu1 %v5816_v57, %s9715_s19  ;;  %s652_s19 = scalar_lea.vmem %s9654_s8, %s8632_s30  ;;  %s616_s30 = scalar_lea.vmem [#allocation2], %s7083_s1 }
0x2411   : > { %v664_v45 = vld [vmem:[%s652_s19] sm:$0xff]  ;;  %s7244_s19 = sshll.u32 %s8573_s25, 7  ;;  %s8466_s25 = smov [#allocation2]  }
0x2412   : > { %vm665_vm10 = vcmp.gt.f32.partialorder %v664_v45, 0.0  ;;  %s8392_s6 = sshll.u32 %s8466_s25, 4  ;;  %s8393_s6 = int_to_ptr.vmem [resolvable:$false] %s8392_s6 }
0x2413   : > { %s8394_s17 = scalar_lea.vmem %s8393_s6, 256 }
0x2474   : > { %v6079_v42 = vpop.permute.xlu0 %6078 }
0x2475   : > { %7889 = vmatpush3.xpose.msk.msra.mxu0 %vm840_vm2, %v6079_v42 }
0x2476   : > { %7898 = vmatprep.subr.mxu0 %v8454_v8 }
0x2478   : > { %v6246_v9 = vpop.permute.xlu0 %6245 }
0x247a   : > { %v6077_v43 = vpop.permute.xlu1 %6076 }
0x247b   : > { %7891 = vmatmul.mubr.msk.f32.vlgmr.msra.gmra.mrb[54].mxu0 %vm840_vm2, %v6077_v43 }
0x247c   : > { %7899 = vmatpush3.xpose.msk.msra.mxu0 %vm840_vm2, %v6246_v9  ;;  %7900 = vmatprep.mubr.msk.f32.mxu0 %vm8453_vm0, %v8454_v8  ;;  %v6413_v44 = vpop.permute.xlu0 %6412 }
0x247d   : > { %7908 = vmatprep.subr.mxu0 %v8454_v8 }
0x247e   : > { %v6244_v52 = vpop.permute.xlu1 %6243 }
0x247f   : > { %7901 = vmatmul.mubr.msk.f32.vlgmr.msra.gmra.mrb[56].mxu0 %vm840_vm2, %v6244_v52 }
0x2480   : > { %7909 = vmatpush3.xpose.msk.msra.mxu0 %vm840_vm2, %v6413_v44  ;;  %7910 = vmatprep.mubr.msk.f32.mxu0 %vm8453_vm0, %v8454_v8 }
0x2481   : > { %8079 = vmatprep.subr.bf16.mxu0 %v8452_v5 }
0x2482   : > { %v6411_v40 = vpop.permute.xlu1 %6410 }
0x2483   : > { %7911 = vmatmul.mubr.msk.f32.vlgmr.msra.gmra.mrb[58].mxu0 %vm840_vm2, %v6411_v40 }
0x2484   : > { %7926 = vmatprep.mubr.msk.f32.mxu0 %vm8453_vm0, %v8454_v8 }
0x24db   : > { %v5983_v46 = vpop.f32.mrb[64].mxu1 }
0x24dc   : > { %v5987_v47 = vmul.f32 0.35355338, %v5983_v46  ;;  %v7882_v21 = vpop.f32.mrb[65].mxu1 }
0x24de   : > { %v5988_v33 = vsel %vm665_vm10, %v5987_v47, -1e+09 }
0x24df   : > { %v5989_v49 = vsel %vm840_vm2, %v5988_v33, -inf }
0x24e0   : > { %5990 = vmax.xlane.f32.xlu0 %v5989_v49 }
0x254e   : > { %v6150_v11 = vpop.f32.mrb[54].mxu0 }
0x254f   : > { %v6154_v50 = vmul.f32 0.35355338, %v6150_v11  ;;  %v7892_v51 = vpop.f32.mrb[55].mxu0 }
0x2551   : > { %v6155_v61 = vsel %vm665_vm10, %v6154_v50, -1e+09 }
0x2552   : > { %v6317_v53 = vpop.f32.mrb[56].mxu0  ;;  %v6156_v55 = vsel %vm840_vm2, %v6155_v61, -inf }
0x2553   : > { %v6321_v63 = vmul.f32 0.35355338, %v6317_v53  ;;  %6157 = vmax.xlane.f32.xlu1 %v6156_v55  ;;  %v7902_v56 = vpop.f32.mrb[57].mxu0 }
0x2555   : > { %v6322_v59 = vsel %vm665_vm10, %v6321_v63, -1e+09 }
0x2556   : > { %v6484_v60 = vpop.f32.mrb[58].mxu0  ;;  %v6323_v1 = vsel %vm840_vm2, %v6322_v59, -inf }
0x2557   : > { %v6488_v16 = vmul.f32 0.35355338, %v6484_v60  ;;  %v7912_v2 = vpop.f32.mrb[59].mxu0  ;;  %6324 = vmax.xlane.f32.xlu0 %v6323_v1 }
0x2559   : > { %v6489_v3 = vsel %vm665_vm10, %v6488_v16, -1e+09 }
0x255a   : > { %v6490_v58 = vsel %vm840_vm2, %v6489_v3, -inf }
0x255b   : > { %6491 = vmax.xlane.f32.xlu0 %v6490_v58 }
0x2564   : > { %6000 = vrot.lane.b32.xlu1 %v9445_v37, %s9711_s20  ;;  %s6924_s20 = sshll.u32 %s616_s30, 4  ;;  %s9605_s20 = int_to_ptr.vmem [resolvable:$true] %s6924_s20 }
0x2565   : > { %p8395_p0 = scmp.lt.s32.totalorder %s9605_s20, %s8393_s6 }
0x256d   : > { %v5991_v0 = vpop.xlane.xlu0 %5990 }
0x256e   : > { %v5992_v6 = vsub.f32 %v5988_v33, %v5991_v0 }
0x2570   : > { %v5993_v10 = vmul.f32 1.442695, %v5992_v6 }
0x2572   : > { %8368 = vpow2.f32 %v5993_v10 }
0x257c   : > { %v8369_v12 = vpop.eup %8368 }
0x257d   : > { %v5995_v25 = vsel %vm840_vm2, %v8369_v12, 0.0 }
0x2588   : > { %5996 = vadd.xlane.f32.xlu1 %v5995_v25 }
0x25e0   : > { %v6158_v13 = vpop.xlane.xlu1 %6157 }
0x25e1   : > { %v6159_v14 = vsub.f32 %v6155_v61, %v6158_v13 }
0x25e3   : > { %v6160_v15 = vmul.f32 1.442695, %v6159_v14 }
0x25e4   : > { %v6001_v17 = vpop.permute.xlu1 %6000  ;;  %v6325_v18 = vpop.xlane.xlu0 %6324 }
0x25e5   : > { %8370 = vpow2.f32 %v6160_v15  ;;  %v6326_v20 = vsub.f32 %v6322_v59, %v6325_v18  ;;  %7884 = vmatpush3.msra.mxu1 %v6001_v17 }
0x25e6   : > { %7893 = vmatprep.subr.mxu1 %v8454_v8 }
0x25e7   : > { %v6327_v19 = vmul.f32 1.442695, %v6326_v20  ;;  %v7225_v20 = vld [vmem:[%s9657_s11 + $0x28] sm:$0xff] }
0x25e8   : > { %v6492_v22 = vpop.xlane.xlu0 %6491 }
0x25e9   : > { %8372 = vpow2.f32 %v6327_v19  ;;  %v6493_v54 = vsub.f32 %v6489_v3, %v6492_v22  ;;  %v7227_v22 = vld [vmem:[%s9657_s11 + $0x38] sm:$0xff] }
0x25eb   : > { %v6494_v27 = vmul.f32 1.442695, %v6493_v54 }
0x25ed   : > { %8374 = vpow2.f32 %v6494_v27  ;;  %v7231_v27 = vld [vmem:[%s9659_s13 + $0x40] sm:$0xff] }
0x25ef   : > { %v8371_v29 = vpop.eup %8370 }
0x25f0   : > { %v6162_v30 = vsel %vm840_vm2, %v8371_v29, 0.0 }
0x25f1   : > { %6163 = vadd.xlane.f32.xlu0 %v6162_v30  ;;  %v7233_v30 = vld [vmem:[%s9659_s13 + $0x50] sm:$0xff] }
0x25f3   : > { %v8373_v31 = vpop.eup %8372 }
0x25f4   : > { %v6329_v48 = vsel %vm840_vm2, %v8373_v31, 0.0 }
0x25f5   : > { %6330 = vadd.xlane.f32.xlu1 %v6329_v48  ;;  %v7234_v48 = vld [vmem:[%s9659_s13 + $0x58] sm:$0xff] }
0x25f7   : > { %v8375_v7 = vpop.eup %8374 }
0x25f8   : > { %v6496_v32 = vsel %vm840_vm2, %v8375_v7, 0.0 }
0x25f9   : > { %6497 = vadd.xlane.f32.xlu0 %v6496_v32  ;;  %v7235_v32 = vld [vmem:[%s9659_s13 + $0x60] sm:$0xff] }
0x2606   : > { %6334 = vrot.lane.b32.xlu1 %v9445_v37, %s9717_s29 }
0x260a   : > { %6501 = vrot.lane.b32.xlu1 %v9445_v37, %s9718_s28 }
0x260e   : > { %8272 = vrot.lane.b32.xlu1 %v9401_v62, %s9720_s5 }
0x260f   : > { %6167 = vrot.lane.b32.xlu0 %v9445_v37, %s9719_s23  ;;  %s9726_s23 = sld [smem:[#allocation17_spill]] }
0x2613   : > { %8267 = vrot.lane.b32.xlu0 %v9412_v4, %s9720_s5 }
0x2615   : > { %v5997_v34 = vpop.xlane.xlu1 %5996 }
0x2616   : > { %8376 = vrcp.f32 %v5997_v34  ;;  %v7236_v34 = vld [vmem:[%s9659_s13 + $0x68] sm:$0xff] }
0x2620   : > { %v8377_v36 = vpop.eup %8376 }
0x2621   : > { %v5999_v28 = vmul.f32 %v8377_v36, %v8369_v12  ;;  %v8098_v36 = vpack.c.bf16 %v7236_v34, %v7235_v32 }
0x2623   : > { %7886 = vmatmul.mubr.msk.f32.vlgmr.msra.gmra.mrb[66].mxu1 %vm840_vm2, %v5999_v28 }
0x2624   : > { %7895 = vmatprep.mubr.msk.f32.mxu1 %vm8453_vm0, %v8454_v8 }
0x267e   : > { %v6164_v38 = vpop.xlane.xlu0 %6163 }
0x267f   : > { %8378 = vrcp.f32 %v6164_v38 }
0x2682   : > { %v6331_v39 = vpop.xlane.xlu1 %6330 }
0x2683   : > { %8380 = vrcp.f32 %v6331_v39 }
0x2686   : > { %v6498_v57 = vpop.xlane.xlu0 %6497  ;;  %v6335_v42 = vpop.permute.xlu1 %6334 }
0x2687   : > { %8382 = vrcp.f32 %v6498_v57  ;;  %v7223_v57 = vld [vmem:[%s9661_s15 + $0xc] sm:$0x3] }
0x2689   : > { %v8379_v41 = vpop.eup %8378 }
0x268a   : > { %v6166_v37 = vmul.f32 %v8379_v41, %v8371_v29  ;;  %v6168_v9 = vpop.permute.xlu0 %6167  ;;  %v6502_v52 = vpop.permute.xlu1 %6501  ;;  %v7232_v29 = vld [vmem:[%s9659_s13 + $0x48] sm:$0xff]  ;;  %v6699_v41 = vrot.slane %v7223_v57, %v8794_v24 }
0x268b   : > { %7894 = vmatpush3.msra.mxu1 %v6168_v9  ;;  %v6704_v9 = vrot.slane %v7223_v57, %v8800_v26 }
0x268c   : > { %7896 = vmatmul.mubr.msk.f32.vlgmr.msra.gmra.mrb[68].mxu1 %vm840_vm2, %v6166_v37  ;;  %7903 = vmatprep.subr.mxu1 %v8454_v8 }
0x268d   : > { %v8381_v43 = vpop.eup %8380  ;;  %7904 = vmatpush3.msra.mxu1 %v6335_v42  ;;  %7905 = vmatprep.mubr.msk.f32.mxu1 %vm8453_vm0, %v8454_v8 }
0x268e   : > { %v6333_v4 = vmul.f32 %v8381_v43, %v8373_v31  ;;  %7913 = vmatprep.subr.mxu1 %v8454_v8  ;;  %v8268_v45 = vpop.permute.xlu0 %8267  ;;  %v8273_v11 = vpop.permute.xlu1 %8272  ;;  %v8092_v31 = vpack.c.bf16 %v7232_v29, %v7231_v27 }
0x268f   : > { %v8270_v46 = vunpack.i.h.bf16 %v8268_v45  ;;  %v8269_v47 = vunpack.i.l.bf16 %v8268_v45  ;;  %v8275_v50 = vunpack.i.h.bf16 %v8273_v11  ;;  %v8274_v51 = vunpack.i.l.bf16 %v8273_v11 }
0x2690   : > { %7906 = vmatmul.mubr.msk.f32.vlgmr.msra.gmra.mrb[70].mxu1 %vm840_vm2, %v6333_v4 }
0x2691   : > { %v8383_v44 = vpop.eup %8382  ;;  %7914 = vmatpush3.msra.mxu1 %v6502_v52  ;;  %7915 = vmatprep.mubr.msk.f32.mxu1 %vm8453_vm0, %v8454_v8  ;;  %v8080_v21 = vpack.c.bf16 %v8270_v46, %v8269_v47  ;;  %v8083_v61 = vpack.c.bf16 %v8275_v50, %v8274_v51  ;;  %v7238_v52 = vld [vmem:[%s9659_s13 + $0x78] sm:$0xff] }
0x2692   : > { %v6500_v40 = vmul.f32 %v8383_v44, %v8375_v7  ;;  %8085 = vmatprep.subr.bf16.mxu1 %v8452_v5  ;;  %v8095_v7 = vpack.c.bf16 %v7234_v48, %v7233_v30 }
0x2693   : > { %8081 = vmatpush3.bf16.msra.mxu0 %v8080_v21 }
0x2694   : > { %7916 = vmatmul.mubr.msk.f32.vlgmr.msra.gmra.mrb[72].mxu1 %vm840_vm2, %v6500_v40  ;;  %8082 = vmatprep.subr.bf16.mxu0 %v8452_v5  ;;  %v7229_v40 = vld [vmem:[%s9658_s12 + $0x1] ss:$0 sm:$0xff] }
0x2695   : > { %7937 = vmatprep.mubr.msk.f32.mxu1 %vm8453_vm0, %v8454_v8 }
0x2697   : > { %8084 = vmatpush3.bf16.msra.mxu0 %v8083_v61 }
0x2698   : > { %8091 = vmatprep.subr.bf16.mxu0 %v8452_v5 }
0x26f6   : > { %v6072_v33 = vpop.f32.mrb[66].mxu1 }
0x26f7   : > { %v7887_v49 = vpop.f32.mrb[67].mxu1 }
0x275f   : > { %v6239_v53 = vpop.f32.mrb[68].mxu1 }
0x2760   : > { %6578 = vrot.lane.b32.xlu0 %v6239_v53, %s9722_s16  ;;  %v7897_v62 = vpop.f32.mrb[69].mxu1  ;;  %s9603_s16 = scalar_lea.hbm %s9726_s23, %s7244_s19 }
0x2763   : > { %v6406_v55 = vpop.f32.mrb[70].mxu1 }
0x2764   : > { %6582 = vrot.lane.b32.xlu1 %v6406_v55, %s9723_s21  ;;  %v7907_v63 = vpop.f32.mrb[71].mxu1  ;;  %s6911_s21 = scalar_lea.sflag [#allocation3], %s614_s26 }
0x2767   : > { %v6573_v56 = vpop.f32.mrb[72].mxu1 }
0x2768   : > { %6586 = vrot.lane.b32.xlu0 %v6573_v56, %s9724_s24  ;;  %v7917_v59 = vpop.f32.mrb[73].mxu1  ;;  %6604 = vrot.lane.b32.xlu1 %v9421_v23, %s9720_s5  ;;  %s9727_s5 = smov %s9726_s23  ;;  %s8388_s24 = scalar_lea.vmem %s9605_s20, 128 }
0x2769   : > { %p8389_p11 = scmp.ne.s32.totalorder %s9605_s20, %s8388_s24  ;;  %p8396_p1 = scmp.lt.s32.totalorder %s8394_s17, %s8388_s24 }
0x276b   : > { %p8390_p12 = pnand %p8389_p11, %p8590_p5  ;;  %p8397_p2 = por %p8396_p1, %p8395_p0 }
0x276d   : > { %p8391_p13 = pneg %p8390_p12 }
0x276f   : > { %p8398_p3 = pnand %p8397_p2, %p8391_p13 }
0x27d2   : > { %v6579_v60 = vpop.permute.xlu0 %6578 }
0x27d3   : > { %v6589_v16 = vsel %vm840_vm2, %v6072_v33, %v6579_v60  ;;  %v7240_v33 = vld [vmem:[%s9660_s14 + $0x1] ss:$0 sm:$0xff] }
0x27d6   : > { %v6583_v1 = vpop.permute.xlu1 %6582 }
0x27d7   : > { %v6590_v2 = vsel %vm1520_vm4, %v6589_v16, %v6583_v1  ;;  %v7242_v16 = vld [vmem:[%s9661_s15 + $0xe] sm:$0x3] }
0x27da   : > { %v6587_v3 = vpop.permute.xlu0 %6586  ;;  %v6605_v0 = vpop.permute.xlu1 %6604 }
0x27db   : > { %v6591_v58 = vsel %vm1522_vm5, %v6590_v2, %v6587_v3  ;;  %v6902_v2 = vrot.slane %v7242_v16, %v8794_v24 }
0x27dc   : > { %7927 = vmatmul.mubr.msk.f32.vlgmr.msra.gmra.mrb[60].mxu0 %vm677_vm1, %v6591_v58 }
0x27dd   : > { %7956 = vmatprep.mubr.msk.f32.mxu0 %vm8453_vm0, %v8454_v8  ;;  %v7224_v8 = vld [vmem:[%s9657_s11 + $0x20] sm:$0xff]  ;;  %8093 = vmatpush3.bf16.msra.mxu0 %v8092_v31 }
0x27de   : > { %v8086_v19 = vpack.c.bf16 %v7225_v20, %v7224_v8  ;;  %8094 = vmatprep.subr.bf16.mxu0 %v8452_v5 }
0x27e0   : > { %8087 = vmatpush3.bf16.msra.mxu1 %v8086_v19 }
0x27e1   : > { %8088 = vmatprep.subr.bf16.mxu1 %v8452_v5  ;;  %8096 = vmatpush3.bf16.msra.mxu0 %v8095_v7 }
0x27e2   : > { %8097 = vmatprep.subr.bf16.mxu0 %v8452_v5 }
0x27e5   : > { %8099 = vmatpush3.bf16.msra.mxu0 %v8098_v36 }
0x27e6   : > { %8100 = vmatprep.subr.bf16.mxu0 %v8452_v5  ;;  %v7237_v5 = vld [vmem:[%s9659_s13 + $0x70] sm:$0xff] }
0x27e7   : > { %v8101_v44 = vpack.c.bf16 %v7238_v52, %v7237_v5 }
0x27e9   : > { %8102 = vmatpush3.bf16.msra.mxu0 %v8101_v44 }
0x28af   : > { %v6676_v6 = vpop.f32.mrb[60].mxu0 }
0x28b0   : > { %v6677_v10 = vadd.f32 %v6676_v6, %v6605_v0  ;;  %v7928_v12 = vpop.f32.mrb[61].mxu0  ;;  %v6907_v0 = vrot.slane %v7242_v16, %v8800_v26 }
0x28b2   : > { %v6680_v23 = vadd.f32 %v6677_v10, %v9439_v35  ;;  %v7226_v35 = vld [vmem:[%s9657_s11 + $0x30] sm:$0xff] }
0x28b3   : > { %v8089_v54 = vpack.c.bf16 %v7227_v22, %v7226_v35 }
0x28b4   : > { %v6681_v25 = vsel %vm677_vm1, %v6680_v23, 0.0 }
0x28b5   : > { %6682 = vadd.xlane.f32.xlu0 %v6681_v25  ;;  %8090 = vmatpush3.bf16.msra.mxu1 %v8089_v54 }
0x2942   : > { %v6683_v13 = vpop.xlane.xlu0 %6682 }
0x2943   : > { %v6684_v14 = vmul.f32 0.03125, %v6683_v13 }
0x2945   : > { %v6685_v15 = vsub.f32 %v6680_v23, %v6684_v14 }
0x2947   : > { %v6686_v17 = vmul.f32 %v6685_v15, %v6685_v15 }
0x2949   : > { %v6687_v18 = vsel %vm677_vm1, %v6686_v17, 0.0 }
0x294a   : > { %6688 = vadd.xlane.f32.xlu1 %v6687_v18 }
0x29d7   : > { %v6689_v28 = vpop.xlane.xlu1 %6688 }
0x29d8   : > { %v6690_v38 = vmul.f32 0.03125, %v6689_v28 }
0x29da   : > { %v6691_v39 = vadd.f32 1e-06, %v6690_v38 }
0x29dc   : > { %8384 = vrsqrt.f32 %v6691_v39 }
0x29e6   : > { %v8385_v37 = vpop.eup %8384 }
0x29e7   : > { %v6693_v42 = vmul.f32 %v8385_v37, %v6685_v15 }
0x29e9   : > { %v6700_v43 = vmul.f32 %v6699_v41, %v6693_v42 }
0x29eb   : > { %v6705_v4 = vadd.f32 %v6704_v9, %v6700_v43 }
0x29ed   : > { %7938 = vmatmul.mubr.msk.f32.vlgmr.msra.gmra.mrb[74].mxu1 %vm677_vm1, %v6705_v4 }
0x2ac0   : > { %v6788_v45 = vpop.f32.mrb[74].mxu1 }
0x2ac1   : > { %v6789_v46 = vadd.f32 %v7229_v40, %v6788_v45  ;;  %v7939_v47 = vpop.f32.mrb[75].mxu1 }
0x2ac3   : > { %v6792_v21 = vmax.f32 %v6789_v46, 0.0 }
0x2ac5   : > { %7957 = vmatmul.mubr.msk.f32.vlgmr.msra.gmra.mrb[62].mxu0 %vm1738_vm6, %v6792_v21 }
0x2b98   : > { %v6879_v49 = vpop.f32.mrb[62].mxu0 }
0x2b99   : > { %v6880_v11 = vadd.f32 %v7240_v33, %v6879_v49  ;;  %v7958_v50 = vpop.f32.mrb[63].mxu0 }
0x2b9b   : > { %v6883_v51 = vadd.f32 %v6880_v11, %v6705_v4 }
0x2b9d   : > { %v6884_v61 = vsel %vm677_vm1, %v6883_v51, 0.0 }
0x2b9e   : > { %6885 = vadd.xlane.f32.xlu0 %v6884_v61 }
0x2c2b   : > { %v6886_v53 = vpop.xlane.xlu0 %6885 }
0x2c2c   : > { %v6887_v62 = vmul.f32 0.03125, %v6886_v53 }
0x2c2e   : > { %v6888_v55 = vsub.f32 %v6883_v51, %v6887_v62 }
0x2c30   : > { %v6889_v63 = vmul.f32 %v6888_v55, %v6888_v55 }
0x2c32   : > { %v6890_v56 = vsel %vm677_vm1, %v6889_v63, 0.0 }
0x2c33   : > { %6891 = vadd.xlane.f32.xlu0 %v6890_v56 }
0x2cc0   : > { %v6892_v59 = vpop.xlane.xlu0 %6891 }
0x2cc1   : > { %v6893_v60 = vmul.f32 0.03125, %v6892_v59 }
0x2cc3   : > { %v6894_v1 = vadd.f32 1e-06, %v6893_v60 }
0x2cc5   : > { %8386 = vrsqrt.f32 %v6894_v1 }
0x2ccf   : > { %v8387_v3 = vpop.eup %8386 }
0x2cd0   : > { %v6896_v58 = vmul.f32 %v8387_v3, %v6888_v55 }
0x2cd2   : > { %v6903_v6 = vmul.f32 %v6902_v2, %v6896_v58 }
0x2cd4   : > { %v6908_v10 = vadd.f32 %v6907_v0, %v6903_v6 }
0x2cd6   : > { %6909 = vst.msk [vmem:[%s616_s30] sm:$0xff] %vm677_vm1, %v6908_v10 }
0x2cd7   : > { %8401 = shalt.err (!%p8398_p3)
}
0x2cd8   : > { %s8402_s0 = scalar_lea.hbm %s9603_s16, 128  ;;  %s8406_s2 = scalar_lea.hbm %s9727_s5, 256 }
0x2cd9   : > { %p8403_p4 = scmp.ne.s32.totalorder %s9603_s16, %s8402_s0  ;;  %p8407_p9 = scmp.lt.u32.totalorder %s9603_s16, %s9727_s5 }
0x2cda   : > { %p8408_p10 = scmp.lt.u32.totalorder %s8406_s2, %s8402_s0  ;;  %p8410_p12 = scmp.lt.u32.totalorder %s8402_s0, %s9603_s16 }
0x2cdb   : > { %p8404_p7 = pnand %p8403_p4, %p8590_p5 }
0x2cdc   : > { %p8409_p11 = por %p8408_p10, %p8407_p9 }
0x2cdd   : > { %p8405_p8 = pneg %p8404_p7 }
0x2cde   : > { %p8411_p13 = por %p8410_p12, %p8409_p11 }
0x2ce0   : > { %p8412_p0 = pnand %p8411_p13, %p8405_p8 }
0x2ce2   : > { %8415 = shalt.err (!%p8412_p0)
}
0x2ce3   : > { %8103 = dma.vmem_to_hbm [thread:$0]  (%p8590_p5), %s9605_s20, 128, %s9603_s16, %s6911_s21  }
0x2ce4 PF: > { %s9728_s30 = sld [smem:[#allocation7_spill]]  ;;  %s9729_s29 = sld [smem:[#allocation5_spill]] }
0x2cea   : > { %p8109_p1 = scmp.ge.s32.totalorder %s9728_s30, 2  ;;  %s6936_s23 = sand.u32 1, %s9729_s29  }
0x2ceb   : > { %s6937_s24 = scalar_lea.sflag [#allocation3], %s6936_s23 }
0x2cec   : > { %p8106_p2 = pnand %p8109_p1, %p8594_p6 }
0x2cee   : > { %8433 = dma.done.wait (!%p8106_p2), %s6937_s24, 128  }
0x2cef   : > { %8435 = vsyncadd (!%p8106_p2), %s6937_s24, 4294967168  ;;  %s9731_s24 = sld [smem:[#allocation8_spill]]  ;;  %s9732_s25 = sld [smem:[#allocation6_spill]] }
0x2cf0   : > { %s9733_s23 = sld [smem:[#allocation9_spill]]  ;;  %s9734_s21 = smov %s8442_s22 }
0x2cf5   : > { %p26_p3 = scmp.ge.s32.totalorder %s9731_s24, 4   ;;  %s9735_s22 = smov %s9732_s25 }
0x2cf7   :  { %28 = sbr.rel (!%p26_p3) target bundleno = 10 (0xa), region = 164 }
0x2cfe   :  { %6942 = vsyncpa [#allocation3], 1 }
0x2cff   :  { %6944 = vsyncpa [#allocation3 + $0x1], 1 }

</bundles_post_ra>
